<compile_context>
chip_gen: v7x
topology: tpu7x:2x2x1
jax: 0.10.0
libtpu: 0.0.40
codegen_flags: <defaults>
</compile_context>

<pallas_src>
import jax
import jax.numpy as jnp
from jax.experimental import pallas as pl
from jax.experimental.pallas import tpu as pltpu

D_PWL = 16            # PiecewiseLinear resolution (d=16 in the reference)
NUM_PROPOSALS = 10    # CountModule.__init__ overrides num_proposals to 10
NUM_PWL = 8           # 8 PiecewiseLinear modules f[0..7]


def _count_kernel(boxes_ref, att_ref, cums_ref, wnext_ref, out_ref):
    """boxes_ref: (bb,4,n) VMEM, att_ref: (bb,n) VMEM,
    cums_ref/wnext_ref: (8, d+1) SMEM tables, out_ref: (bb, num_proposals+1) VMEM."""
    B = boxes_ref.shape[0]
    n = boxes_ref.shape[2]

    def pwl(x, m):
        # PiecewiseLinear.forward:
        #   out = cumsum[min(trunc(16x), 16)] + frac(16x) * normw[min(trunc(16x)+1, 16)]
        # INVARIANT: every input fed here is >= 0 (sigmoid products, 1-IoU,
        # 1-|att diff|, confidence means), so trunc(16x) >= 0 and exactly one
        # bucket mask fires per element.  wnext[k] == normw[min(k+1, 16)], so a
        # single shared mask gathers both tables.
        t = x * float(D_PWL)
        idx = t.astype(jnp.int32)                # trunc toward zero == torch .long()
        frac = t - idx.astype(jnp.float32)       # torch .frac()
        idx_c = jnp.minimum(idx, D_PWL)          # .clamp(max=d)
        cum_g = jnp.zeros_like(x)
        w_g = jnp.zeros_like(x)
        for k in range(D_PWL + 1):               # gather as 17-way shared select
            mask = idx_c == k
            cum_g = jnp.where(mask, cums_ref[m, k], cum_g)
            w_g = jnp.where(mask, wnext_ref[m, k], w_g)
        return cum_g + frac * w_g

    bx = boxes_ref[...]                          # (B,4,n)
    att = jax.nn.sigmoid(att_ref[...])           # F.sigmoid(attention), (B,n)

    # ---- outer product A = a_i * a_j ----------------------------------------
    A = att[:, :, None] * att[:, None, :]        # (B,n,n)

    # ---- pairwise IoU -> D = 1 - IoU ----------------------------------------
    a_min = bx[:, 0:2, :]                        # (B,2,n)
    a_max = bx[:, 2:4, :]                        # (B,2,n)
    pmin = jnp.maximum(a_min[:, :, :, None], a_min[:, :, None, :])   # (B,2,n,n)
    pmax = jnp.minimum(a_max[:, :, :, None], a_max[:, :, None, :])   # (B,2,n,n)
    ipts = jnp.maximum(pmax - pmin, 0.0)
    inter = ipts[:, 0, :, :] * ipts[:, 1, :, :]                      # (B,n,n)
    h = jnp.maximum(bx[:, 2, :] - bx[:, 0, :], 0.0)
    w_ = jnp.maximum(bx[:, 3, :] - bx[:, 1, :], 0.0)
    area = h * w_                                                    # (B,n)
    denom = area[:, :, None] + area[:, None, :] - inter + 1e-12
    iou = inter * pl.reciprocal(denom, approx=True)                  # EUP, VALU-free
    D = 1.0 - iou                                                    # (B,n,n)

    # ---- A_tilde --------------------------------------------------------------
    f0_A = pwl(A, 0)
    A_tilde = f0_A * pwl(D, 1)
    # NOTE: the reference's X = f3(A)*f4(D) only feeds outer_diff(X), which is
    # identically zero, so f2(1 - score_diff).prod(dim=1) == f2(1)**n.  X is
    # dead and dropped; its only effect is the scalar f2(1)**n factor below.

    # ---- deduplicate(X, att) --------------------------------------------------
    att_diff = jnp.abs(att[:, :, None] - att[:, None, :])            # (B,n,n)
    f2_one = cums_ref[2, D_PWL]                  # pwl(1.0, m=2) == cumsum[16]
    f2_pow = f2_one
    for _ in range(n - 1):                       # f2(1)**n on the scalar path
        f2_pow = f2_pow * f2_one
    sim_ij = pwl(1.0 - att_diff, 2) * f2_pow                         # (B,n,n)
    s_i = jnp.sum(sim_ij, axis=2)                                    # (B,n)
    s_st = s_i[:, :, None] * s_i[:, None, :]                         # (B,n,n)

    # ---- expected count -------------------------------------------------------
    # Reference has no epsilon on these divides either; approx reciprocal turns
    # a degenerate s_i -> 0 into a large finite value instead of inf.
    score = A_tilde * pl.reciprocal(s_st, approx=True)
    # correction = f0(att*att) / s_i; f0(att*att) is exactly the diagonal of f0(A).
    eye = (jax.lax.broadcasted_iota(jnp.int32, (n, n), 0) ==
           jax.lax.broadcasted_iota(jnp.int32, (n, n), 1))
    f0_diag = jnp.sum(jnp.where(eye[None, :, :], f0_A, 0.0), axis=2)  # (B,n)
    correction = f0_diag * pl.reciprocal(s_i, approx=True)            # (B,n)
    mod_E = (jnp.sum(jnp.sum(score, axis=2), axis=1, keepdims=True)
             + jnp.sum(correction, axis=1, keepdims=True))            # (B,1)
    c = jnp.sqrt(mod_E + 1e-20)                                       # (B,1)

    # ---- to_k_hot ------------------------------------------------------------
    c = jnp.clip(c, 0.0, float(NUM_PROPOSALS))
    ip = c.astype(jnp.int32)
    frac = c - ip.astype(jnp.float32)
    ip_l = jnp.minimum(ip, NUM_PROPOSALS)                            # (B,1)
    ip_r = jnp.minimum(ip + 1, NUM_PROPOSALS)                        # (B,1)
    cols = jax.lax.broadcasted_iota(jnp.int32, (B, NUM_PROPOSALS + 1), 1)
    left = (cols == ip_l).astype(jnp.float32)
    right = (cols == ip_r).astype(jnp.float32)
    o = (1.0 - frac) * left + frac * right                           # (B, 11)

    # ---- confidence gating ---------------------------------------------------
    p_a = jnp.abs(pwl(att, 5) - 0.5)                                 # (B,n)
    p_d = jnp.abs(pwl(D, 6) - 0.5)                                   # (B,n,n)
    arg = (jnp.mean(p_a, axis=1, keepdims=True)
           + jnp.mean(jnp.mean(p_d, axis=2), axis=1, keepdims=True)) # (B,1)
    o_tilde = pwl(arg, 7) * o                                        # (B, 11)

    out_ref[...] = o_tilde.astype(out_ref.dtype)


def prepare_pwl_tables(pwl_weights):
    """Hoisted parameter prep (recompute only when the 8x17 weights change).
    Returns (cums, wnext): cumulative-sum of normalized |w| and the shifted
    normalized-weight table wnext[k] = normw[min(k+1, d)]."""
    absw = jnp.abs(pwl_weights).astype(jnp.float32)
    normw = absw / jnp.sum(absw, axis=1, keepdims=True)
    cums = jnp.cumsum(normw, axis=1).astype(jnp.float32)
    wnext = jnp.concatenate([normw[:, 1:], normw[:, -1:]], axis=1).astype(jnp.float32)
    return cums, wnext


def count_module_forward(boxes, attention, pwl_tables):
    """boxes: (B,4,M) f32, attention: (B,M) f32, pwl_tables: (cums, wnext) each (8, d+1)."""
    cums, wnext = pwl_tables
    B = boxes.shape[0]
    n = NUM_PROPOSALS

    # filter_most_important: top-n by attention, gather boxes (plain-XLA glue).
    # torch uses sorted=False, but downstream math is permutation invariant.
    att_top, idx = jax.lax.top_k(attention, n)                       # (B,n)
    boxes_top = jnp.take_along_axis(
        boxes, jnp.broadcast_to(idx[:, None, :], (B, 4, n)), axis=2) # (B,4,n)

    # Batch-chunk grid: a single step at tiny B (no extra per-step overhead on
    # v5e/v6e), parallel chunks across both TensorCores on v7x for large B.
    bb = B if B <= 8 else 8
    grid = (pl.cdiv(B, bb),)

    return pl.pallas_call(
        _count_kernel,
        out_shape=jax.ShapeDtypeStruct((B, NUM_PROPOSALS + 1), jnp.float32),
        grid=grid,
        in_specs=[
            pl.BlockSpec((bb, 4, n), lambda i: (i, 0, 0)),                 # boxes_top
            pl.BlockSpec((bb, n), lambda i: (i, 0)),                       # att_top
            pl.BlockSpec(memory_space=pltpu.MemorySpace.SMEM),             # cumsum table
            pl.BlockSpec(memory_space=pltpu.MemorySpace.SMEM),             # shifted weights
        ],
        out_specs=pl.BlockSpec((bb, NUM_PROPOSALS + 1), lambda i: (i, 0)),
        compiler_params=pltpu.CompilerParams(
            dimension_semantics=("parallel",)),
    )(boxes_top, att_top, cums, wnext)


if __name__ == "__main__":
    key = jax.random.PRNGKey(0)
    B, M = 2, 16
    k1, k2, k3 = jax.random.split(key, 3)

    # Well-formed boxes: (B,4,M) with [y1,x1,y2,x2] and y2>=y1, x2>=x1.
    p_min = jax.random.uniform(k1, (B, 2, M), minval=0.0, maxval=0.5)
    size = jax.random.uniform(k2, (B, 2, M), minval=0.05, maxval=0.5)
    boxes = jnp.concatenate([p_min, p_min + size], axis=1).astype(jnp.float32)

    attention = jax.random.normal(k3, (B, M), dtype=jnp.float32)

    # Deterministic PiecewiseLinear init: ones(d+1) with weight[0] = 0, all 8 modules.
    pwl_w = jnp.ones((NUM_PWL, D_PWL + 1), jnp.float32).at[:, 0].set(0.0)
    tables = prepare_pwl_tables(pwl_w)   # hoisted out of the forward path

    out = count_module_forward(boxes, attention, tables)
    jax.block_until_ready(out)
    assert out.shape == (B, NUM_PROPOSALS + 1)
    print("KERNEL_OK")
</pallas_src>

<mosaic_0001>
module attributes {stable_mosaic.version = 11 : i64} {
  func.func @_count_kernel(%arg0: i32, %arg1: memref<2x4x10xf32, #tpu.memory_space<vmem>>, %arg2: memref<2x10xf32, #tpu.memory_space<vmem>>, %arg3: memref<8x17xf32, #tpu.memory_space<smem>>, %arg4: memref<8x17xf32, #tpu.memory_space<smem>>, %arg5: memref<2x11xf32, #tpu.memory_space<vmem>>) attributes {dimension_semantics = [#tpu.dimension_semantics<parallel>], iteration_bounds = array<i64: 1>, scalar_prefetch = 0 : i64, scratch_operands = 0 : i64, tpu.core_type = #tpu.core_type<tc>, window_params = [{transform_indices = @transform_0, window_bounds = array<i64: 2, 4, 10>}, {transform_indices = @transform_1, window_bounds = array<i64: 2, 10>}, {transform_indices = @transform_2, window_bounds = array<i64: 8, 17>}, {transform_indices = @transform_3, window_bounds = array<i64: 8, 17>}, {transform_indices = @transform_4, window_bounds = array<i64: 2, 11>}]} {
    %c0 = arith.constant 0 : index
    %c0_0 = arith.constant 0 : index
    %c0_1 = arith.constant 0 : index
    %0 = vector.load %arg1[%c0, %c0_0, %c0_1] : memref<2x4x10xf32, #tpu.memory_space<vmem>>, vector<2x4x10xf32>
    %c0_2 = arith.constant 0 : index
    %c0_3 = arith.constant 0 : index
    %1 = vector.load %arg2[%c0_2, %c0_3] : memref<2x10xf32, #tpu.memory_space<vmem>>, vector<2x10xf32>
    %2 = arith.negf %1 : vector<2x10xf32>
    %3 = math.exp %2 : vector<2x10xf32>
    %cst = arith.constant 1.000000e+00 : f32
    %4 = vector.broadcast %cst : f32 to vector<2x10xf32>
    %5 = arith.addf %4, %3 : vector<2x10xf32>
    %6 = arith.divf %4, %5 : vector<2x10xf32>
    %7 = vector.shape_cast %6 : vector<2x10xf32> to vector<2x10x1xf32>
    %8 = vector.shape_cast %6 : vector<2x10xf32> to vector<2x1x10xf32>
    %9 = vector.broadcast %7 : vector<2x10x1xf32> to vector<2x10x10xf32>
    %10 = vector.broadcast %8 : vector<2x1x10xf32> to vector<2x10x10xf32>
    %11 = arith.mulf %9, %10 : vector<2x10x10xf32>
    %12 = vector.extract_strided_slice %0 {offsets = [0, 0, 0], sizes = [2, 2, 10], strides = [1, 1, 1]} : vector<2x4x10xf32> to vector<2x2x10xf32>
    %13 = vector.extract_strided_slice %0 {offsets = [0, 2, 0], sizes = [2, 2, 10], strides = [1, 1, 1]} : vector<2x4x10xf32> to vector<2x2x10xf32>
    %14 = vector.shape_cast %12 : vector<2x2x10xf32> to vector<2x2x10x1xf32>
    %15 = vector.shape_cast %12 : vector<2x2x10xf32> to vector<2x2x1x10xf32>
    %16 = vector.broadcast %14 : vector<2x2x10x1xf32> to vector<2x2x10x10xf32>
    %17 = vector.broadcast %15 : vector<2x2x1x10xf32> to vector<2x2x10x10xf32>
    %18 = arith.maximumf %16, %17 : vector<2x2x10x10xf32>
    %19 = vector.shape_cast %13 : vector<2x2x10xf32> to vector<2x2x10x1xf32>
    %20 = vector.shape_cast %13 : vector<2x2x10xf32> to vector<2x2x1x10xf32>
    %21 = vector.broadcast %19 : vector<2x2x10x1xf32> to vector<2x2x10x10xf32>
    %22 = vector.broadcast %20 : vector<2x2x1x10xf32> to vector<2x2x10x10xf32>
    %23 = arith.minimumf %21, %22 : vector<2x2x10x10xf32>
    %24 = arith.subf %23, %18 : vector<2x2x10x10xf32>
    %cst_4 = arith.constant 0.000000e+00 : f32
    %25 = vector.broadcast %cst_4 : f32 to vector<2x2x10x10xf32>
    %26 = arith.maximumf %24, %25 : vector<2x2x10x10xf32>
    %27 = vector.extract_strided_slice %26 {offsets = [0, 0, 0, 0], sizes = [2, 1, 10, 10], strides = [1, 1, 1, 1]} : vector<2x2x10x10xf32> to vector<2x1x10x10xf32>
    %28 = vector.shape_cast %27 : vector<2x1x10x10xf32> to vector<2x10x10xf32>
    %29 = vector.extract_strided_slice %26 {offsets = [0, 1, 0, 0], sizes = [2, 1, 10, 10], strides = [1, 1, 1, 1]} : vector<2x2x10x10xf32> to vector<2x1x10x10xf32>
    %30 = vector.shape_cast %29 : vector<2x1x10x10xf32> to vector<2x10x10xf32>
    %31 = arith.mulf %28, %30 : vector<2x10x10xf32>
    %32 = vector.extract_strided_slice %0 {offsets = [0, 2, 0], sizes = [2, 1, 10], strides = [1, 1, 1]} : vector<2x4x10xf32> to vector<2x1x10xf32>
    %33 = vector.shape_cast %32 : vector<2x1x10xf32> to vector<2x10xf32>
    %34 = vector.extract_strided_slice %0 {offsets = [0, 0, 0], sizes = [2, 1, 10], strides = [1, 1, 1]} : vector<2x4x10xf32> to vector<2x1x10xf32>
    %35 = vector.shape_cast %34 : vector<2x1x10xf32> to vector<2x10xf32>
    %36 = arith.subf %33, %35 : vector<2x10xf32>
    %cst_5 = arith.constant 0.000000e+00 : f32
    %37 = vector.broadcast %cst_5 : f32 to vector<2x10xf32>
    %38 = arith.maximumf %36, %37 : vector<2x10xf32>
    %39 = vector.extract_strided_slice %0 {offsets = [0, 3, 0], sizes = [2, 1, 10], strides = [1, 1, 1]} : vector<2x4x10xf32> to vector<2x1x10xf32>
    %40 = vector.shape_cast %39 : vector<2x1x10xf32> to vector<2x10xf32>
    %41 = vector.extract_strided_slice %0 {offsets = [0, 1, 0], sizes = [2, 1, 10], strides = [1, 1, 1]} : vector<2x4x10xf32> to vector<2x1x10xf32>
    %42 = vector.shape_cast %41 : vector<2x1x10xf32> to vector<2x10xf32>
    %43 = arith.subf %40, %42 : vector<2x10xf32>
    %cst_6 = arith.constant 0.000000e+00 : f32
    %44 = vector.broadcast %cst_6 : f32 to vector<2x10xf32>
    %45 = arith.maximumf %43, %44 : vector<2x10xf32>
    %46 = arith.mulf %38, %45 : vector<2x10xf32>
    %47 = vector.shape_cast %46 : vector<2x10xf32> to vector<2x10x1xf32>
    %48 = vector.shape_cast %46 : vector<2x10xf32> to vector<2x1x10xf32>
    %49 = vector.broadcast %47 : vector<2x10x1xf32> to vector<2x10x10xf32>
    %50 = vector.broadcast %48 : vector<2x1x10xf32> to vector<2x10x10xf32>
    %51 = arith.addf %49, %50 : vector<2x10x10xf32>
    %52 = arith.subf %51, %31 : vector<2x10x10xf32>
    %cst_7 = arith.constant 9.99999996E-13 : f32
    %53 = vector.broadcast %cst_7 : f32 to vector<2x10x10xf32>
    %54 = arith.addf %52, %53 : vector<2x10x10xf32>
    %55 = tpu.reciprocal %54 {approx = true} : vector<2x10x10xf32> -> vector<2x10x10xf32>
    %56 = arith.mulf %31, %55 : vector<2x10x10xf32>
    %cst_8 = arith.constant 1.000000e+00 : f32
    %57 = vector.broadcast %cst_8 : f32 to vector<2x10x10xf32>
    %58 = arith.subf %57, %56 : vector<2x10x10xf32>
    %cst_9 = arith.constant 1.600000e+01 : f32
    %59 = vector.broadcast %cst_9 : f32 to vector<2x10x10xf32>
    %60 = arith.mulf %11, %59 : vector<2x10x10xf32>
    %61 = arith.fptosi %60 : vector<2x10x10xf32> to vector<2x10x10xi32>
    %62 = arith.sitofp %61 : vector<2x10x10xi32> to vector<2x10x10xf32>
    %63 = arith.subf %60, %62 : vector<2x10x10xf32>
    %c16_i32 = arith.constant 16 : i32
    %64 = vector.broadcast %c16_i32 : i32 to vector<2x10x10xi32>
    %65 = arith.minsi %61, %64 : vector<2x10x10xi32>
    %cst_10 = arith.constant 0.000000e+00 : f32
    %66 = vector.broadcast %cst_10 : f32 to vector<2x10x10xf32>
    %cst_11 = arith.constant 0.000000e+00 : f32
    %67 = vector.broadcast %cst_11 : f32 to vector<2x10x10xf32>
    %c0_i32 = arith.constant 0 : i32
    %68 = vector.broadcast %c0_i32 : i32 to vector<2x10x10xi32>
    %69 = arith.cmpi eq, %65, %68 : vector<2x10x10xi32>
    %c0_12 = arith.constant 0 : index
    %c0_13 = arith.constant 0 : index
    %70 = memref.load %arg3[%c0_12, %c0_13] : memref<8x17xf32, #tpu.memory_space<smem>>
    %71 = vector.broadcast %70 : f32 to vector<2x10x10xf32>
    %72 = arith.select %69, %71, %66 : vector<2x10x10xi1>, vector<2x10x10xf32>
    %c0_14 = arith.constant 0 : index
    %c0_15 = arith.constant 0 : index
    %73 = memref.load %arg4[%c0_14, %c0_15] : memref<8x17xf32, #tpu.memory_space<smem>>
    %74 = vector.broadcast %73 : f32 to vector<2x10x10xf32>
    %75 = arith.select %69, %74, %67 : vector<2x10x10xi1>, vector<2x10x10xf32>
    %c1_i32 = arith.constant 1 : i32
    %76 = vector.broadcast %c1_i32 : i32 to vector<2x10x10xi32>
    %77 = arith.cmpi eq, %65, %76 : vector<2x10x10xi32>
    %c0_16 = arith.constant 0 : index
    %c1 = arith.constant 1 : index
    %78 = memref.load %arg3[%c0_16, %c1] : memref<8x17xf32, #tpu.memory_space<smem>>
    %79 = vector.broadcast %78 : f32 to vector<2x10x10xf32>
    %80 = arith.select %77, %79, %72 : vector<2x10x10xi1>, vector<2x10x10xf32>
    %c0_17 = arith.constant 0 : index
    %c1_18 = arith.constant 1 : index
    %81 = memref.load %arg4[%c0_17, %c1_18] : memref<8x17xf32, #tpu.memory_space<smem>>
    %82 = vector.broadcast %81 : f32 to vector<2x10x10xf32>
    %83 = arith.select %77, %82, %75 : vector<2x10x10xi1>, vector<2x10x10xf32>
    %c2_i32 = arith.constant 2 : i32
    %84 = vector.broadcast %c2_i32 : i32 to vector<2x10x10xi32>
    %85 = arith.cmpi eq, %65, %84 : vector<2x10x10xi32>
    %c0_19 = arith.constant 0 : index
    %c2 = arith.constant 2 : index
    %86 = memref.load %arg3[%c0_19, %c2] : memref<8x17xf32, #tpu.memory_space<smem>>
    %87 = vector.broadcast %86 : f32 to vector<2x10x10xf32>
    %88 = arith.select %85, %87, %80 : vector<2x10x10xi1>, vector<2x10x10xf32>
    %c0_20 = arith.constant 0 : index
    %c2_21 = arith.constant 2 : index
    %89 = memref.load %arg4[%c0_20, %c2_21] : memref<8x17xf32, #tpu.memory_space<smem>>
    %90 = vector.broadcast %89 : f32 to vector<2x10x10xf32>
    %91 = arith.select %85, %90, %83 : vector<2x10x10xi1>, vector<2x10x10xf32>
    %c3_i32 = arith.constant 3 : i32
    %92 = vector.broadcast %c3_i32 : i32 to vector<2x10x10xi32>
    %93 = arith.cmpi eq, %65, %92 : vector<2x10x10xi32>
    %c0_22 = arith.constant 0 : index
    %c3 = arith.constant 3 : index
    %94 = memref.load %arg3[%c0_22, %c3] : memref<8x17xf32, #tpu.memory_space<smem>>
    %95 = vector.broadcast %94 : f32 to vector<2x10x10xf32>
    %96 = arith.select %93, %95, %88 : vector<2x10x10xi1>, vector<2x10x10xf32>
    %c0_23 = arith.constant 0 : index
    %c3_24 = arith.constant 3 : index
    %97 = memref.load %arg4[%c0_23, %c3_24] : memref<8x17xf32, #tpu.memory_space<smem>>
    %98 = vector.broadcast %97 : f32 to vector<2x10x10xf32>
    %99 = arith.select %93, %98, %91 : vector<2x10x10xi1>, vector<2x10x10xf32>
    %c4_i32 = arith.constant 4 : i32
    %100 = vector.broadcast %c4_i32 : i32 to vector<2x10x10xi32>
    %101 = arith.cmpi eq, %65, %100 : vector<2x10x10xi32>
    %c0_25 = arith.constant 0 : index
    %c4 = arith.constant 4 : index
    %102 = memref.load %arg3[%c0_25, %c4] : memref<8x17xf32, #tpu.memory_space<smem>>
    %103 = vector.broadcast %102 : f32 to vector<2x10x10xf32>
    %104 = arith.select %101, %103, %96 : vector<2x10x10xi1>, vector<2x10x10xf32>
    %c0_26 = arith.constant 0 : index
    %c4_27 = arith.constant 4 : index
    %105 = memref.load %arg4[%c0_26, %c4_27] : memref<8x17xf32, #tpu.memory_space<smem>>
    %106 = vector.broadcast %105 : f32 to vector<2x10x10xf32>
    %107 = arith.select %101, %106, %99 : vector<2x10x10xi1>, vector<2x10x10xf32>
    %c5_i32 = arith.constant 5 : i32
    %108 = vector.broadcast %c5_i32 : i32 to vector<2x10x10xi32>
    %109 = arith.cmpi eq, %65, %108 : vector<2x10x10xi32>
    %c0_28 = arith.constant 0 : index
    %c5 = arith.constant 5 : index
    %110 = memref.load %arg3[%c0_28, %c5] : memref<8x17xf32, #tpu.memory_space<smem>>
    %111 = vector.broadcast %110 : f32 to vector<2x10x10xf32>
    %112 = arith.select %109, %111, %104 : vector<2x10x10xi1>, vector<2x10x10xf32>
    %c0_29 = arith.constant 0 : index
    %c5_30 = arith.constant 5 : index
    %113 = memref.load %arg4[%c0_29, %c5_30] : memref<8x17xf32, #tpu.memory_space<smem>>
    %114 = vector.broadcast %113 : f32 to vector<2x10x10xf32>
    %115 = arith.select %109, %114, %107 : vector<2x10x10xi1>, vector<2x10x10xf32>
    %c6_i32 = arith.constant 6 : i32
    %116 = vector.broadcast %c6_i32 : i32 to vector<2x10x10xi32>
    %117 = arith.cmpi eq, %65, %116 : vector<2x10x10xi32>
    %c0_31 = arith.constant 0 : index
    %c6 = arith.constant 6 : index
    %118 = memref.load %arg3[%c0_31, %c6] : memref<8x17xf32, #tpu.memory_space<smem>>
    %119 = vector.broadcast %118 : f32 to vector<2x10x10xf32>
    %120 = arith.select %117, %119, %112 : vector<2x10x10xi1>, vector<2x10x10xf32>
    %c0_32 = arith.constant 0 : index
    %c6_33 = arith.constant 6 : index
    %121 = memref.load %arg4[%c0_32, %c6_33] : memref<8x17xf32, #tpu.memory_space<smem>>
    %122 = vector.broadcast %121 : f32 to vector<2x10x10xf32>
    %123 = arith.select %117, %122, %115 : vector<2x10x10xi1>, vector<2x10x10xf32>
    %c7_i32 = arith.constant 7 : i32
    %124 = vector.broadcast %c7_i32 : i32 to vector<2x10x10xi32>
    %125 = arith.cmpi eq, %65, %124 : vector<2x10x10xi32>
    %c0_34 = arith.constant 0 : index
    %c7 = arith.constant 7 : index
    %126 = memref.load %arg3[%c0_34, %c7] : memref<8x17xf32, #tpu.memory_space<smem>>
    %127 = vector.broadcast %126 : f32 to vector<2x10x10xf32>
    %128 = arith.select %125, %127, %120 : vector<2x10x10xi1>, vector<2x10x10xf32>
    %c0_35 = arith.constant 0 : index
    %c7_36 = arith.constant 7 : index
    %129 = memref.load %arg4[%c0_35, %c7_36] : memref<8x17xf32, #tpu.memory_space<smem>>
    %130 = vector.broadcast %129 : f32 to vector<2x10x10xf32>
    %131 = arith.select %125, %130, %123 : vector<2x10x10xi1>, vector<2x10x10xf32>
    %c8_i32 = arith.constant 8 : i32
    %132 = vector.broadcast %c8_i32 : i32 to vector<2x10x10xi32>
    %133 = arith.cmpi eq, %65, %132 : vector<2x10x10xi32>
    %c0_37 = arith.constant 0 : index
    %c8 = arith.constant 8 : index
    %134 = memref.load %arg3[%c0_37, %c8] : memref<8x17xf32, #tpu.memory_space<smem>>
    %135 = vector.broadcast %134 : f32 to vector<2x10x10xf32>
    %136 = arith.select %133, %135, %128 : vector<2x10x10xi1>, vector<2x10x10xf32>
    %c0_38 = arith.constant 0 : index
    %c8_39 = arith.constant 8 : index
    %137 = memref.load %arg4[%c0_38, %c8_39] : memref<8x17xf32, #tpu.memory_space<smem>>
    %138 = vector.broadcast %137 : f32 to vector<2x10x10xf32>
    %139 = arith.select %133, %138, %131 : vector<2x10x10xi1>, vector<2x10x10xf32>
    %c9_i32 = arith.constant 9 : i32
    %140 = vector.broadcast %c9_i32 : i32 to vector<2x10x10xi32>
    %141 = arith.cmpi eq, %65, %140 : vector<2x10x10xi32>
    %c0_40 = arith.constant 0 : index
    %c9 = arith.constant 9 : index
    %142 = memref.load %arg3[%c0_40, %c9] : memref<8x17xf32, #tpu.memory_space<smem>>
    %143 = vector.broadcast %142 : f32 to vector<2x10x10xf32>
    %144 = arith.select %141, %143, %136 : vector<2x10x10xi1>, vector<2x10x10xf32>
    %c0_41 = arith.constant 0 : index
    %c9_42 = arith.constant 9 : index
    %145 = memref.load %arg4[%c0_41, %c9_42] : memref<8x17xf32, #tpu.memory_space<smem>>
    %146 = vector.broadcast %145 : f32 to vector<2x10x10xf32>
    %147 = arith.select %141, %146, %139 : vector<2x10x10xi1>, vector<2x10x10xf32>
    %c10_i32 = arith.constant 10 : i32
    %148 = vector.broadcast %c10_i32 : i32 to vector<2x10x10xi32>
    %149 = arith.cmpi eq, %65, %148 : vector<2x10x10xi32>
    %c0_43 = arith.constant 0 : index
    %c10 = arith.constant 10 : index
    %150 = memref.load %arg3[%c0_43, %c10] : memref<8x17xf32, #tpu.memory_space<smem>>
    %151 = vector.broadcast %150 : f32 to vector<2x10x10xf32>
    %152 = arith.select %149, %151, %144 : vector<2x10x10xi1>, vector<2x10x10xf32>
    %c0_44 = arith.constant 0 : index
    %c10_45 = arith.constant 10 : index
    %153 = memref.load %arg4[%c0_44, %c10_45] : memref<8x17xf32, #tpu.memory_space<smem>>
    %154 = vector.broadcast %153 : f32 to vector<2x10x10xf32>
    %155 = arith.select %149, %154, %147 : vector<2x10x10xi1>, vector<2x10x10xf32>
    %c11_i32 = arith.constant 11 : i32
    %156 = vector.broadcast %c11_i32 : i32 to vector<2x10x10xi32>
    %157 = arith.cmpi eq, %65, %156 : vector<2x10x10xi32>
    %c0_46 = arith.constant 0 : index
    %c11 = arith.constant 11 : index
    %158 = memref.load %arg3[%c0_46, %c11] : memref<8x17xf32, #tpu.memory_space<smem>>
    %159 = vector.broadcast %158 : f32 to vector<2x10x10xf32>
    %160 = arith.select %157, %159, %152 : vector<2x10x10xi1>, vector<2x10x10xf32>
    %c0_47 = arith.constant 0 : index
    %c11_48 = arith.constant 11 : index
    %161 = memref.load %arg4[%c0_47, %c11_48] : memref<8x17xf32, #tpu.memory_space<smem>>
    %162 = vector.broadcast %161 : f32 to vector<2x10x10xf32>
    %163 = arith.select %157, %162, %155 : vector<2x10x10xi1>, vector<2x10x10xf32>
    %c12_i32 = arith.constant 12 : i32
    %164 = vector.broadcast %c12_i32 : i32 to vector<2x10x10xi32>
    %165 = arith.cmpi eq, %65, %164 : vector<2x10x10xi32>
    %c0_49 = arith.constant 0 : index
    %c12 = arith.constant 12 : index
    %166 = memref.load %arg3[%c0_49, %c12] : memref<8x17xf32, #tpu.memory_space<smem>>
    %167 = vector.broadcast %166 : f32 to vector<2x10x10xf32>
    %168 = arith.select %165, %167, %160 : vector<2x10x10xi1>, vector<2x10x10xf32>
    %c0_50 = arith.constant 0 : index
    %c12_51 = arith.constant 12 : index
    %169 = memref.load %arg4[%c0_50, %c12_51] : memref<8x17xf32, #tpu.memory_space<smem>>
    %170 = vector.broadcast %169 : f32 to vector<2x10x10xf32>
    %171 = arith.select %165, %170, %163 : vector<2x10x10xi1>, vector<2x10x10xf32>
    %c13_i32 = arith.constant 13 : i32
    %172 = vector.broadcast %c13_i32 : i32 to vector<2x10x10xi32>
    %173 = arith.cmpi eq, %65, %172 : vector<2x10x10xi32>
    %c0_52 = arith.constant 0 : index
    %c13 = arith.constant 13 : index
    %174 = memref.load %arg3[%c0_52, %c13] : memref<8x17xf32, #tpu.memory_space<smem>>
    %175 = vector.broadcast %174 : f32 to vector<2x10x10xf32>
    %176 = arith.select %173, %175, %168 : vector<2x10x10xi1>, vector<2x10x10xf32>
    %c0_53 = arith.constant 0 : index
    %c13_54 = arith.constant 13 : index
    %177 = memref.load %arg4[%c0_53, %c13_54] : memref<8x17xf32, #tpu.memory_space<smem>>
    %178 = vector.broadcast %177 : f32 to vector<2x10x10xf32>
    %179 = arith.select %173, %178, %171 : vector<2x10x10xi1>, vector<2x10x10xf32>
    %c14_i32 = arith.constant 14 : i32
    %180 = vector.broadcast %c14_i32 : i32 to vector<2x10x10xi32>
    %181 = arith.cmpi eq, %65, %180 : vector<2x10x10xi32>
    %c0_55 = arith.constant 0 : index
    %c14 = arith.constant 14 : index
    %182 = memref.load %arg3[%c0_55, %c14] : memref<8x17xf32, #tpu.memory_space<smem>>
    %183 = vector.broadcast %182 : f32 to vector<2x10x10xf32>
    %184 = arith.select %181, %183, %176 : vector<2x10x10xi1>, vector<2x10x10xf32>
    %c0_56 = arith.constant 0 : index
    %c14_57 = arith.constant 14 : index
    %185 = memref.load %arg4[%c0_56, %c14_57] : memref<8x17xf32, #tpu.memory_space<smem>>
    %186 = vector.broadcast %185 : f32 to vector<2x10x10xf32>
    %187 = arith.select %181, %186, %179 : vector<2x10x10xi1>, vector<2x10x10xf32>
    %c15_i32 = arith.constant 15 : i32
    %188 = vector.broadcast %c15_i32 : i32 to vector<2x10x10xi32>
    %189 = arith.cmpi eq, %65, %188 : vector<2x10x10xi32>
    %c0_58 = arith.constant 0 : index
    %c15 = arith.constant 15 : index
    %190 = memref.load %arg3[%c0_58, %c15] : memref<8x17xf32, #tpu.memory_space<smem>>
    %191 = vector.broadcast %190 : f32 to vector<2x10x10xf32>
    %192 = arith.select %189, %191, %184 : vector<2x10x10xi1>, vector<2x10x10xf32>
    %c0_59 = arith.constant 0 : index
    %c15_60 = arith.constant 15 : index
    %193 = memref.load %arg4[%c0_59, %c15_60] : memref<8x17xf32, #tpu.memory_space<smem>>
    %194 = vector.broadcast %193 : f32 to vector<2x10x10xf32>
    %195 = arith.select %189, %194, %187 : vector<2x10x10xi1>, vector<2x10x10xf32>
    %c16_i32_61 = arith.constant 16 : i32
    %196 = vector.broadcast %c16_i32_61 : i32 to vector<2x10x10xi32>
    %197 = arith.cmpi eq, %65, %196 : vector<2x10x10xi32>
    %c0_62 = arith.constant 0 : index
    %c16 = arith.constant 16 : index
    %198 = memref.load %arg3[%c0_62, %c16] : memref<8x17xf32, #tpu.memory_space<smem>>
    %199 = vector.broadcast %198 : f32 to vector<2x10x10xf32>
    %200 = arith.select %197, %199, %192 : vector<2x10x10xi1>, vector<2x10x10xf32>
    %c0_63 = arith.constant 0 : index
    %c16_64 = arith.constant 16 : index
    %201 = memref.load %arg4[%c0_63, %c16_64] : memref<8x17xf32, #tpu.memory_space<smem>>
    %202 = vector.broadcast %201 : f32 to vector<2x10x10xf32>
    %203 = arith.select %197, %202, %195 : vector<2x10x10xi1>, vector<2x10x10xf32>
    %204 = arith.mulf %63, %203 : vector<2x10x10xf32>
    %205 = arith.addf %200, %204 : vector<2x10x10xf32>
    %cst_65 = arith.constant 1.600000e+01 : f32
    %206 = vector.broadcast %cst_65 : f32 to vector<2x10x10xf32>
    %207 = arith.mulf %58, %206 : vector<2x10x10xf32>
    %208 = arith.fptosi %207 : vector<2x10x10xf32> to vector<2x10x10xi32>
    %209 = arith.sitofp %208 : vector<2x10x10xi32> to vector<2x10x10xf32>
    %210 = arith.subf %207, %209 : vector<2x10x10xf32>
    %c16_i32_66 = arith.constant 16 : i32
    %211 = vector.broadcast %c16_i32_66 : i32 to vector<2x10x10xi32>
    %212 = arith.minsi %208, %211 : vector<2x10x10xi32>
    %cst_67 = arith.constant 0.000000e+00 : f32
    %213 = vector.broadcast %cst_67 : f32 to vector<2x10x10xf32>
    %cst_68 = arith.constant 0.000000e+00 : f32
    %214 = vector.broadcast %cst_68 : f32 to vector<2x10x10xf32>
    %c0_i32_69 = arith.constant 0 : i32
    %215 = vector.broadcast %c0_i32_69 : i32 to vector<2x10x10xi32>
    %216 = arith.cmpi eq, %212, %215 : vector<2x10x10xi32>
    %c1_70 = arith.constant 1 : index
    %c0_71 = arith.constant 0 : index
    %217 = memref.load %arg3[%c1_70, %c0_71] : memref<8x17xf32, #tpu.memory_space<smem>>
    %218 = vector.broadcast %217 : f32 to vector<2x10x10xf32>
    %219 = arith.select %216, %218, %213 : vector<2x10x10xi1>, vector<2x10x10xf32>
    %c1_72 = arith.constant 1 : index
    %c0_73 = arith.constant 0 : index
    %220 = memref.load %arg4[%c1_72, %c0_73] : memref<8x17xf32, #tpu.memory_space<smem>>
    %221 = vector.broadcast %220 : f32 to vector<2x10x10xf32>
    %222 = arith.select %216, %221, %214 : vector<2x10x10xi1>, vector<2x10x10xf32>
    %c1_i32_74 = arith.constant 1 : i32
    %223 = vector.broadcast %c1_i32_74 : i32 to vector<2x10x10xi32>
    %224 = arith.cmpi eq, %212, %223 : vector<2x10x10xi32>
    %c1_75 = arith.constant 1 : index
    %c1_76 = arith.constant 1 : index
    %225 = memref.load %arg3[%c1_75, %c1_76] : memref<8x17xf32, #tpu.memory_space<smem>>
    %226 = vector.broadcast %225 : f32 to vector<2x10x10xf32>
    %227 = arith.select %224, %226, %219 : vector<2x10x10xi1>, vector<2x10x10xf32>
    %c1_77 = arith.constant 1 : index
    %c1_78 = arith.constant 1 : index
    %228 = memref.load %arg4[%c1_77, %c1_78] : memref<8x17xf32, #tpu.memory_space<smem>>
    %229 = vector.broadcast %228 : f32 to vector<2x10x10xf32>
    %230 = arith.select %224, %229, %222 : vector<2x10x10xi1>, vector<2x10x10xf32>
    %c2_i32_79 = arith.constant 2 : i32
    %231 = vector.broadcast %c2_i32_79 : i32 to vector<2x10x10xi32>
    %232 = arith.cmpi eq, %212, %231 : vector<2x10x10xi32>
    %c1_80 = arith.constant 1 : index
    %c2_81 = arith.constant 2 : index
    %233 = memref.load %arg3[%c1_80, %c2_81] : memref<8x17xf32, #tpu.memory_space<smem>>
    %234 = vector.broadcast %233 : f32 to vector<2x10x10xf32>
    %235 = arith.select %232, %234, %227 : vector<2x10x10xi1>, vector<2x10x10xf32>
    %c1_82 = arith.constant 1 : index
    %c2_83 = arith.constant 2 : index
    %236 = memref.load %arg4[%c1_82, %c2_83] : memref<8x17xf32, #tpu.memory_space<smem>>
    %237 = vector.broadcast %236 : f32 to vector<2x10x10xf32>
    %238 = arith.select %232, %237, %230 : vector<2x10x10xi1>, vector<2x10x10xf32>
    %c3_i32_84 = arith.constant 3 : i32
    %239 = vector.broadcast %c3_i32_84 : i32 to vector<2x10x10xi32>
    %240 = arith.cmpi eq, %212, %239 : vector<2x10x10xi32>
    %c1_85 = arith.constant 1 : index
    %c3_86 = arith.constant 3 : index
    %241 = memref.load %arg3[%c1_85, %c3_86] : memref<8x17xf32, #tpu.memory_space<smem>>
    %242 = vector.broadcast %241 : f32 to vector<2x10x10xf32>
    %243 = arith.select %240, %242, %235 : vector<2x10x10xi1>, vector<2x10x10xf32>
    %c1_87 = arith.constant 1 : index
    %c3_88 = arith.constant 3 : index
    %244 = memref.load %arg4[%c1_87, %c3_88] : memref<8x17xf32, #tpu.memory_space<smem>>
    %245 = vector.broadcast %244 : f32 to vector<2x10x10xf32>
    %246 = arith.select %240, %245, %238 : vector<2x10x10xi1>, vector<2x10x10xf32>
    %c4_i32_89 = arith.constant 4 : i32
    %247 = vector.broadcast %c4_i32_89 : i32 to vector<2x10x10xi32>
    %248 = arith.cmpi eq, %212, %247 : vector<2x10x10xi32>
    %c1_90 = arith.constant 1 : index
    %c4_91 = arith.constant 4 : index
    %249 = memref.load %arg3[%c1_90, %c4_91] : memref<8x17xf32, #tpu.memory_space<smem>>
    %250 = vector.broadcast %249 : f32 to vector<2x10x10xf32>
    %251 = arith.select %248, %250, %243 : vector<2x10x10xi1>, vector<2x10x10xf32>
    %c1_92 = arith.constant 1 : index
    %c4_93 = arith.constant 4 : index
    %252 = memref.load %arg4[%c1_92, %c4_93] : memref<8x17xf32, #tpu.memory_space<smem>>
    %253 = vector.broadcast %252 : f32 to vector<2x10x10xf32>
    %254 = arith.select %248, %253, %246 : vector<2x10x10xi1>, vector<2x10x10xf32>
    %c5_i32_94 = arith.constant 5 : i32
    %255 = vector.broadcast %c5_i32_94 : i32 to vector<2x10x10xi32>
    %256 = arith.cmpi eq, %212, %255 : vector<2x10x10xi32>
    %c1_95 = arith.constant 1 : index
    %c5_96 = arith.constant 5 : index
    %257 = memref.load %arg3[%c1_95, %c5_96] : memref<8x17xf32, #tpu.memory_space<smem>>
    %258 = vector.broadcast %257 : f32 to vector<2x10x10xf32>
    %259 = arith.select %256, %258, %251 : vector<2x10x10xi1>, vector<2x10x10xf32>
    %c1_97 = arith.constant 1 : index
    %c5_98 = arith.constant 5 : index
    %260 = memref.load %arg4[%c1_97, %c5_98] : memref<8x17xf32, #tpu.memory_space<smem>>
    %261 = vector.broadcast %260 : f32 to vector<2x10x10xf32>
    %262 = arith.select %256, %261, %254 : vector<2x10x10xi1>, vector<2x10x10xf32>
    %c6_i32_99 = arith.constant 6 : i32
    %263 = vector.broadcast %c6_i32_99 : i32 to vector<2x10x10xi32>
    %264 = arith.cmpi eq, %212, %263 : vector<2x10x10xi32>
    %c1_100 = arith.constant 1 : index
    %c6_101 = arith.constant 6 : index
    %265 = memref.load %arg3[%c1_100, %c6_101] : memref<8x17xf32, #tpu.memory_space<smem>>
    %266 = vector.broadcast %265 : f32 to vector<2x10x10xf32>
    %267 = arith.select %264, %266, %259 : vector<2x10x10xi1>, vector<2x10x10xf32>
    %c1_102 = arith.constant 1 : index
    %c6_103 = arith.constant 6 : index
    %268 = memref.load %arg4[%c1_102, %c6_103] : memref<8x17xf32, #tpu.memory_space<smem>>
    %269 = vector.broadcast %268 : f32 to vector<2x10x10xf32>
    %270 = arith.select %264, %269, %262 : vector<2x10x10xi1>, vector<2x10x10xf32>
    %c7_i32_104 = arith.constant 7 : i32
    %271 = vector.broadcast %c7_i32_104 : i32 to vector<2x10x10xi32>
    %272 = arith.cmpi eq, %212, %271 : vector<2x10x10xi32>
    %c1_105 = arith.constant 1 : index
    %c7_106 = arith.constant 7 : index
    %273 = memref.load %arg3[%c1_105, %c7_106] : memref<8x17xf32, #tpu.memory_space<smem>>
    %274 = vector.broadcast %273 : f32 to vector<2x10x10xf32>
    %275 = arith.select %272, %274, %267 : vector<2x10x10xi1>, vector<2x10x10xf32>
    %c1_107 = arith.constant 1 : index
    %c7_108 = arith.constant 7 : index
    %276 = memref.load %arg4[%c1_107, %c7_108] : memref<8x17xf32, #tpu.memory_space<smem>>
    %277 = vector.broadcast %276 : f32 to vector<2x10x10xf32>
    %278 = arith.select %272, %277, %270 : vector<2x10x10xi1>, vector<2x10x10xf32>
    %c8_i32_109 = arith.constant 8 : i32
    %279 = vector.broadcast %c8_i32_109 : i32 to vector<2x10x10xi32>
    %280 = arith.cmpi eq, %212, %279 : vector<2x10x10xi32>
    %c1_110 = arith.constant 1 : index
    %c8_111 = arith.constant 8 : index
    %281 = memref.load %arg3[%c1_110, %c8_111] : memref<8x17xf32, #tpu.memory_space<smem>>
    %282 = vector.broadcast %281 : f32 to vector<2x10x10xf32>
    %283 = arith.select %280, %282, %275 : vector<2x10x10xi1>, vector<2x10x10xf32>
    %c1_112 = arith.constant 1 : index
    %c8_113 = arith.constant 8 : index
    %284 = memref.load %arg4[%c1_112, %c8_113] : memref<8x17xf32, #tpu.memory_space<smem>>
    %285 = vector.broadcast %284 : f32 to vector<2x10x10xf32>
    %286 = arith.select %280, %285, %278 : vector<2x10x10xi1>, vector<2x10x10xf32>
    %c9_i32_114 = arith.constant 9 : i32
    %287 = vector.broadcast %c9_i32_114 : i32 to vector<2x10x10xi32>
    %288 = arith.cmpi eq, %212, %287 : vector<2x10x10xi32>
    %c1_115 = arith.constant 1 : index
    %c9_116 = arith.constant 9 : index
    %289 = memref.load %arg3[%c1_115, %c9_116] : memref<8x17xf32, #tpu.memory_space<smem>>
    %290 = vector.broadcast %289 : f32 to vector<2x10x10xf32>
    %291 = arith.select %288, %290, %283 : vector<2x10x10xi1>, vector<2x10x10xf32>
    %c1_117 = arith.constant 1 : index
    %c9_118 = arith.constant 9 : index
    %292 = memref.load %arg4[%c1_117, %c9_118] : memref<8x17xf32, #tpu.memory_space<smem>>
    %293 = vector.broadcast %292 : f32 to vector<2x10x10xf32>
    %294 = arith.select %288, %293, %286 : vector<2x10x10xi1>, vector<2x10x10xf32>
    %c10_i32_119 = arith.constant 10 : i32
    %295 = vector.broadcast %c10_i32_119 : i32 to vector<2x10x10xi32>
    %296 = arith.cmpi eq, %212, %295 : vector<2x10x10xi32>
    %c1_120 = arith.constant 1 : index
    %c10_121 = arith.constant 10 : index
    %297 = memref.load %arg3[%c1_120, %c10_121] : memref<8x17xf32, #tpu.memory_space<smem>>
    %298 = vector.broadcast %297 : f32 to vector<2x10x10xf32>
    %299 = arith.select %296, %298, %291 : vector<2x10x10xi1>, vector<2x10x10xf32>
    %c1_122 = arith.constant 1 : index
    %c10_123 = arith.constant 10 : index
    %300 = memref.load %arg4[%c1_122, %c10_123] : memref<8x17xf32, #tpu.memory_space<smem>>
    %301 = vector.broadcast %300 : f32 to vector<2x10x10xf32>
    %302 = arith.select %296, %301, %294 : vector<2x10x10xi1>, vector<2x10x10xf32>
    %c11_i32_124 = arith.constant 11 : i32
    %303 = vector.broadcast %c11_i32_124 : i32 to vector<2x10x10xi32>
    %304 = arith.cmpi eq, %212, %303 : vector<2x10x10xi32>
    %c1_125 = arith.constant 1 : index
    %c11_126 = arith.constant 11 : index
    %305 = memref.load %arg3[%c1_125, %c11_126] : memref<8x17xf32, #tpu.memory_space<smem>>
    %306 = vector.broadcast %305 : f32 to vector<2x10x10xf32>
    %307 = arith.select %304, %306, %299 : vector<2x10x10xi1>, vector<2x10x10xf32>
    %c1_127 = arith.constant 1 : index
    %c11_128 = arith.constant 11 : index
    %308 = memref.load %arg4[%c1_127, %c11_128] : memref<8x17xf32, #tpu.memory_space<smem>>
    %309 = vector.broadcast %308 : f32 to vector<2x10x10xf32>
    %310 = arith.select %304, %309, %302 : vector<2x10x10xi1>, vector<2x10x10xf32>
    %c12_i32_129 = arith.constant 12 : i32
    %311 = vector.broadcast %c12_i32_129 : i32 to vector<2x10x10xi32>
    %312 = arith.cmpi eq, %212, %311 : vector<2x10x10xi32>
    %c1_130 = arith.constant 1 : index
    %c12_131 = arith.constant 12 : index
    %313 = memref.load %arg3[%c1_130, %c12_131] : memref<8x17xf32, #tpu.memory_space<smem>>
    %314 = vector.broadcast %313 : f32 to vector<2x10x10xf32>
    %315 = arith.select %312, %314, %307 : vector<2x10x10xi1>, vector<2x10x10xf32>
    %c1_132 = arith.constant 1 : index
    %c12_133 = arith.constant 12 : index
    %316 = memref.load %arg4[%c1_132, %c12_133] : memref<8x17xf32, #tpu.memory_space<smem>>
    %317 = vector.broadcast %316 : f32 to vector<2x10x10xf32>
    %318 = arith.select %312, %317, %310 : vector<2x10x10xi1>, vector<2x10x10xf32>
    %c13_i32_134 = arith.constant 13 : i32
    %319 = vector.broadcast %c13_i32_134 : i32 to vector<2x10x10xi32>
    %320 = arith.cmpi eq, %212, %319 : vector<2x10x10xi32>
    %c1_135 = arith.constant 1 : index
    %c13_136 = arith.constant 13 : index
    %321 = memref.load %arg3[%c1_135, %c13_136] : memref<8x17xf32, #tpu.memory_space<smem>>
    %322 = vector.broadcast %321 : f32 to vector<2x10x10xf32>
    %323 = arith.select %320, %322, %315 : vector<2x10x10xi1>, vector<2x10x10xf32>
    %c1_137 = arith.constant 1 : index
    %c13_138 = arith.constant 13 : index
    %324 = memref.load %arg4[%c1_137, %c13_138] : memref<8x17xf32, #tpu.memory_space<smem>>
    %325 = vector.broadcast %324 : f32 to vector<2x10x10xf32>
    %326 = arith.select %320, %325, %318 : vector<2x10x10xi1>, vector<2x10x10xf32>
    %c14_i32_139 = arith.constant 14 : i32
    %327 = vector.broadcast %c14_i32_139 : i32 to vector<2x10x10xi32>
    %328 = arith.cmpi eq, %212, %327 : vector<2x10x10xi32>
    %c1_140 = arith.constant 1 : index
    %c14_141 = arith.constant 14 : index
    %329 = memref.load %arg3[%c1_140, %c14_141] : memref<8x17xf32, #tpu.memory_space<smem>>
    %330 = vector.broadcast %329 : f32 to vector<2x10x10xf32>
    %331 = arith.select %328, %330, %323 : vector<2x10x10xi1>, vector<2x10x10xf32>
    %c1_142 = arith.constant 1 : index
    %c14_143 = arith.constant 14 : index
    %332 = memref.load %arg4[%c1_142, %c14_143] : memref<8x17xf32, #tpu.memory_space<smem>>
    %333 = vector.broadcast %332 : f32 to vector<2x10x10xf32>
    %334 = arith.select %328, %333, %326 : vector<2x10x10xi1>, vector<2x10x10xf32>
    %c15_i32_144 = arith.constant 15 : i32
    %335 = vector.broadcast %c15_i32_144 : i32 to vector<2x10x10xi32>
    %336 = arith.cmpi eq, %212, %335 : vector<2x10x10xi32>
    %c1_145 = arith.constant 1 : index
    %c15_146 = arith.constant 15 : index
    %337 = memref.load %arg3[%c1_145, %c15_146] : memref<8x17xf32, #tpu.memory_space<smem>>
    %338 = vector.broadcast %337 : f32 to vector<2x10x10xf32>
    %339 = arith.select %336, %338, %331 : vector<2x10x10xi1>, vector<2x10x10xf32>
    %c1_147 = arith.constant 1 : index
    %c15_148 = arith.constant 15 : index
    %340 = memref.load %arg4[%c1_147, %c15_148] : memref<8x17xf32, #tpu.memory_space<smem>>
    %341 = vector.broadcast %340 : f32 to vector<2x10x10xf32>
    %342 = arith.select %336, %341, %334 : vector<2x10x10xi1>, vector<2x10x10xf32>
    %c16_i32_149 = arith.constant 16 : i32
    %343 = vector.broadcast %c16_i32_149 : i32 to vector<2x10x10xi32>
    %344 = arith.cmpi eq, %212, %343 : vector<2x10x10xi32>
    %c1_150 = arith.constant 1 : index
    %c16_151 = arith.constant 16 : index
    %345 = memref.load %arg3[%c1_150, %c16_151] : memref<8x17xf32, #tpu.memory_space<smem>>
    %346 = vector.broadcast %345 : f32 to vector<2x10x10xf32>
    %347 = arith.select %344, %346, %339 : vector<2x10x10xi1>, vector<2x10x10xf32>
    %c1_152 = arith.constant 1 : index
    %c16_153 = arith.constant 16 : index
    %348 = memref.load %arg4[%c1_152, %c16_153] : memref<8x17xf32, #tpu.memory_space<smem>>
    %349 = vector.broadcast %348 : f32 to vector<2x10x10xf32>
    %350 = arith.select %344, %349, %342 : vector<2x10x10xi1>, vector<2x10x10xf32>
    %351 = arith.mulf %210, %350 : vector<2x10x10xf32>
    %352 = arith.addf %347, %351 : vector<2x10x10xf32>
    %353 = arith.mulf %205, %352 : vector<2x10x10xf32>
    %354 = vector.shape_cast %6 : vector<2x10xf32> to vector<2x10x1xf32>
    %355 = vector.shape_cast %6 : vector<2x10xf32> to vector<2x1x10xf32>
    %356 = vector.broadcast %354 : vector<2x10x1xf32> to vector<2x10x10xf32>
    %357 = vector.broadcast %355 : vector<2x1x10xf32> to vector<2x10x10xf32>
    %358 = arith.subf %356, %357 : vector<2x10x10xf32>
    %359 = math.absf %358 : vector<2x10x10xf32>
    %c2_154 = arith.constant 2 : index
    %c16_155 = arith.constant 16 : index
    %360 = memref.load %arg3[%c2_154, %c16_155] : memref<8x17xf32, #tpu.memory_space<smem>>
    %361 = arith.mulf %360, %360 : f32
    %362 = arith.mulf %361, %360 : f32
    %363 = arith.mulf %362, %360 : f32
    %364 = arith.mulf %363, %360 : f32
    %365 = arith.mulf %364, %360 : f32
    %366 = arith.mulf %365, %360 : f32
    %367 = arith.mulf %366, %360 : f32
    %368 = arith.mulf %367, %360 : f32
    %369 = arith.mulf %368, %360 : f32
    %cst_156 = arith.constant 1.000000e+00 : f32
    %370 = vector.broadcast %cst_156 : f32 to vector<2x10x10xf32>
    %371 = arith.subf %370, %359 : vector<2x10x10xf32>
    %cst_157 = arith.constant 1.600000e+01 : f32
    %372 = vector.broadcast %cst_157 : f32 to vector<2x10x10xf32>
    %373 = arith.mulf %371, %372 : vector<2x10x10xf32>
    %374 = arith.fptosi %373 : vector<2x10x10xf32> to vector<2x10x10xi32>
    %375 = arith.sitofp %374 : vector<2x10x10xi32> to vector<2x10x10xf32>
    %376 = arith.subf %373, %375 : vector<2x10x10xf32>
    %c16_i32_158 = arith.constant 16 : i32
    %377 = vector.broadcast %c16_i32_158 : i32 to vector<2x10x10xi32>
    %378 = arith.minsi %374, %377 : vector<2x10x10xi32>
    %cst_159 = arith.constant 0.000000e+00 : f32
    %379 = vector.broadcast %cst_159 : f32 to vector<2x10x10xf32>
    %cst_160 = arith.constant 0.000000e+00 : f32
    %380 = vector.broadcast %cst_160 : f32 to vector<2x10x10xf32>
    %c0_i32_161 = arith.constant 0 : i32
    %381 = vector.broadcast %c0_i32_161 : i32 to vector<2x10x10xi32>
    %382 = arith.cmpi eq, %378, %381 : vector<2x10x10xi32>
    %c2_162 = arith.constant 2 : index
    %c0_163 = arith.constant 0 : index
    %383 = memref.load %arg3[%c2_162, %c0_163] : memref<8x17xf32, #tpu.memory_space<smem>>
    %384 = vector.broadcast %383 : f32 to vector<2x10x10xf32>
    %385 = arith.select %382, %384, %379 : vector<2x10x10xi1>, vector<2x10x10xf32>
    %c2_164 = arith.constant 2 : index
    %c0_165 = arith.constant 0 : index
    %386 = memref.load %arg4[%c2_164, %c0_165] : memref<8x17xf32, #tpu.memory_space<smem>>
    %387 = vector.broadcast %386 : f32 to vector<2x10x10xf32>
    %388 = arith.select %382, %387, %380 : vector<2x10x10xi1>, vector<2x10x10xf32>
    %c1_i32_166 = arith.constant 1 : i32
    %389 = vector.broadcast %c1_i32_166 : i32 to vector<2x10x10xi32>
    %390 = arith.cmpi eq, %378, %389 : vector<2x10x10xi32>
    %c2_167 = arith.constant 2 : index
    %c1_168 = arith.constant 1 : index
    %391 = memref.load %arg3[%c2_167, %c1_168] : memref<8x17xf32, #tpu.memory_space<smem>>
    %392 = vector.broadcast %391 : f32 to vector<2x10x10xf32>
    %393 = arith.select %390, %392, %385 : vector<2x10x10xi1>, vector<2x10x10xf32>
    %c2_169 = arith.constant 2 : index
    %c1_170 = arith.constant 1 : index
    %394 = memref.load %arg4[%c2_169, %c1_170] : memref<8x17xf32, #tpu.memory_space<smem>>
    %395 = vector.broadcast %394 : f32 to vector<2x10x10xf32>
    %396 = arith.select %390, %395, %388 : vector<2x10x10xi1>, vector<2x10x10xf32>
    %c2_i32_171 = arith.constant 2 : i32
    %397 = vector.broadcast %c2_i32_171 : i32 to vector<2x10x10xi32>
    %398 = arith.cmpi eq, %378, %397 : vector<2x10x10xi32>
    %c2_172 = arith.constant 2 : index
    %c2_173 = arith.constant 2 : index
    %399 = memref.load %arg3[%c2_172, %c2_173] : memref<8x17xf32, #tpu.memory_space<smem>>
    %400 = vector.broadcast %399 : f32 to vector<2x10x10xf32>
    %401 = arith.select %398, %400, %393 : vector<2x10x10xi1>, vector<2x10x10xf32>
    %c2_174 = arith.constant 2 : index
    %c2_175 = arith.constant 2 : index
    %402 = memref.load %arg4[%c2_174, %c2_175] : memref<8x17xf32, #tpu.memory_space<smem>>
    %403 = vector.broadcast %402 : f32 to vector<2x10x10xf32>
    %404 = arith.select %398, %403, %396 : vector<2x10x10xi1>, vector<2x10x10xf32>
    %c3_i32_176 = arith.constant 3 : i32
    %405 = vector.broadcast %c3_i32_176 : i32 to vector<2x10x10xi32>
    %406 = arith.cmpi eq, %378, %405 : vector<2x10x10xi32>
    %c2_177 = arith.constant 2 : index
    %c3_178 = arith.constant 3 : index
    %407 = memref.load %arg3[%c2_177, %c3_178] : memref<8x17xf32, #tpu.memory_space<smem>>
    %408 = vector.broadcast %407 : f32 to vector<2x10x10xf32>
    %409 = arith.select %406, %408, %401 : vector<2x10x10xi1>, vector<2x10x10xf32>
    %c2_179 = arith.constant 2 : index
    %c3_180 = arith.constant 3 : index
    %410 = memref.load %arg4[%c2_179, %c3_180] : memref<8x17xf32, #tpu.memory_space<smem>>
    %411 = vector.broadcast %410 : f32 to vector<2x10x10xf32>
    %412 = arith.select %406, %411, %404 : vector<2x10x10xi1>, vector<2x10x10xf32>
    %c4_i32_181 = arith.constant 4 : i32
    %413 = vector.broadcast %c4_i32_181 : i32 to vector<2x10x10xi32>
    %414 = arith.cmpi eq, %378, %413 : vector<2x10x10xi32>
    %c2_182 = arith.constant 2 : index
    %c4_183 = arith.constant 4 : index
    %415 = memref.load %arg3[%c2_182, %c4_183] : memref<8x17xf32, #tpu.memory_space<smem>>
    %416 = vector.broadcast %415 : f32 to vector<2x10x10xf32>
    %417 = arith.select %414, %416, %409 : vector<2x10x10xi1>, vector<2x10x10xf32>
    %c2_184 = arith.constant 2 : index
    %c4_185 = arith.constant 4 : index
    %418 = memref.load %arg4[%c2_184, %c4_185] : memref<8x17xf32, #tpu.memory_space<smem>>
    %419 = vector.broadcast %418 : f32 to vector<2x10x10xf32>
    %420 = arith.select %414, %419, %412 : vector<2x10x10xi1>, vector<2x10x10xf32>
    %c5_i32_186 = arith.constant 5 : i32
    %421 = vector.broadcast %c5_i32_186 : i32 to vector<2x10x10xi32>
    %422 = arith.cmpi eq, %378, %421 : vector<2x10x10xi32>
    %c2_187 = arith.constant 2 : index
    %c5_188 = arith.constant 5 : index
    %423 = memref.load %arg3[%c2_187, %c5_188] : memref<8x17xf32, #tpu.memory_space<smem>>
    %424 = vector.broadcast %423 : f32 to vector<2x10x10xf32>
    %425 = arith.select %422, %424, %417 : vector<2x10x10xi1>, vector<2x10x10xf32>
    %c2_189 = arith.constant 2 : index
    %c5_190 = arith.constant 5 : index
    %426 = memref.load %arg4[%c2_189, %c5_190] : memref<8x17xf32, #tpu.memory_space<smem>>
    %427 = vector.broadcast %426 : f32 to vector<2x10x10xf32>
    %428 = arith.select %422, %427, %420 : vector<2x10x10xi1>, vector<2x10x10xf32>
    %c6_i32_191 = arith.constant 6 : i32
    %429 = vector.broadcast %c6_i32_191 : i32 to vector<2x10x10xi32>
    %430 = arith.cmpi eq, %378, %429 : vector<2x10x10xi32>
    %c2_192 = arith.constant 2 : index
    %c6_193 = arith.constant 6 : index
    %431 = memref.load %arg3[%c2_192, %c6_193] : memref<8x17xf32, #tpu.memory_space<smem>>
    %432 = vector.broadcast %431 : f32 to vector<2x10x10xf32>
    %433 = arith.select %430, %432, %425 : vector<2x10x10xi1>, vector<2x10x10xf32>
    %c2_194 = arith.constant 2 : index
    %c6_195 = arith.constant 6 : index
    %434 = memref.load %arg4[%c2_194, %c6_195] : memref<8x17xf32, #tpu.memory_space<smem>>
    %435 = vector.broadcast %434 : f32 to vector<2x10x10xf32>
    %436 = arith.select %430, %435, %428 : vector<2x10x10xi1>, vector<2x10x10xf32>
    %c7_i32_196 = arith.constant 7 : i32
    %437 = vector.broadcast %c7_i32_196 : i32 to vector<2x10x10xi32>
    %438 = arith.cmpi eq, %378, %437 : vector<2x10x10xi32>
    %c2_197 = arith.constant 2 : index
    %c7_198 = arith.constant 7 : index
    %439 = memref.load %arg3[%c2_197, %c7_198] : memref<8x17xf32, #tpu.memory_space<smem>>
    %440 = vector.broadcast %439 : f32 to vector<2x10x10xf32>
    %441 = arith.select %438, %440, %433 : vector<2x10x10xi1>, vector<2x10x10xf32>
    %c2_199 = arith.constant 2 : index
    %c7_200 = arith.constant 7 : index
    %442 = memref.load %arg4[%c2_199, %c7_200] : memref<8x17xf32, #tpu.memory_space<smem>>
    %443 = vector.broadcast %442 : f32 to vector<2x10x10xf32>
    %444 = arith.select %438, %443, %436 : vector<2x10x10xi1>, vector<2x10x10xf32>
    %c8_i32_201 = arith.constant 8 : i32
    %445 = vector.broadcast %c8_i32_201 : i32 to vector<2x10x10xi32>
    %446 = arith.cmpi eq, %378, %445 : vector<2x10x10xi32>
    %c2_202 = arith.constant 2 : index
    %c8_203 = arith.constant 8 : index
    %447 = memref.load %arg3[%c2_202, %c8_203] : memref<8x17xf32, #tpu.memory_space<smem>>
    %448 = vector.broadcast %447 : f32 to vector<2x10x10xf32>
    %449 = arith.select %446, %448, %441 : vector<2x10x10xi1>, vector<2x10x10xf32>
    %c2_204 = arith.constant 2 : index
    %c8_205 = arith.constant 8 : index
    %450 = memref.load %arg4[%c2_204, %c8_205] : memref<8x17xf32, #tpu.memory_space<smem>>
    %451 = vector.broadcast %450 : f32 to vector<2x10x10xf32>
    %452 = arith.select %446, %451, %444 : vector<2x10x10xi1>, vector<2x10x10xf32>
    %c9_i32_206 = arith.constant 9 : i32
    %453 = vector.broadcast %c9_i32_206 : i32 to vector<2x10x10xi32>
    %454 = arith.cmpi eq, %378, %453 : vector<2x10x10xi32>
    %c2_207 = arith.constant 2 : index
    %c9_208 = arith.constant 9 : index
    %455 = memref.load %arg3[%c2_207, %c9_208] : memref<8x17xf32, #tpu.memory_space<smem>>
    %456 = vector.broadcast %455 : f32 to vector<2x10x10xf32>
    %457 = arith.select %454, %456, %449 : vector<2x10x10xi1>, vector<2x10x10xf32>
    %c2_209 = arith.constant 2 : index
    %c9_210 = arith.constant 9 : index
    %458 = memref.load %arg4[%c2_209, %c9_210] : memref<8x17xf32, #tpu.memory_space<smem>>
    %459 = vector.broadcast %458 : f32 to vector<2x10x10xf32>
    %460 = arith.select %454, %459, %452 : vector<2x10x10xi1>, vector<2x10x10xf32>
    %c10_i32_211 = arith.constant 10 : i32
    %461 = vector.broadcast %c10_i32_211 : i32 to vector<2x10x10xi32>
    %462 = arith.cmpi eq, %378, %461 : vector<2x10x10xi32>
    %c2_212 = arith.constant 2 : index
    %c10_213 = arith.constant 10 : index
    %463 = memref.load %arg3[%c2_212, %c10_213] : memref<8x17xf32, #tpu.memory_space<smem>>
    %464 = vector.broadcast %463 : f32 to vector<2x10x10xf32>
    %465 = arith.select %462, %464, %457 : vector<2x10x10xi1>, vector<2x10x10xf32>
    %c2_214 = arith.constant 2 : index
    %c10_215 = arith.constant 10 : index
    %466 = memref.load %arg4[%c2_214, %c10_215] : memref<8x17xf32, #tpu.memory_space<smem>>
    %467 = vector.broadcast %466 : f32 to vector<2x10x10xf32>
    %468 = arith.select %462, %467, %460 : vector<2x10x10xi1>, vector<2x10x10xf32>
    %c11_i32_216 = arith.constant 11 : i32
    %469 = vector.broadcast %c11_i32_216 : i32 to vector<2x10x10xi32>
    %470 = arith.cmpi eq, %378, %469 : vector<2x10x10xi32>
    %c2_217 = arith.constant 2 : index
    %c11_218 = arith.constant 11 : index
    %471 = memref.load %arg3[%c2_217, %c11_218] : memref<8x17xf32, #tpu.memory_space<smem>>
    %472 = vector.broadcast %471 : f32 to vector<2x10x10xf32>
    %473 = arith.select %470, %472, %465 : vector<2x10x10xi1>, vector<2x10x10xf32>
    %c2_219 = arith.constant 2 : index
    %c11_220 = arith.constant 11 : index
    %474 = memref.load %arg4[%c2_219, %c11_220] : memref<8x17xf32, #tpu.memory_space<smem>>
    %475 = vector.broadcast %474 : f32 to vector<2x10x10xf32>
    %476 = arith.select %470, %475, %468 : vector<2x10x10xi1>, vector<2x10x10xf32>
    %c12_i32_221 = arith.constant 12 : i32
    %477 = vector.broadcast %c12_i32_221 : i32 to vector<2x10x10xi32>
    %478 = arith.cmpi eq, %378, %477 : vector<2x10x10xi32>
    %c2_222 = arith.constant 2 : index
    %c12_223 = arith.constant 12 : index
    %479 = memref.load %arg3[%c2_222, %c12_223] : memref<8x17xf32, #tpu.memory_space<smem>>
    %480 = vector.broadcast %479 : f32 to vector<2x10x10xf32>
    %481 = arith.select %478, %480, %473 : vector<2x10x10xi1>, vector<2x10x10xf32>
    %c2_224 = arith.constant 2 : index
    %c12_225 = arith.constant 12 : index
    %482 = memref.load %arg4[%c2_224, %c12_225] : memref<8x17xf32, #tpu.memory_space<smem>>
    %483 = vector.broadcast %482 : f32 to vector<2x10x10xf32>
    %484 = arith.select %478, %483, %476 : vector<2x10x10xi1>, vector<2x10x10xf32>
    %c13_i32_226 = arith.constant 13 : i32
    %485 = vector.broadcast %c13_i32_226 : i32 to vector<2x10x10xi32>
    %486 = arith.cmpi eq, %378, %485 : vector<2x10x10xi32>
    %c2_227 = arith.constant 2 : index
    %c13_228 = arith.constant 13 : index
    %487 = memref.load %arg3[%c2_227, %c13_228] : memref<8x17xf32, #tpu.memory_space<smem>>
    %488 = vector.broadcast %487 : f32 to vector<2x10x10xf32>
    %489 = arith.select %486, %488, %481 : vector<2x10x10xi1>, vector<2x10x10xf32>
    %c2_229 = arith.constant 2 : index
    %c13_230 = arith.constant 13 : index
    %490 = memref.load %arg4[%c2_229, %c13_230] : memref<8x17xf32, #tpu.memory_space<smem>>
    %491 = vector.broadcast %490 : f32 to vector<2x10x10xf32>
    %492 = arith.select %486, %491, %484 : vector<2x10x10xi1>, vector<2x10x10xf32>
    %c14_i32_231 = arith.constant 14 : i32
    %493 = vector.broadcast %c14_i32_231 : i32 to vector<2x10x10xi32>
    %494 = arith.cmpi eq, %378, %493 : vector<2x10x10xi32>
    %c2_232 = arith.constant 2 : index
    %c14_233 = arith.constant 14 : index
    %495 = memref.load %arg3[%c2_232, %c14_233] : memref<8x17xf32, #tpu.memory_space<smem>>
    %496 = vector.broadcast %495 : f32 to vector<2x10x10xf32>
    %497 = arith.select %494, %496, %489 : vector<2x10x10xi1>, vector<2x10x10xf32>
    %c2_234 = arith.constant 2 : index
    %c14_235 = arith.constant 14 : index
    %498 = memref.load %arg4[%c2_234, %c14_235] : memref<8x17xf32, #tpu.memory_space<smem>>
    %499 = vector.broadcast %498 : f32 to vector<2x10x10xf32>
    %500 = arith.select %494, %499, %492 : vector<2x10x10xi1>, vector<2x10x10xf32>
    %c15_i32_236 = arith.constant 15 : i32
    %501 = vector.broadcast %c15_i32_236 : i32 to vector<2x10x10xi32>
    %502 = arith.cmpi eq, %378, %501 : vector<2x10x10xi32>
    %c2_237 = arith.constant 2 : index
    %c15_238 = arith.constant 15 : index
    %503 = memref.load %arg3[%c2_237, %c15_238] : memref<8x17xf32, #tpu.memory_space<smem>>
    %504 = vector.broadcast %503 : f32 to vector<2x10x10xf32>
    %505 = arith.select %502, %504, %497 : vector<2x10x10xi1>, vector<2x10x10xf32>
    %c2_239 = arith.constant 2 : index
    %c15_240 = arith.constant 15 : index
    %506 = memref.load %arg4[%c2_239, %c15_240] : memref<8x17xf32, #tpu.memory_space<smem>>
    %507 = vector.broadcast %506 : f32 to vector<2x10x10xf32>
    %508 = arith.select %502, %507, %500 : vector<2x10x10xi1>, vector<2x10x10xf32>
    %c16_i32_241 = arith.constant 16 : i32
    %509 = vector.broadcast %c16_i32_241 : i32 to vector<2x10x10xi32>
    %510 = arith.cmpi eq, %378, %509 : vector<2x10x10xi32>
    %c2_242 = arith.constant 2 : index
    %c16_243 = arith.constant 16 : index
    %511 = memref.load %arg3[%c2_242, %c16_243] : memref<8x17xf32, #tpu.memory_space<smem>>
    %512 = vector.broadcast %511 : f32 to vector<2x10x10xf32>
    %513 = arith.select %510, %512, %505 : vector<2x10x10xi1>, vector<2x10x10xf32>
    %c2_244 = arith.constant 2 : index
    %c16_245 = arith.constant 16 : index
    %514 = memref.load %arg4[%c2_244, %c16_245] : memref<8x17xf32, #tpu.memory_space<smem>>
    %515 = vector.broadcast %514 : f32 to vector<2x10x10xf32>
    %516 = arith.select %510, %515, %508 : vector<2x10x10xi1>, vector<2x10x10xf32>
    %517 = arith.mulf %376, %516 : vector<2x10x10xf32>
    %518 = arith.addf %513, %517 : vector<2x10x10xf32>
    %519 = vector.broadcast %369 : f32 to vector<2x10x10xf32>
    %520 = arith.mulf %518, %519 : vector<2x10x10xf32>
    %cst_246 = arith.constant dense<0.000000e+00> : vector<2x10xf32>
    %521 = vector.multi_reduction <add>, %520, %cst_246 [2] : vector<2x10x10xf32> to vector<2x10xf32>
    %522 = vector.shape_cast %521 : vector<2x10xf32> to vector<2x10x1xf32>
    %523 = vector.shape_cast %521 : vector<2x10xf32> to vector<2x1x10xf32>
    %524 = vector.broadcast %522 : vector<2x10x1xf32> to vector<2x10x10xf32>
    %525 = vector.broadcast %523 : vector<2x1x10xf32> to vector<2x10x10xf32>
    %526 = arith.mulf %524, %525 : vector<2x10x10xf32>
    %527 = tpu.reciprocal %526 {approx = true} : vector<2x10x10xf32> -> vector<2x10x10xf32>
    %528 = arith.mulf %353, %527 : vector<2x10x10xf32>
    %529 = tpu.iota {dimensions = array<i32: 0>} : vector<10x10xi32>
    %530 = tpu.iota {dimensions = array<i32: 1>} : vector<10x10xi32>
    %531 = arith.cmpi eq, %529, %530 : vector<10x10xi32>
    %532 = vector.shape_cast %531 : vector<10x10xi1> to vector<1x10x10xi1>
    %cst_247 = arith.constant 0.000000e+00 : f32
    %533 = vector.shape_cast %532 : vector<1x10x10xi1> to vector<1x10x10xi1>
    %534 = vector.broadcast %533 : vector<1x10x10xi1> to vector<2x10x10xi1>
    %535 = vector.broadcast %cst_247 : f32 to vector<2x10x10xf32>
    %536 = arith.select %534, %205, %535 : vector<2x10x10xi1>, vector<2x10x10xf32>
    %cst_248 = arith.constant dense<0.000000e+00> : vector<2x10xf32>
    %537 = vector.multi_reduction <add>, %536, %cst_248 [2] : vector<2x10x10xf32> to vector<2x10xf32>
    %538 = tpu.reciprocal %521 {approx = true} : vector<2x10xf32> -> vector<2x10xf32>
    %539 = arith.mulf %537, %538 : vector<2x10xf32>
    %cst_249 = arith.constant dense<0.000000e+00> : vector<2x10xf32>
    %540 = vector.multi_reduction <add>, %528, %cst_249 [2] : vector<2x10x10xf32> to vector<2x10xf32>
    %cst_250 = arith.constant dense<0.000000e+00> : vector<2xf32>
    %541 = vector.multi_reduction <add>, %540, %cst_250 [1] : vector<2x10xf32> to vector<2xf32>
    %542 = vector.shape_cast %541 : vector<2xf32> to vector<2x1xf32>
    %cst_251 = arith.constant dense<0.000000e+00> : vector<2xf32>
    %543 = vector.multi_reduction <add>, %539, %cst_251 [1] : vector<2x10xf32> to vector<2xf32>
    %544 = vector.shape_cast %543 : vector<2xf32> to vector<2x1xf32>
    %545 = arith.addf %542, %544 : vector<2x1xf32>
    %cst_252 = arith.constant 9.99999968E-21 : f32
    %546 = vector.broadcast %cst_252 : f32 to vector<2x1xf32>
    %547 = arith.addf %545, %546 : vector<2x1xf32>
    %548 = math.sqrt %547 : vector<2x1xf32>
    %cst_253 = arith.constant 0.000000e+00 : f32
    %cst_254 = arith.constant 1.000000e+01 : f32
    %549 = vector.broadcast %cst_253 : f32 to vector<2x1xf32>
    %550 = arith.maximumf %549, %548 : vector<2x1xf32>
    %551 = vector.broadcast %cst_254 : f32 to vector<2x1xf32>
    %552 = arith.minimumf %551, %550 : vector<2x1xf32>
    %553 = arith.fptosi %552 : vector<2x1xf32> to vector<2x1xi32>
    %554 = arith.sitofp %553 : vector<2x1xi32> to vector<2x1xf32>
    %555 = arith.subf %552, %554 : vector<2x1xf32>
    %c10_i32_255 = arith.constant 10 : i32
    %556 = vector.broadcast %c10_i32_255 : i32 to vector<2x1xi32>
    %557 = arith.minsi %553, %556 : vector<2x1xi32>
    %c1_i32_256 = arith.constant 1 : i32
    %558 = vector.broadcast %c1_i32_256 : i32 to vector<2x1xi32>
    %559 = arith.addi %553, %558 : vector<2x1xi32>
    %c10_i32_257 = arith.constant 10 : i32
    %560 = vector.broadcast %c10_i32_257 : i32 to vector<2x1xi32>
    %561 = arith.minsi %559, %560 : vector<2x1xi32>
    %562 = tpu.iota {dimensions = array<i32: 1>} : vector<2x11xi32>
    %563 = vector.broadcast %557 : vector<2x1xi32> to vector<2x11xi32>
    %564 = arith.cmpi eq, %562, %563 : vector<2x11xi32>
    %565 = arith.extui %564 : vector<2x11xi1> to vector<2x11xi32>
    %566 = arith.sitofp %565 : vector<2x11xi32> to vector<2x11xf32>
    %567 = vector.broadcast %561 : vector<2x1xi32> to vector<2x11xi32>
    %568 = arith.cmpi eq, %562, %567 : vector<2x11xi32>
    %569 = arith.extui %568 : vector<2x11xi1> to vector<2x11xi32>
    %570 = arith.sitofp %569 : vector<2x11xi32> to vector<2x11xf32>
    %cst_258 = arith.constant 1.000000e+00 : f32
    %571 = vector.broadcast %cst_258 : f32 to vector<2x1xf32>
    %572 = arith.subf %571, %555 : vector<2x1xf32>
    %573 = vector.broadcast %572 : vector<2x1xf32> to vector<2x11xf32>
    %574 = arith.mulf %573, %566 : vector<2x11xf32>
    %575 = vector.broadcast %555 : vector<2x1xf32> to vector<2x11xf32>
    %576 = arith.mulf %575, %570 : vector<2x11xf32>
    %577 = arith.addf %574, %576 : vector<2x11xf32>
    %cst_259 = arith.constant 1.600000e+01 : f32
    %578 = vector.broadcast %cst_259 : f32 to vector<2x10xf32>
    %579 = arith.mulf %6, %578 : vector<2x10xf32>
    %580 = arith.fptosi %579 : vector<2x10xf32> to vector<2x10xi32>
    %581 = arith.sitofp %580 : vector<2x10xi32> to vector<2x10xf32>
    %582 = arith.subf %579, %581 : vector<2x10xf32>
    %c16_i32_260 = arith.constant 16 : i32
    %583 = vector.broadcast %c16_i32_260 : i32 to vector<2x10xi32>
    %584 = arith.minsi %580, %583 : vector<2x10xi32>
    %cst_261 = arith.constant 0.000000e+00 : f32
    %585 = vector.broadcast %cst_261 : f32 to vector<2x10xf32>
    %cst_262 = arith.constant 0.000000e+00 : f32
    %586 = vector.broadcast %cst_262 : f32 to vector<2x10xf32>
    %c0_i32_263 = arith.constant 0 : i32
    %587 = vector.broadcast %c0_i32_263 : i32 to vector<2x10xi32>
    %588 = arith.cmpi eq, %584, %587 : vector<2x10xi32>
    %c5_264 = arith.constant 5 : index
    %c0_265 = arith.constant 0 : index
    %589 = memref.load %arg3[%c5_264, %c0_265] : memref<8x17xf32, #tpu.memory_space<smem>>
    %590 = vector.broadcast %589 : f32 to vector<2x10xf32>
    %591 = arith.select %588, %590, %585 : vector<2x10xi1>, vector<2x10xf32>
    %c5_266 = arith.constant 5 : index
    %c0_267 = arith.constant 0 : index
    %592 = memref.load %arg4[%c5_266, %c0_267] : memref<8x17xf32, #tpu.memory_space<smem>>
    %593 = vector.broadcast %592 : f32 to vector<2x10xf32>
    %594 = arith.select %588, %593, %586 : vector<2x10xi1>, vector<2x10xf32>
    %c1_i32_268 = arith.constant 1 : i32
    %595 = vector.broadcast %c1_i32_268 : i32 to vector<2x10xi32>
    %596 = arith.cmpi eq, %584, %595 : vector<2x10xi32>
    %c5_269 = arith.constant 5 : index
    %c1_270 = arith.constant 1 : index
    %597 = memref.load %arg3[%c5_269, %c1_270] : memref<8x17xf32, #tpu.memory_space<smem>>
    %598 = vector.broadcast %597 : f32 to vector<2x10xf32>
    %599 = arith.select %596, %598, %591 : vector<2x10xi1>, vector<2x10xf32>
    %c5_271 = arith.constant 5 : index
    %c1_272 = arith.constant 1 : index
    %600 = memref.load %arg4[%c5_271, %c1_272] : memref<8x17xf32, #tpu.memory_space<smem>>
    %601 = vector.broadcast %600 : f32 to vector<2x10xf32>
    %602 = arith.select %596, %601, %594 : vector<2x10xi1>, vector<2x10xf32>
    %c2_i32_273 = arith.constant 2 : i32
    %603 = vector.broadcast %c2_i32_273 : i32 to vector<2x10xi32>
    %604 = arith.cmpi eq, %584, %603 : vector<2x10xi32>
    %c5_274 = arith.constant 5 : index
    %c2_275 = arith.constant 2 : index
    %605 = memref.load %arg3[%c5_274, %c2_275] : memref<8x17xf32, #tpu.memory_space<smem>>
    %606 = vector.broadcast %605 : f32 to vector<2x10xf32>
    %607 = arith.select %604, %606, %599 : vector<2x10xi1>, vector<2x10xf32>
    %c5_276 = arith.constant 5 : index
    %c2_277 = arith.constant 2 : index
    %608 = memref.load %arg4[%c5_276, %c2_277] : memref<8x17xf32, #tpu.memory_space<smem>>
    %609 = vector.broadcast %608 : f32 to vector<2x10xf32>
    %610 = arith.select %604, %609, %602 : vector<2x10xi1>, vector<2x10xf32>
    %c3_i32_278 = arith.constant 3 : i32
    %611 = vector.broadcast %c3_i32_278 : i32 to vector<2x10xi32>
    %612 = arith.cmpi eq, %584, %611 : vector<2x10xi32>
    %c5_279 = arith.constant 5 : index
    %c3_280 = arith.constant 3 : index
    %613 = memref.load %arg3[%c5_279, %c3_280] : memref<8x17xf32, #tpu.memory_space<smem>>
    %614 = vector.broadcast %613 : f32 to vector<2x10xf32>
    %615 = arith.select %612, %614, %607 : vector<2x10xi1>, vector<2x10xf32>
    %c5_281 = arith.constant 5 : index
    %c3_282 = arith.constant 3 : index
    %616 = memref.load %arg4[%c5_281, %c3_282] : memref<8x17xf32, #tpu.memory_space<smem>>
    %617 = vector.broadcast %616 : f32 to vector<2x10xf32>
    %618 = arith.select %612, %617, %610 : vector<2x10xi1>, vector<2x10xf32>
    %c4_i32_283 = arith.constant 4 : i32
    %619 = vector.broadcast %c4_i32_283 : i32 to vector<2x10xi32>
    %620 = arith.cmpi eq, %584, %619 : vector<2x10xi32>
    %c5_284 = arith.constant 5 : index
    %c4_285 = arith.constant 4 : index
    %621 = memref.load %arg3[%c5_284, %c4_285] : memref<8x17xf32, #tpu.memory_space<smem>>
    %622 = vector.broadcast %621 : f32 to vector<2x10xf32>
    %623 = arith.select %620, %622, %615 : vector<2x10xi1>, vector<2x10xf32>
    %c5_286 = arith.constant 5 : index
    %c4_287 = arith.constant 4 : index
    %624 = memref.load %arg4[%c5_286, %c4_287] : memref<8x17xf32, #tpu.memory_space<smem>>
    %625 = vector.broadcast %624 : f32 to vector<2x10xf32>
    %626 = arith.select %620, %625, %618 : vector<2x10xi1>, vector<2x10xf32>
    %c5_i32_288 = arith.constant 5 : i32
    %627 = vector.broadcast %c5_i32_288 : i32 to vector<2x10xi32>
    %628 = arith.cmpi eq, %584, %627 : vector<2x10xi32>
    %c5_289 = arith.constant 5 : index
    %c5_290 = arith.constant 5 : index
    %629 = memref.load %arg3[%c5_289, %c5_290] : memref<8x17xf32, #tpu.memory_space<smem>>
    %630 = vector.broadcast %629 : f32 to vector<2x10xf32>
    %631 = arith.select %628, %630, %623 : vector<2x10xi1>, vector<2x10xf32>
    %c5_291 = arith.constant 5 : index
    %c5_292 = arith.constant 5 : index
    %632 = memref.load %arg4[%c5_291, %c5_292] : memref<8x17xf32, #tpu.memory_space<smem>>
    %633 = vector.broadcast %632 : f32 to vector<2x10xf32>
    %634 = arith.select %628, %633, %626 : vector<2x10xi1>, vector<2x10xf32>
    %c6_i32_293 = arith.constant 6 : i32
    %635 = vector.broadcast %c6_i32_293 : i32 to vector<2x10xi32>
    %636 = arith.cmpi eq, %584, %635 : vector<2x10xi32>
    %c5_294 = arith.constant 5 : index
    %c6_295 = arith.constant 6 : index
    %637 = memref.load %arg3[%c5_294, %c6_295] : memref<8x17xf32, #tpu.memory_space<smem>>
    %638 = vector.broadcast %637 : f32 to vector<2x10xf32>
    %639 = arith.select %636, %638, %631 : vector<2x10xi1>, vector<2x10xf32>
    %c5_296 = arith.constant 5 : index
    %c6_297 = arith.constant 6 : index
    %640 = memref.load %arg4[%c5_296, %c6_297] : memref<8x17xf32, #tpu.memory_space<smem>>
    %641 = vector.broadcast %640 : f32 to vector<2x10xf32>
    %642 = arith.select %636, %641, %634 : vector<2x10xi1>, vector<2x10xf32>
    %c7_i32_298 = arith.constant 7 : i32
    %643 = vector.broadcast %c7_i32_298 : i32 to vector<2x10xi32>
    %644 = arith.cmpi eq, %584, %643 : vector<2x10xi32>
    %c5_299 = arith.constant 5 : index
    %c7_300 = arith.constant 7 : index
    %645 = memref.load %arg3[%c5_299, %c7_300] : memref<8x17xf32, #tpu.memory_space<smem>>
    %646 = vector.broadcast %645 : f32 to vector<2x10xf32>
    %647 = arith.select %644, %646, %639 : vector<2x10xi1>, vector<2x10xf32>
    %c5_301 = arith.constant 5 : index
    %c7_302 = arith.constant 7 : index
    %648 = memref.load %arg4[%c5_301, %c7_302] : memref<8x17xf32, #tpu.memory_space<smem>>
    %649 = vector.broadcast %648 : f32 to vector<2x10xf32>
    %650 = arith.select %644, %649, %642 : vector<2x10xi1>, vector<2x10xf32>
    %c8_i32_303 = arith.constant 8 : i32
    %651 = vector.broadcast %c8_i32_303 : i32 to vector<2x10xi32>
    %652 = arith.cmpi eq, %584, %651 : vector<2x10xi32>
    %c5_304 = arith.constant 5 : index
    %c8_305 = arith.constant 8 : index
    %653 = memref.load %arg3[%c5_304, %c8_305] : memref<8x17xf32, #tpu.memory_space<smem>>
    %654 = vector.broadcast %653 : f32 to vector<2x10xf32>
    %655 = arith.select %652, %654, %647 : vector<2x10xi1>, vector<2x10xf32>
    %c5_306 = arith.constant 5 : index
    %c8_307 = arith.constant 8 : index
    %656 = memref.load %arg4[%c5_306, %c8_307] : memref<8x17xf32, #tpu.memory_space<smem>>
    %657 = vector.broadcast %656 : f32 to vector<2x10xf32>
    %658 = arith.select %652, %657, %650 : vector<2x10xi1>, vector<2x10xf32>
    %c9_i32_308 = arith.constant 9 : i32
    %659 = vector.broadcast %c9_i32_308 : i32 to vector<2x10xi32>
    %660 = arith.cmpi eq, %584, %659 : vector<2x10xi32>
    %c5_309 = arith.constant 5 : index
    %c9_310 = arith.constant 9 : index
    %661 = memref.load %arg3[%c5_309, %c9_310] : memref<8x17xf32, #tpu.memory_space<smem>>
    %662 = vector.broadcast %661 : f32 to vector<2x10xf32>
    %663 = arith.select %660, %662, %655 : vector<2x10xi1>, vector<2x10xf32>
    %c5_311 = arith.constant 5 : index
    %c9_312 = arith.constant 9 : index
    %664 = memref.load %arg4[%c5_311, %c9_312] : memref<8x17xf32, #tpu.memory_space<smem>>
    %665 = vector.broadcast %664 : f32 to vector<2x10xf32>
    %666 = arith.select %660, %665, %658 : vector<2x10xi1>, vector<2x10xf32>
    %c10_i32_313 = arith.constant 10 : i32
    %667 = vector.broadcast %c10_i32_313 : i32 to vector<2x10xi32>
    %668 = arith.cmpi eq, %584, %667 : vector<2x10xi32>
    %c5_314 = arith.constant 5 : index
    %c10_315 = arith.constant 10 : index
    %669 = memref.load %arg3[%c5_314, %c10_315] : memref<8x17xf32, #tpu.memory_space<smem>>
    %670 = vector.broadcast %669 : f32 to vector<2x10xf32>
    %671 = arith.select %668, %670, %663 : vector<2x10xi1>, vector<2x10xf32>
    %c5_316 = arith.constant 5 : index
    %c10_317 = arith.constant 10 : index
    %672 = memref.load %arg4[%c5_316, %c10_317] : memref<8x17xf32, #tpu.memory_space<smem>>
    %673 = vector.broadcast %672 : f32 to vector<2x10xf32>
    %674 = arith.select %668, %673, %666 : vector<2x10xi1>, vector<2x10xf32>
    %c11_i32_318 = arith.constant 11 : i32
    %675 = vector.broadcast %c11_i32_318 : i32 to vector<2x10xi32>
    %676 = arith.cmpi eq, %584, %675 : vector<2x10xi32>
    %c5_319 = arith.constant 5 : index
    %c11_320 = arith.constant 11 : index
    %677 = memref.load %arg3[%c5_319, %c11_320] : memref<8x17xf32, #tpu.memory_space<smem>>
    %678 = vector.broadcast %677 : f32 to vector<2x10xf32>
    %679 = arith.select %676, %678, %671 : vector<2x10xi1>, vector<2x10xf32>
    %c5_321 = arith.constant 5 : index
    %c11_322 = arith.constant 11 : index
    %680 = memref.load %arg4[%c5_321, %c11_322] : memref<8x17xf32, #tpu.memory_space<smem>>
    %681 = vector.broadcast %680 : f32 to vector<2x10xf32>
    %682 = arith.select %676, %681, %674 : vector<2x10xi1>, vector<2x10xf32>
    %c12_i32_323 = arith.constant 12 : i32
    %683 = vector.broadcast %c12_i32_323 : i32 to vector<2x10xi32>
    %684 = arith.cmpi eq, %584, %683 : vector<2x10xi32>
    %c5_324 = arith.constant 5 : index
    %c12_325 = arith.constant 12 : index
    %685 = memref.load %arg3[%c5_324, %c12_325] : memref<8x17xf32, #tpu.memory_space<smem>>
    %686 = vector.broadcast %685 : f32 to vector<2x10xf32>
    %687 = arith.select %684, %686, %679 : vector<2x10xi1>, vector<2x10xf32>
    %c5_326 = arith.constant 5 : index
    %c12_327 = arith.constant 12 : index
    %688 = memref.load %arg4[%c5_326, %c12_327] : memref<8x17xf32, #tpu.memory_space<smem>>
    %689 = vector.broadcast %688 : f32 to vector<2x10xf32>
    %690 = arith.select %684, %689, %682 : vector<2x10xi1>, vector<2x10xf32>
    %c13_i32_328 = arith.constant 13 : i32
    %691 = vector.broadcast %c13_i32_328 : i32 to vector<2x10xi32>
    %692 = arith.cmpi eq, %584, %691 : vector<2x10xi32>
    %c5_329 = arith.constant 5 : index
    %c13_330 = arith.constant 13 : index
    %693 = memref.load %arg3[%c5_329, %c13_330] : memref<8x17xf32, #tpu.memory_space<smem>>
    %694 = vector.broadcast %693 : f32 to vector<2x10xf32>
    %695 = arith.select %692, %694, %687 : vector<2x10xi1>, vector<2x10xf32>
    %c5_331 = arith.constant 5 : index
    %c13_332 = arith.constant 13 : index
    %696 = memref.load %arg4[%c5_331, %c13_332] : memref<8x17xf32, #tpu.memory_space<smem>>
    %697 = vector.broadcast %696 : f32 to vector<2x10xf32>
    %698 = arith.select %692, %697, %690 : vector<2x10xi1>, vector<2x10xf32>
    %c14_i32_333 = arith.constant 14 : i32
    %699 = vector.broadcast %c14_i32_333 : i32 to vector<2x10xi32>
    %700 = arith.cmpi eq, %584, %699 : vector<2x10xi32>
    %c5_334 = arith.constant 5 : index
    %c14_335 = arith.constant 14 : index
    %701 = memref.load %arg3[%c5_334, %c14_335] : memref<8x17xf32, #tpu.memory_space<smem>>
    %702 = vector.broadcast %701 : f32 to vector<2x10xf32>
    %703 = arith.select %700, %702, %695 : vector<2x10xi1>, vector<2x10xf32>
    %c5_336 = arith.constant 5 : index
    %c14_337 = arith.constant 14 : index
    %704 = memref.load %arg4[%c5_336, %c14_337] : memref<8x17xf32, #tpu.memory_space<smem>>
    %705 = vector.broadcast %704 : f32 to vector<2x10xf32>
    %706 = arith.select %700, %705, %698 : vector<2x10xi1>, vector<2x10xf32>
    %c15_i32_338 = arith.constant 15 : i32
    %707 = vector.broadcast %c15_i32_338 : i32 to vector<2x10xi32>
    %708 = arith.cmpi eq, %584, %707 : vector<2x10xi32>
    %c5_339 = arith.constant 5 : index
    %c15_340 = arith.constant 15 : index
    %709 = memref.load %arg3[%c5_339, %c15_340] : memref<8x17xf32, #tpu.memory_space<smem>>
    %710 = vector.broadcast %709 : f32 to vector<2x10xf32>
    %711 = arith.select %708, %710, %703 : vector<2x10xi1>, vector<2x10xf32>
    %c5_341 = arith.constant 5 : index
    %c15_342 = arith.constant 15 : index
    %712 = memref.load %arg4[%c5_341, %c15_342] : memref<8x17xf32, #tpu.memory_space<smem>>
    %713 = vector.broadcast %712 : f32 to vector<2x10xf32>
    %714 = arith.select %708, %713, %706 : vector<2x10xi1>, vector<2x10xf32>
    %c16_i32_343 = arith.constant 16 : i32
    %715 = vector.broadcast %c16_i32_343 : i32 to vector<2x10xi32>
    %716 = arith.cmpi eq, %584, %715 : vector<2x10xi32>
    %c5_344 = arith.constant 5 : index
    %c16_345 = arith.constant 16 : index
    %717 = memref.load %arg3[%c5_344, %c16_345] : memref<8x17xf32, #tpu.memory_space<smem>>
    %718 = vector.broadcast %717 : f32 to vector<2x10xf32>
    %719 = arith.select %716, %718, %711 : vector<2x10xi1>, vector<2x10xf32>
    %c5_346 = arith.constant 5 : index
    %c16_347 = arith.constant 16 : index
    %720 = memref.load %arg4[%c5_346, %c16_347] : memref<8x17xf32, #tpu.memory_space<smem>>
    %721 = vector.broadcast %720 : f32 to vector<2x10xf32>
    %722 = arith.select %716, %721, %714 : vector<2x10xi1>, vector<2x10xf32>
    %723 = arith.mulf %582, %722 : vector<2x10xf32>
    %724 = arith.addf %719, %723 : vector<2x10xf32>
    %cst_348 = arith.constant 5.000000e-01 : f32
    %725 = vector.broadcast %cst_348 : f32 to vector<2x10xf32>
    %726 = arith.subf %724, %725 : vector<2x10xf32>
    %727 = math.absf %726 : vector<2x10xf32>
    %cst_349 = arith.constant 1.600000e+01 : f32
    %728 = vector.broadcast %cst_349 : f32 to vector<2x10x10xf32>
    %729 = arith.mulf %58, %728 : vector<2x10x10xf32>
    %730 = arith.fptosi %729 : vector<2x10x10xf32> to vector<2x10x10xi32>
    %731 = arith.sitofp %730 : vector<2x10x10xi32> to vector<2x10x10xf32>
    %732 = arith.subf %729, %731 : vector<2x10x10xf32>
    %c16_i32_350 = arith.constant 16 : i32
    %733 = vector.broadcast %c16_i32_350 : i32 to vector<2x10x10xi32>
    %734 = arith.minsi %730, %733 : vector<2x10x10xi32>
    %cst_351 = arith.constant 0.000000e+00 : f32
    %735 = vector.broadcast %cst_351 : f32 to vector<2x10x10xf32>
    %cst_352 = arith.constant 0.000000e+00 : f32
    %736 = vector.broadcast %cst_352 : f32 to vector<2x10x10xf32>
    %c0_i32_353 = arith.constant 0 : i32
    %737 = vector.broadcast %c0_i32_353 : i32 to vector<2x10x10xi32>
    %738 = arith.cmpi eq, %734, %737 : vector<2x10x10xi32>
    %c6_354 = arith.constant 6 : index
    %c0_355 = arith.constant 0 : index
    %739 = memref.load %arg3[%c6_354, %c0_355] : memref<8x17xf32, #tpu.memory_space<smem>>
    %740 = vector.broadcast %739 : f32 to vector<2x10x10xf32>
    %741 = arith.select %738, %740, %735 : vector<2x10x10xi1>, vector<2x10x10xf32>
    %c6_356 = arith.constant 6 : index
    %c0_357 = arith.constant 0 : index
    %742 = memref.load %arg4[%c6_356, %c0_357] : memref<8x17xf32, #tpu.memory_space<smem>>
    %743 = vector.broadcast %742 : f32 to vector<2x10x10xf32>
    %744 = arith.select %738, %743, %736 : vector<2x10x10xi1>, vector<2x10x10xf32>
    %c1_i32_358 = arith.constant 1 : i32
    %745 = vector.broadcast %c1_i32_358 : i32 to vector<2x10x10xi32>
    %746 = arith.cmpi eq, %734, %745 : vector<2x10x10xi32>
    %c6_359 = arith.constant 6 : index
    %c1_360 = arith.constant 1 : index
    %747 = memref.load %arg3[%c6_359, %c1_360] : memref<8x17xf32, #tpu.memory_space<smem>>
    %748 = vector.broadcast %747 : f32 to vector<2x10x10xf32>
    %749 = arith.select %746, %748, %741 : vector<2x10x10xi1>, vector<2x10x10xf32>
    %c6_361 = arith.constant 6 : index
    %c1_362 = arith.constant 1 : index
    %750 = memref.load %arg4[%c6_361, %c1_362] : memref<8x17xf32, #tpu.memory_space<smem>>
    %751 = vector.broadcast %750 : f32 to vector<2x10x10xf32>
    %752 = arith.select %746, %751, %744 : vector<2x10x10xi1>, vector<2x10x10xf32>
    %c2_i32_363 = arith.constant 2 : i32
    %753 = vector.broadcast %c2_i32_363 : i32 to vector<2x10x10xi32>
    %754 = arith.cmpi eq, %734, %753 : vector<2x10x10xi32>
    %c6_364 = arith.constant 6 : index
    %c2_365 = arith.constant 2 : index
    %755 = memref.load %arg3[%c6_364, %c2_365] : memref<8x17xf32, #tpu.memory_space<smem>>
    %756 = vector.broadcast %755 : f32 to vector<2x10x10xf32>
    %757 = arith.select %754, %756, %749 : vector<2x10x10xi1>, vector<2x10x10xf32>
    %c6_366 = arith.constant 6 : index
    %c2_367 = arith.constant 2 : index
    %758 = memref.load %arg4[%c6_366, %c2_367] : memref<8x17xf32, #tpu.memory_space<smem>>
    %759 = vector.broadcast %758 : f32 to vector<2x10x10xf32>
    %760 = arith.select %754, %759, %752 : vector<2x10x10xi1>, vector<2x10x10xf32>
    %c3_i32_368 = arith.constant 3 : i32
    %761 = vector.broadcast %c3_i32_368 : i32 to vector<2x10x10xi32>
    %762 = arith.cmpi eq, %734, %761 : vector<2x10x10xi32>
    %c6_369 = arith.constant 6 : index
    %c3_370 = arith.constant 3 : index
    %763 = memref.load %arg3[%c6_369, %c3_370] : memref<8x17xf32, #tpu.memory_space<smem>>
    %764 = vector.broadcast %763 : f32 to vector<2x10x10xf32>
    %765 = arith.select %762, %764, %757 : vector<2x10x10xi1>, vector<2x10x10xf32>
    %c6_371 = arith.constant 6 : index
    %c3_372 = arith.constant 3 : index
    %766 = memref.load %arg4[%c6_371, %c3_372] : memref<8x17xf32, #tpu.memory_space<smem>>
    %767 = vector.broadcast %766 : f32 to vector<2x10x10xf32>
    %768 = arith.select %762, %767, %760 : vector<2x10x10xi1>, vector<2x10x10xf32>
    %c4_i32_373 = arith.constant 4 : i32
    %769 = vector.broadcast %c4_i32_373 : i32 to vector<2x10x10xi32>
    %770 = arith.cmpi eq, %734, %769 : vector<2x10x10xi32>
    %c6_374 = arith.constant 6 : index
    %c4_375 = arith.constant 4 : index
    %771 = memref.load %arg3[%c6_374, %c4_375] : memref<8x17xf32, #tpu.memory_space<smem>>
    %772 = vector.broadcast %771 : f32 to vector<2x10x10xf32>
    %773 = arith.select %770, %772, %765 : vector<2x10x10xi1>, vector<2x10x10xf32>
    %c6_376 = arith.constant 6 : index
    %c4_377 = arith.constant 4 : index
    %774 = memref.load %arg4[%c6_376, %c4_377] : memref<8x17xf32, #tpu.memory_space<smem>>
    %775 = vector.broadcast %774 : f32 to vector<2x10x10xf32>
    %776 = arith.select %770, %775, %768 : vector<2x10x10xi1>, vector<2x10x10xf32>
    %c5_i32_378 = arith.constant 5 : i32
    %777 = vector.broadcast %c5_i32_378 : i32 to vector<2x10x10xi32>
    %778 = arith.cmpi eq, %734, %777 : vector<2x10x10xi32>
    %c6_379 = arith.constant 6 : index
    %c5_380 = arith.constant 5 : index
    %779 = memref.load %arg3[%c6_379, %c5_380] : memref<8x17xf32, #tpu.memory_space<smem>>
    %780 = vector.broadcast %779 : f32 to vector<2x10x10xf32>
    %781 = arith.select %778, %780, %773 : vector<2x10x10xi1>, vector<2x10x10xf32>
    %c6_381 = arith.constant 6 : index
    %c5_382 = arith.constant 5 : index
    %782 = memref.load %arg4[%c6_381, %c5_382] : memref<8x17xf32, #tpu.memory_space<smem>>
    %783 = vector.broadcast %782 : f32 to vector<2x10x10xf32>
    %784 = arith.select %778, %783, %776 : vector<2x10x10xi1>, vector<2x10x10xf32>
    %c6_i32_383 = arith.constant 6 : i32
    %785 = vector.broadcast %c6_i32_383 : i32 to vector<2x10x10xi32>
    %786 = arith.cmpi eq, %734, %785 : vector<2x10x10xi32>
    %c6_384 = arith.constant 6 : index
    %c6_385 = arith.constant 6 : index
    %787 = memref.load %arg3[%c6_384, %c6_385] : memref<8x17xf32, #tpu.memory_space<smem>>
    %788 = vector.broadcast %787 : f32 to vector<2x10x10xf32>
    %789 = arith.select %786, %788, %781 : vector<2x10x10xi1>, vector<2x10x10xf32>
    %c6_386 = arith.constant 6 : index
    %c6_387 = arith.constant 6 : index
    %790 = memref.load %arg4[%c6_386, %c6_387] : memref<8x17xf32, #tpu.memory_space<smem>>
    %791 = vector.broadcast %790 : f32 to vector<2x10x10xf32>
    %792 = arith.select %786, %791, %784 : vector<2x10x10xi1>, vector<2x10x10xf32>
    %c7_i32_388 = arith.constant 7 : i32
    %793 = vector.broadcast %c7_i32_388 : i32 to vector<2x10x10xi32>
    %794 = arith.cmpi eq, %734, %793 : vector<2x10x10xi32>
    %c6_389 = arith.constant 6 : index
    %c7_390 = arith.constant 7 : index
    %795 = memref.load %arg3[%c6_389, %c7_390] : memref<8x17xf32, #tpu.memory_space<smem>>
    %796 = vector.broadcast %795 : f32 to vector<2x10x10xf32>
    %797 = arith.select %794, %796, %789 : vector<2x10x10xi1>, vector<2x10x10xf32>
    %c6_391 = arith.constant 6 : index
    %c7_392 = arith.constant 7 : index
    %798 = memref.load %arg4[%c6_391, %c7_392] : memref<8x17xf32, #tpu.memory_space<smem>>
    %799 = vector.broadcast %798 : f32 to vector<2x10x10xf32>
    %800 = arith.select %794, %799, %792 : vector<2x10x10xi1>, vector<2x10x10xf32>
    %c8_i32_393 = arith.constant 8 : i32
    %801 = vector.broadcast %c8_i32_393 : i32 to vector<2x10x10xi32>
    %802 = arith.cmpi eq, %734, %801 : vector<2x10x10xi32>
    %c6_394 = arith.constant 6 : index
    %c8_395 = arith.constant 8 : index
    %803 = memref.load %arg3[%c6_394, %c8_395] : memref<8x17xf32, #tpu.memory_space<smem>>
    %804 = vector.broadcast %803 : f32 to vector<2x10x10xf32>
    %805 = arith.select %802, %804, %797 : vector<2x10x10xi1>, vector<2x10x10xf32>
    %c6_396 = arith.constant 6 : index
    %c8_397 = arith.constant 8 : index
    %806 = memref.load %arg4[%c6_396, %c8_397] : memref<8x17xf32, #tpu.memory_space<smem>>
    %807 = vector.broadcast %806 : f32 to vector<2x10x10xf32>
    %808 = arith.select %802, %807, %800 : vector<2x10x10xi1>, vector<2x10x10xf32>
    %c9_i32_398 = arith.constant 9 : i32
    %809 = vector.broadcast %c9_i32_398 : i32 to vector<2x10x10xi32>
    %810 = arith.cmpi eq, %734, %809 : vector<2x10x10xi32>
    %c6_399 = arith.constant 6 : index
    %c9_400 = arith.constant 9 : index
    %811 = memref.load %arg3[%c6_399, %c9_400] : memref<8x17xf32, #tpu.memory_space<smem>>
    %812 = vector.broadcast %811 : f32 to vector<2x10x10xf32>
    %813 = arith.select %810, %812, %805 : vector<2x10x10xi1>, vector<2x10x10xf32>
    %c6_401 = arith.constant 6 : index
    %c9_402 = arith.constant 9 : index
    %814 = memref.load %arg4[%c6_401, %c9_402] : memref<8x17xf32, #tpu.memory_space<smem>>
    %815 = vector.broadcast %814 : f32 to vector<2x10x10xf32>
    %816 = arith.select %810, %815, %808 : vector<2x10x10xi1>, vector<2x10x10xf32>
    %c10_i32_403 = arith.constant 10 : i32
    %817 = vector.broadcast %c10_i32_403 : i32 to vector<2x10x10xi32>
    %818 = arith.cmpi eq, %734, %817 : vector<2x10x10xi32>
    %c6_404 = arith.constant 6 : index
    %c10_405 = arith.constant 10 : index
    %819 = memref.load %arg3[%c6_404, %c10_405] : memref<8x17xf32, #tpu.memory_space<smem>>
    %820 = vector.broadcast %819 : f32 to vector<2x10x10xf32>
    %821 = arith.select %818, %820, %813 : vector<2x10x10xi1>, vector<2x10x10xf32>
    %c6_406 = arith.constant 6 : index
    %c10_407 = arith.constant 10 : index
    %822 = memref.load %arg4[%c6_406, %c10_407] : memref<8x17xf32, #tpu.memory_space<smem>>
    %823 = vector.broadcast %822 : f32 to vector<2x10x10xf32>
    %824 = arith.select %818, %823, %816 : vector<2x10x10xi1>, vector<2x10x10xf32>
    %c11_i32_408 = arith.constant 11 : i32
    %825 = vector.broadcast %c11_i32_408 : i32 to vector<2x10x10xi32>
    %826 = arith.cmpi eq, %734, %825 : vector<2x10x10xi32>
    %c6_409 = arith.constant 6 : index
    %c11_410 = arith.constant 11 : index
    %827 = memref.load %arg3[%c6_409, %c11_410] : memref<8x17xf32, #tpu.memory_space<smem>>
    %828 = vector.broadcast %827 : f32 to vector<2x10x10xf32>
    %829 = arith.select %826, %828, %821 : vector<2x10x10xi1>, vector<2x10x10xf32>
    %c6_411 = arith.constant 6 : index
    %c11_412 = arith.constant 11 : index
    %830 = memref.load %arg4[%c6_411, %c11_412] : memref<8x17xf32, #tpu.memory_space<smem>>
    %831 = vector.broadcast %830 : f32 to vector<2x10x10xf32>
    %832 = arith.select %826, %831, %824 : vector<2x10x10xi1>, vector<2x10x10xf32>
    %c12_i32_413 = arith.constant 12 : i32
    %833 = vector.broadcast %c12_i32_413 : i32 to vector<2x10x10xi32>
    %834 = arith.cmpi eq, %734, %833 : vector<2x10x10xi32>
    %c6_414 = arith.constant 6 : index
    %c12_415 = arith.constant 12 : index
    %835 = memref.load %arg3[%c6_414, %c12_415] : memref<8x17xf32, #tpu.memory_space<smem>>
    %836 = vector.broadcast %835 : f32 to vector<2x10x10xf32>
    %837 = arith.select %834, %836, %829 : vector<2x10x10xi1>, vector<2x10x10xf32>
    %c6_416 = arith.constant 6 : index
    %c12_417 = arith.constant 12 : index
    %838 = memref.load %arg4[%c6_416, %c12_417] : memref<8x17xf32, #tpu.memory_space<smem>>
    %839 = vector.broadcast %838 : f32 to vector<2x10x10xf32>
    %840 = arith.select %834, %839, %832 : vector<2x10x10xi1>, vector<2x10x10xf32>
    %c13_i32_418 = arith.constant 13 : i32
    %841 = vector.broadcast %c13_i32_418 : i32 to vector<2x10x10xi32>
    %842 = arith.cmpi eq, %734, %841 : vector<2x10x10xi32>
    %c6_419 = arith.constant 6 : index
    %c13_420 = arith.constant 13 : index
    %843 = memref.load %arg3[%c6_419, %c13_420] : memref<8x17xf32, #tpu.memory_space<smem>>
    %844 = vector.broadcast %843 : f32 to vector<2x10x10xf32>
    %845 = arith.select %842, %844, %837 : vector<2x10x10xi1>, vector<2x10x10xf32>
    %c6_421 = arith.constant 6 : index
    %c13_422 = arith.constant 13 : index
    %846 = memref.load %arg4[%c6_421, %c13_422] : memref<8x17xf32, #tpu.memory_space<smem>>
    %847 = vector.broadcast %846 : f32 to vector<2x10x10xf32>
    %848 = arith.select %842, %847, %840 : vector<2x10x10xi1>, vector<2x10x10xf32>
    %c14_i32_423 = arith.constant 14 : i32
    %849 = vector.broadcast %c14_i32_423 : i32 to vector<2x10x10xi32>
    %850 = arith.cmpi eq, %734, %849 : vector<2x10x10xi32>
    %c6_424 = arith.constant 6 : index
    %c14_425 = arith.constant 14 : index
    %851 = memref.load %arg3[%c6_424, %c14_425] : memref<8x17xf32, #tpu.memory_space<smem>>
    %852 = vector.broadcast %851 : f32 to vector<2x10x10xf32>
    %853 = arith.select %850, %852, %845 : vector<2x10x10xi1>, vector<2x10x10xf32>
    %c6_426 = arith.constant 6 : index
    %c14_427 = arith.constant 14 : index
    %854 = memref.load %arg4[%c6_426, %c14_427] : memref<8x17xf32, #tpu.memory_space<smem>>
    %855 = vector.broadcast %854 : f32 to vector<2x10x10xf32>
    %856 = arith.select %850, %855, %848 : vector<2x10x10xi1>, vector<2x10x10xf32>
    %c15_i32_428 = arith.constant 15 : i32
    %857 = vector.broadcast %c15_i32_428 : i32 to vector<2x10x10xi32>
    %858 = arith.cmpi eq, %734, %857 : vector<2x10x10xi32>
    %c6_429 = arith.constant 6 : index
    %c15_430 = arith.constant 15 : index
    %859 = memref.load %arg3[%c6_429, %c15_430] : memref<8x17xf32, #tpu.memory_space<smem>>
    %860 = vector.broadcast %859 : f32 to vector<2x10x10xf32>
    %861 = arith.select %858, %860, %853 : vector<2x10x10xi1>, vector<2x10x10xf32>
    %c6_431 = arith.constant 6 : index
    %c15_432 = arith.constant 15 : index
    %862 = memref.load %arg4[%c6_431, %c15_432] : memref<8x17xf32, #tpu.memory_space<smem>>
    %863 = vector.broadcast %862 : f32 to vector<2x10x10xf32>
    %864 = arith.select %858, %863, %856 : vector<2x10x10xi1>, vector<2x10x10xf32>
    %c16_i32_433 = arith.constant 16 : i32
    %865 = vector.broadcast %c16_i32_433 : i32 to vector<2x10x10xi32>
    %866 = arith.cmpi eq, %734, %865 : vector<2x10x10xi32>
    %c6_434 = arith.constant 6 : index
    %c16_435 = arith.constant 16 : index
    %867 = memref.load %arg3[%c6_434, %c16_435] : memref<8x17xf32, #tpu.memory_space<smem>>
    %868 = vector.broadcast %867 : f32 to vector<2x10x10xf32>
    %869 = arith.select %866, %868, %861 : vector<2x10x10xi1>, vector<2x10x10xf32>
    %c6_436 = arith.constant 6 : index
    %c16_437 = arith.constant 16 : index
    %870 = memref.load %arg4[%c6_436, %c16_437] : memref<8x17xf32, #tpu.memory_space<smem>>
    %871 = vector.broadcast %870 : f32 to vector<2x10x10xf32>
    %872 = arith.select %866, %871, %864 : vector<2x10x10xi1>, vector<2x10x10xf32>
    %873 = arith.mulf %732, %872 : vector<2x10x10xf32>
    %874 = arith.addf %869, %873 : vector<2x10x10xf32>
    %cst_438 = arith.constant 5.000000e-01 : f32
    %875 = vector.broadcast %cst_438 : f32 to vector<2x10x10xf32>
    %876 = arith.subf %874, %875 : vector<2x10x10xf32>
    %877 = math.absf %876 : vector<2x10x10xf32>
    %cst_439 = arith.constant dense<0.000000e+00> : vector<2xf32>
    %878 = vector.multi_reduction <add>, %727, %cst_439 [1] : vector<2x10xf32> to vector<2xf32>
    %879 = vector.shape_cast %878 : vector<2xf32> to vector<2x1xf32>
    %cst_440 = arith.constant 1.000000e+01 : f32
    %880 = vector.broadcast %cst_440 : f32 to vector<2x1xf32>
    %881 = arith.divf %879, %880 : vector<2x1xf32>
    %cst_441 = arith.constant dense<0.000000e+00> : vector<2x10xf32>
    %882 = vector.multi_reduction <add>, %877, %cst_441 [2] : vector<2x10x10xf32> to vector<2x10xf32>
    %cst_442 = arith.constant 1.000000e+01 : f32
    %883 = vector.broadcast %cst_442 : f32 to vector<2x10xf32>
    %884 = arith.divf %882, %883 : vector<2x10xf32>
    %cst_443 = arith.constant dense<0.000000e+00> : vector<2xf32>
    %885 = vector.multi_reduction <add>, %884, %cst_443 [1] : vector<2x10xf32> to vector<2xf32>
    %886 = vector.shape_cast %885 : vector<2xf32> to vector<2x1xf32>
    %cst_444 = arith.constant 1.000000e+01 : f32
    %887 = vector.broadcast %cst_444 : f32 to vector<2x1xf32>
    %888 = arith.divf %886, %887 : vector<2x1xf32>
    %889 = arith.addf %881, %888 : vector<2x1xf32>
    %cst_445 = arith.constant 1.600000e+01 : f32
    %890 = vector.broadcast %cst_445 : f32 to vector<2x1xf32>
    %891 = arith.mulf %889, %890 : vector<2x1xf32>
    %892 = arith.fptosi %891 : vector<2x1xf32> to vector<2x1xi32>
    %893 = arith.sitofp %892 : vector<2x1xi32> to vector<2x1xf32>
    %894 = arith.subf %891, %893 : vector<2x1xf32>
    %c16_i32_446 = arith.constant 16 : i32
    %895 = vector.broadcast %c16_i32_446 : i32 to vector<2x1xi32>
    %896 = arith.minsi %892, %895 : vector<2x1xi32>
    %cst_447 = arith.constant 0.000000e+00 : f32
    %897 = vector.broadcast %cst_447 : f32 to vector<2x1xf32>
    %cst_448 = arith.constant 0.000000e+00 : f32
    %898 = vector.broadcast %cst_448 : f32 to vector<2x1xf32>
    %c0_i32_449 = arith.constant 0 : i32
    %899 = vector.broadcast %c0_i32_449 : i32 to vector<2x1xi32>
    %900 = arith.cmpi eq, %896, %899 : vector<2x1xi32>
    %c7_450 = arith.constant 7 : index
    %c0_451 = arith.constant 0 : index
    %901 = memref.load %arg3[%c7_450, %c0_451] : memref<8x17xf32, #tpu.memory_space<smem>>
    %902 = vector.broadcast %901 : f32 to vector<2x1xf32>
    %903 = arith.select %900, %902, %897 : vector<2x1xi1>, vector<2x1xf32>
    %c7_452 = arith.constant 7 : index
    %c0_453 = arith.constant 0 : index
    %904 = memref.load %arg4[%c7_452, %c0_453] : memref<8x17xf32, #tpu.memory_space<smem>>
    %905 = vector.broadcast %904 : f32 to vector<2x1xf32>
    %906 = arith.select %900, %905, %898 : vector<2x1xi1>, vector<2x1xf32>
    %c1_i32_454 = arith.constant 1 : i32
    %907 = vector.broadcast %c1_i32_454 : i32 to vector<2x1xi32>
    %908 = arith.cmpi eq, %896, %907 : vector<2x1xi32>
    %c7_455 = arith.constant 7 : index
    %c1_456 = arith.constant 1 : index
    %909 = memref.load %arg3[%c7_455, %c1_456] : memref<8x17xf32, #tpu.memory_space<smem>>
    %910 = vector.broadcast %909 : f32 to vector<2x1xf32>
    %911 = arith.select %908, %910, %903 : vector<2x1xi1>, vector<2x1xf32>
    %c7_457 = arith.constant 7 : index
    %c1_458 = arith.constant 1 : index
    %912 = memref.load %arg4[%c7_457, %c1_458] : memref<8x17xf32, #tpu.memory_space<smem>>
    %913 = vector.broadcast %912 : f32 to vector<2x1xf32>
    %914 = arith.select %908, %913, %906 : vector<2x1xi1>, vector<2x1xf32>
    %c2_i32_459 = arith.constant 2 : i32
    %915 = vector.broadcast %c2_i32_459 : i32 to vector<2x1xi32>
    %916 = arith.cmpi eq, %896, %915 : vector<2x1xi32>
    %c7_460 = arith.constant 7 : index
    %c2_461 = arith.constant 2 : index
    %917 = memref.load %arg3[%c7_460, %c2_461] : memref<8x17xf32, #tpu.memory_space<smem>>
    %918 = vector.broadcast %917 : f32 to vector<2x1xf32>
    %919 = arith.select %916, %918, %911 : vector<2x1xi1>, vector<2x1xf32>
    %c7_462 = arith.constant 7 : index
    %c2_463 = arith.constant 2 : index
    %920 = memref.load %arg4[%c7_462, %c2_463] : memref<8x17xf32, #tpu.memory_space<smem>>
    %921 = vector.broadcast %920 : f32 to vector<2x1xf32>
    %922 = arith.select %916, %921, %914 : vector<2x1xi1>, vector<2x1xf32>
    %c3_i32_464 = arith.constant 3 : i32
    %923 = vector.broadcast %c3_i32_464 : i32 to vector<2x1xi32>
    %924 = arith.cmpi eq, %896, %923 : vector<2x1xi32>
    %c7_465 = arith.constant 7 : index
    %c3_466 = arith.constant 3 : index
    %925 = memref.load %arg3[%c7_465, %c3_466] : memref<8x17xf32, #tpu.memory_space<smem>>
    %926 = vector.broadcast %925 : f32 to vector<2x1xf32>
    %927 = arith.select %924, %926, %919 : vector<2x1xi1>, vector<2x1xf32>
    %c7_467 = arith.constant 7 : index
    %c3_468 = arith.constant 3 : index
    %928 = memref.load %arg4[%c7_467, %c3_468] : memref<8x17xf32, #tpu.memory_space<smem>>
    %929 = vector.broadcast %928 : f32 to vector<2x1xf32>
    %930 = arith.select %924, %929, %922 : vector<2x1xi1>, vector<2x1xf32>
    %c4_i32_469 = arith.constant 4 : i32
    %931 = vector.broadcast %c4_i32_469 : i32 to vector<2x1xi32>
    %932 = arith.cmpi eq, %896, %931 : vector<2x1xi32>
    %c7_470 = arith.constant 7 : index
    %c4_471 = arith.constant 4 : index
    %933 = memref.load %arg3[%c7_470, %c4_471] : memref<8x17xf32, #tpu.memory_space<smem>>
    %934 = vector.broadcast %933 : f32 to vector<2x1xf32>
    %935 = arith.select %932, %934, %927 : vector<2x1xi1>, vector<2x1xf32>
    %c7_472 = arith.constant 7 : index
    %c4_473 = arith.constant 4 : index
    %936 = memref.load %arg4[%c7_472, %c4_473] : memref<8x17xf32, #tpu.memory_space<smem>>
    %937 = vector.broadcast %936 : f32 to vector<2x1xf32>
    %938 = arith.select %932, %937, %930 : vector<2x1xi1>, vector<2x1xf32>
    %c5_i32_474 = arith.constant 5 : i32
    %939 = vector.broadcast %c5_i32_474 : i32 to vector<2x1xi32>
    %940 = arith.cmpi eq, %896, %939 : vector<2x1xi32>
    %c7_475 = arith.constant 7 : index
    %c5_476 = arith.constant 5 : index
    %941 = memref.load %arg3[%c7_475, %c5_476] : memref<8x17xf32, #tpu.memory_space<smem>>
    %942 = vector.broadcast %941 : f32 to vector<2x1xf32>
    %943 = arith.select %940, %942, %935 : vector<2x1xi1>, vector<2x1xf32>
    %c7_477 = arith.constant 7 : index
    %c5_478 = arith.constant 5 : index
    %944 = memref.load %arg4[%c7_477, %c5_478] : memref<8x17xf32, #tpu.memory_space<smem>>
    %945 = vector.broadcast %944 : f32 to vector<2x1xf32>
    %946 = arith.select %940, %945, %938 : vector<2x1xi1>, vector<2x1xf32>
    %c6_i32_479 = arith.constant 6 : i32
    %947 = vector.broadcast %c6_i32_479 : i32 to vector<2x1xi32>
    %948 = arith.cmpi eq, %896, %947 : vector<2x1xi32>
    %c7_480 = arith.constant 7 : index
    %c6_481 = arith.constant 6 : index
    %949 = memref.load %arg3[%c7_480, %c6_481] : memref<8x17xf32, #tpu.memory_space<smem>>
    %950 = vector.broadcast %949 : f32 to vector<2x1xf32>
    %951 = arith.select %948, %950, %943 : vector<2x1xi1>, vector<2x1xf32>
    %c7_482 = arith.constant 7 : index
    %c6_483 = arith.constant 6 : index
    %952 = memref.load %arg4[%c7_482, %c6_483] : memref<8x17xf32, #tpu.memory_space<smem>>
    %953 = vector.broadcast %952 : f32 to vector<2x1xf32>
    %954 = arith.select %948, %953, %946 : vector<2x1xi1>, vector<2x1xf32>
    %c7_i32_484 = arith.constant 7 : i32
    %955 = vector.broadcast %c7_i32_484 : i32 to vector<2x1xi32>
    %956 = arith.cmpi eq, %896, %955 : vector<2x1xi32>
    %c7_485 = arith.constant 7 : index
    %c7_486 = arith.constant 7 : index
    %957 = memref.load %arg3[%c7_485, %c7_486] : memref<8x17xf32, #tpu.memory_space<smem>>
    %958 = vector.broadcast %957 : f32 to vector<2x1xf32>
    %959 = arith.select %956, %958, %951 : vector<2x1xi1>, vector<2x1xf32>
    %c7_487 = arith.constant 7 : index
    %c7_488 = arith.constant 7 : index
    %960 = memref.load %arg4[%c7_487, %c7_488] : memref<8x17xf32, #tpu.memory_space<smem>>
    %961 = vector.broadcast %960 : f32 to vector<2x1xf32>
    %962 = arith.select %956, %961, %954 : vector<2x1xi1>, vector<2x1xf32>
    %c8_i32_489 = arith.constant 8 : i32
    %963 = vector.broadcast %c8_i32_489 : i32 to vector<2x1xi32>
    %964 = arith.cmpi eq, %896, %963 : vector<2x1xi32>
    %c7_490 = arith.constant 7 : index
    %c8_491 = arith.constant 8 : index
    %965 = memref.load %arg3[%c7_490, %c8_491] : memref<8x17xf32, #tpu.memory_space<smem>>
    %966 = vector.broadcast %965 : f32 to vector<2x1xf32>
    %967 = arith.select %964, %966, %959 : vector<2x1xi1>, vector<2x1xf32>
    %c7_492 = arith.constant 7 : index
    %c8_493 = arith.constant 8 : index
    %968 = memref.load %arg4[%c7_492, %c8_493] : memref<8x17xf32, #tpu.memory_space<smem>>
    %969 = vector.broadcast %968 : f32 to vector<2x1xf32>
    %970 = arith.select %964, %969, %962 : vector<2x1xi1>, vector<2x1xf32>
    %c9_i32_494 = arith.constant 9 : i32
    %971 = vector.broadcast %c9_i32_494 : i32 to vector<2x1xi32>
    %972 = arith.cmpi eq, %896, %971 : vector<2x1xi32>
    %c7_495 = arith.constant 7 : index
    %c9_496 = arith.constant 9 : index
    %973 = memref.load %arg3[%c7_495, %c9_496] : memref<8x17xf32, #tpu.memory_space<smem>>
    %974 = vector.broadcast %973 : f32 to vector<2x1xf32>
    %975 = arith.select %972, %974, %967 : vector<2x1xi1>, vector<2x1xf32>
    %c7_497 = arith.constant 7 : index
    %c9_498 = arith.constant 9 : index
    %976 = memref.load %arg4[%c7_497, %c9_498] : memref<8x17xf32, #tpu.memory_space<smem>>
    %977 = vector.broadcast %976 : f32 to vector<2x1xf32>
    %978 = arith.select %972, %977, %970 : vector<2x1xi1>, vector<2x1xf32>
    %c10_i32_499 = arith.constant 10 : i32
    %979 = vector.broadcast %c10_i32_499 : i32 to vector<2x1xi32>
    %980 = arith.cmpi eq, %896, %979 : vector<2x1xi32>
    %c7_500 = arith.constant 7 : index
    %c10_501 = arith.constant 10 : index
    %981 = memref.load %arg3[%c7_500, %c10_501] : memref<8x17xf32, #tpu.memory_space<smem>>
    %982 = vector.broadcast %981 : f32 to vector<2x1xf32>
    %983 = arith.select %980, %982, %975 : vector<2x1xi1>, vector<2x1xf32>
    %c7_502 = arith.constant 7 : index
    %c10_503 = arith.constant 10 : index
    %984 = memref.load %arg4[%c7_502, %c10_503] : memref<8x17xf32, #tpu.memory_space<smem>>
    %985 = vector.broadcast %984 : f32 to vector<2x1xf32>
    %986 = arith.select %980, %985, %978 : vector<2x1xi1>, vector<2x1xf32>
    %c11_i32_504 = arith.constant 11 : i32
    %987 = vector.broadcast %c11_i32_504 : i32 to vector<2x1xi32>
    %988 = arith.cmpi eq, %896, %987 : vector<2x1xi32>
    %c7_505 = arith.constant 7 : index
    %c11_506 = arith.constant 11 : index
    %989 = memref.load %arg3[%c7_505, %c11_506] : memref<8x17xf32, #tpu.memory_space<smem>>
    %990 = vector.broadcast %989 : f32 to vector<2x1xf32>
    %991 = arith.select %988, %990, %983 : vector<2x1xi1>, vector<2x1xf32>
    %c7_507 = arith.constant 7 : index
    %c11_508 = arith.constant 11 : index
    %992 = memref.load %arg4[%c7_507, %c11_508] : memref<8x17xf32, #tpu.memory_space<smem>>
    %993 = vector.broadcast %992 : f32 to vector<2x1xf32>
    %994 = arith.select %988, %993, %986 : vector<2x1xi1>, vector<2x1xf32>
    %c12_i32_509 = arith.constant 12 : i32
    %995 = vector.broadcast %c12_i32_509 : i32 to vector<2x1xi32>
    %996 = arith.cmpi eq, %896, %995 : vector<2x1xi32>
    %c7_510 = arith.constant 7 : index
    %c12_511 = arith.constant 12 : index
    %997 = memref.load %arg3[%c7_510, %c12_511] : memref<8x17xf32, #tpu.memory_space<smem>>
    %998 = vector.broadcast %997 : f32 to vector<2x1xf32>
    %999 = arith.select %996, %998, %991 : vector<2x1xi1>, vector<2x1xf32>
    %c7_512 = arith.constant 7 : index
    %c12_513 = arith.constant 12 : index
    %1000 = memref.load %arg4[%c7_512, %c12_513] : memref<8x17xf32, #tpu.memory_space<smem>>
    %1001 = vector.broadcast %1000 : f32 to vector<2x1xf32>
    %1002 = arith.select %996, %1001, %994 : vector<2x1xi1>, vector<2x1xf32>
    %c13_i32_514 = arith.constant 13 : i32
    %1003 = vector.broadcast %c13_i32_514 : i32 to vector<2x1xi32>
    %1004 = arith.cmpi eq, %896, %1003 : vector<2x1xi32>
    %c7_515 = arith.constant 7 : index
    %c13_516 = arith.constant 13 : index
    %1005 = memref.load %arg3[%c7_515, %c13_516] : memref<8x17xf32, #tpu.memory_space<smem>>
    %1006 = vector.broadcast %1005 : f32 to vector<2x1xf32>
    %1007 = arith.select %1004, %1006, %999 : vector<2x1xi1>, vector<2x1xf32>
    %c7_517 = arith.constant 7 : index
    %c13_518 = arith.constant 13 : index
    %1008 = memref.load %arg4[%c7_517, %c13_518] : memref<8x17xf32, #tpu.memory_space<smem>>
    %1009 = vector.broadcast %1008 : f32 to vector<2x1xf32>
    %1010 = arith.select %1004, %1009, %1002 : vector<2x1xi1>, vector<2x1xf32>
    %c14_i32_519 = arith.constant 14 : i32
    %1011 = vector.broadcast %c14_i32_519 : i32 to vector<2x1xi32>
    %1012 = arith.cmpi eq, %896, %1011 : vector<2x1xi32>
    %c7_520 = arith.constant 7 : index
    %c14_521 = arith.constant 14 : index
    %1013 = memref.load %arg3[%c7_520, %c14_521] : memref<8x17xf32, #tpu.memory_space<smem>>
    %1014 = vector.broadcast %1013 : f32 to vector<2x1xf32>
    %1015 = arith.select %1012, %1014, %1007 : vector<2x1xi1>, vector<2x1xf32>
    %c7_522 = arith.constant 7 : index
    %c14_523 = arith.constant 14 : index
    %1016 = memref.load %arg4[%c7_522, %c14_523] : memref<8x17xf32, #tpu.memory_space<smem>>
    %1017 = vector.broadcast %1016 : f32 to vector<2x1xf32>
    %1018 = arith.select %1012, %1017, %1010 : vector<2x1xi1>, vector<2x1xf32>
    %c15_i32_524 = arith.constant 15 : i32
    %1019 = vector.broadcast %c15_i32_524 : i32 to vector<2x1xi32>
    %1020 = arith.cmpi eq, %896, %1019 : vector<2x1xi32>
    %c7_525 = arith.constant 7 : index
    %c15_526 = arith.constant 15 : index
    %1021 = memref.load %arg3[%c7_525, %c15_526] : memref<8x17xf32, #tpu.memory_space<smem>>
    %1022 = vector.broadcast %1021 : f32 to vector<2x1xf32>
    %1023 = arith.select %1020, %1022, %1015 : vector<2x1xi1>, vector<2x1xf32>
    %c7_527 = arith.constant 7 : index
    %c15_528 = arith.constant 15 : index
    %1024 = memref.load %arg4[%c7_527, %c15_528] : memref<8x17xf32, #tpu.memory_space<smem>>
    %1025 = vector.broadcast %1024 : f32 to vector<2x1xf32>
    %1026 = arith.select %1020, %1025, %1018 : vector<2x1xi1>, vector<2x1xf32>
    %c16_i32_529 = arith.constant 16 : i32
    %1027 = vector.broadcast %c16_i32_529 : i32 to vector<2x1xi32>
    %1028 = arith.cmpi eq, %896, %1027 : vector<2x1xi32>
    %c7_530 = arith.constant 7 : index
    %c16_531 = arith.constant 16 : index
    %1029 = memref.load %arg3[%c7_530, %c16_531] : memref<8x17xf32, #tpu.memory_space<smem>>
    %1030 = vector.broadcast %1029 : f32 to vector<2x1xf32>
    %1031 = arith.select %1028, %1030, %1023 : vector<2x1xi1>, vector<2x1xf32>
    %c7_532 = arith.constant 7 : index
    %c16_533 = arith.constant 16 : index
    %1032 = memref.load %arg4[%c7_532, %c16_533] : memref<8x17xf32, #tpu.memory_space<smem>>
    %1033 = vector.broadcast %1032 : f32 to vector<2x1xf32>
    %1034 = arith.select %1028, %1033, %1026 : vector<2x1xi1>, vector<2x1xf32>
    %1035 = arith.mulf %894, %1034 : vector<2x1xf32>
    %1036 = arith.addf %1031, %1035 : vector<2x1xf32>
    %1037 = vector.broadcast %1036 : vector<2x1xf32> to vector<2x11xf32>
    %1038 = arith.mulf %1037, %577 : vector<2x11xf32>
    %c0_534 = arith.constant 0 : index
    %c0_535 = arith.constant 0 : index
    %1039 = vector.load %arg5[%c0_534, %c0_535] : memref<2x11xf32, #tpu.memory_space<vmem>>, vector<2x11xf32>
    tpu.vector_store %arg5[%c0_534, %c0_535], %1038 {strides = array<i32>} : memref<2x11xf32, #tpu.memory_space<vmem>>, vector<2x11xf32>,
    return
  }
  func.func @transform_0(%arg0: i32) -> (i32, i32, i32) {
    %c0_i32 = arith.constant 0 : i32
    %c0_i32_0 = arith.constant 0 : i32
    %c0_i32_1 = arith.constant 0 : i32
    return %arg0, %c0_i32, %c0_i32_0 : i32, i32, i32
  }
  func.func @transform_1(%arg0: i32) -> (i32, i32) {
    %c0_i32 = arith.constant 0 : i32
    %c0_i32_0 = arith.constant 0 : i32
    return %arg0, %c0_i32 : i32, i32
  }
  func.func @transform_2(%arg0: i32) -> (i32, i32) {
    %c0_i32 = arith.constant 0 : i32
    %c0_i32_0 = arith.constant 0 : i32
    %c0_i32_1 = arith.constant 0 : i32
    return %c0_i32, %c0_i32_0 : i32, i32
  }
  func.func @transform_3(%arg0: i32) -> (i32, i32) {
    %c0_i32 = arith.constant 0 : i32
    %c0_i32_0 = arith.constant 0 : i32
    %c0_i32_1 = arith.constant 0 : i32
    return %c0_i32, %c0_i32_0 : i32, i32
  }
  func.func @transform_4(%arg0: i32) -> (i32, i32) {
    %c0_i32 = arith.constant 0 : i32
    %c0_i32_0 = arith.constant 0 : i32
    return %arg0, %c0_i32 : i32, i32
  }
}

</mosaic_0001>

<bundles_post_ra>
// kernel: tpu_custom_call.1
= control target key start
LH: loop header
LB: loop body
LE: loop exit
PB: predicated region body
PF: predicated region fallthrough
CT: control target
= control target key end

     0   :  { %s5354_s0 = inlined_call_operand.hbm [shape: f32[2,4,10], index: 0, kind: input, shape index: {}]   ;;  %s5355_s1 = inlined_call_operand.vmem [shape: f32[2,10], index: 1, kind: input, shape index: {}]   ;;  %s5356_s2 = inlined_call_operand.hbm [shape: f32[8,17], index: 2, kind: input, shape index: {}]   ;;  %s5357_s3 = inlined_call_operand.vmem [shape: f32[8,17], index: 3, kind: input, shape index: {}]   ;;  %s5358_s4 = inlined_call_operand.hbm [shape: f32[2,11], index: 4, kind: output, shape index: {}]  }
   0x1   :  { %5525 = sst [smem:[#allocation75_spill]] %s5358_s4 }
   0x2   :  { %9 = vsyncpa [#allocation3], 0 }
   0x3   :  { %10 = vsyncpa [#allocation5], 0 }
   0x4   :  { %11 = vsyncpa [#allocation6], 0 }
   0x5   :  { %12 = vsyncpa [#allocation4], 0  ;;  %s2442_s15 = smov [#allocation2]   ;;  %s2368_s19 = scalar_lea.hbm %s5354_s0, 128 }
   0x6   :  { %s18_s16 = sshll.u32 %s2442_s15, 4  ;;  %p2369_p0 = scmp.ne.s32.totalorder %s5354_s0, %s2368_s19  ;;  %s19_s16 = int_to_ptr.vmem [resolvable:$true] %s18_s16 }
   0x7   :  { %p2372_p1 = scmp.lt.u32.totalorder %s2368_s19, %s5354_s0 }
   0x9   :  { %p2374_p2 = pnand %p2372_p1, %p2369_p0 }
   0xb   :  { %2377 = shalt.err (!%p2374_p2)
}
   0xc   :  { %s2378_s24 = scalar_lea.vmem %s19_s16, 128  ;;  %p2383_p4 = scmp.lt.s32.totalorder %s19_s16, %s19_s16 }
   0xd   :  { %p2379_p3 = scmp.ne.s32.totalorder %s19_s16, %s2378_s24  ;;  %p2384_p5 = scmp.lt.s32.totalorder %s2378_s24, %s2378_s24 }
   0xf   :  { %p2385_p6 = por %p2384_p5, %p2383_p4 }
  0x11   :  { %p2386_p7 = pnand %p2385_p6, %p2379_p3 }
  0x13   :  { %2389 = shalt.err (!%p2386_p7)
}
  0x14   :  { %s2443_s25 = smov 64   ;;  %s2444_s26 = smov 4  }
  0x15   :  { %24 = dma.hbm_to_vmem [thread:$0]  %s5354_s0, 128, %s19_s16, [#allocation3], %s2443_s25, %s2443_s25, %s2444_s26  }
  0x16   :  { %s2390_s5 = scalar_lea.hbm %s5356_s2, 128 }
  0x17   :  { %p2391_p8 = scmp.ne.s32.totalorder %s5356_s2, %s2390_s5  ;;  %p2394_p9 = scmp.lt.u32.totalorder %s2390_s5, %s5356_s2 }
  0x19   :  { %p2396_p10 = pnand %p2394_p9, %p2391_p8 }
  0x1b   :  { %2399 = shalt.err (!%p2396_p10)
}
  0x1c   :  { %s2445_s10 = smov [#allocation7]   ;;  %s41_s14 = sshll.u32 %s5357_s3, 4  ;;  %s42_s14 = int_to_ptr.vmem [resolvable:$true] %s41_s14 }
  0x1d   :  { %34 = dma.hbm_to_smem %s5356_s2, 128, %s2445_s10, [#allocation5]  }
  0x1e   :  { %s2400_s15 = scalar_lea.vmem %s42_s14, 128  ;;  %p2405_p12 = scmp.lt.s32.totalorder %s42_s14, %s42_s14 }
  0x1f   :  { %p2401_p11 = scmp.ne.s32.totalorder %s42_s14, %s2400_s15  ;;  %p2406_p13 = scmp.lt.s32.totalorder %s2400_s15, %s2400_s15 }
  0x21   :  { %p2407_p0 = por %p2406_p13, %p2405_p12 }
  0x23   :  { %p2408_p1 = pnand %p2407_p0, %p2401_p11 }
  0x25   :  { %2411 = shalt.err (!%p2408_p1)
}
  0x26   :  { %s2446_s16 = smov [#allocation8]  }
  0x27   :  { %44 = dma.vmem_to_smem %s42_s14, 128, %s2446_s16, [#allocation6]  }
  0x28   :  { %2434 = dma.done.wait [#allocation3], 128  }
  0x29   :  { %2435 = vsyncadd [#allocation3], 4294967168 }
  0x2a   :  { %2436 = dma.done.wait [#allocation5], 128  }
  0x2b   :  { %2437 = vsyncadd [#allocation5], 4294967168 }
  0x2c   :  { %2438 = dma.done.wait [#allocation6], 128  }
  0x2d   :  { %2439 = vsyncadd [#allocation6], 4294967168 }
  0x2e   :  { %54 = sfence }
  0x2f   :  { %v57_v0 = vld [vmem:[%s5355_s1] sm:$0x3]  ;;  %v5363_v4 = vlaneseq  ;;  %v2447_v12 = vmov 1966171168   ;;  %v56_v17 = vld [vmem:[#allocation2 + $0x4] sm:$0xf] }
  0x30   :  { %v2090_v1 = vmul.f32 -1.442695, %v57_v0  ;;  %v55_v11 = vld [vmem:[#allocation2] sm:$0xf]  ;;  %v88_v13 = vunpack.c.l.s4 %v2447_v12  ;;  %v338_v43 = vrot.slane %v56_v17, 6  ;;  %s2562_s1 = sld [smem:[#allocation7 + $0x110]] }
  0x31   :  { %v2506_v5 = vshrl.u32 %v5363_v4, 7  ;;  %v337_v32 = vrot.slane %v55_v11, 6  ;;  %s2570_s22 = sld [smem:[#allocation7 + $0x100]]  ;;  %s2575_s25 = sld [smem:[#allocation7 + $0x101]] }
  0x32   :  { %2338 = vpow2.f32 %v2090_v1  ;;  %v89_v15 = vunpack.c.0.s8 %v88_v13  ;;  %v342_v48 = vsub.f32 %v56_v17, %v338_v43  ;;  %s2572_s23 = sld [smem:[#allocation8 + $0x100]]  ;;  %s2577_s26 = sld [smem:[#allocation8 + $0x101]] }
  0x33   :  { %5526 = vst [vmem:[#allocation14_spill] sm:$0xff] %v2506_v5  ;;  %v77_v6 = vsub.s32 1, %v2506_v5  ;;  %v2510_v7 = vsub.s32 0, %v2506_v5  ;;  %v243_v31 = vsub.s32 2, %v2506_v5  ;;  %v254_v41 = vsub.s32 3, %v2506_v5  ;;  %s2579_s27 = sld [smem:[#allocation7 + $0x102]] }
  0x34   :  { %v2519_v18 = vsub.s32 %v89_v15, %v2506_v5  ;;  %v341_v42 = vsub.f32 %v55_v11, %v337_v32  ;;  %v344_v52 = vmax.f32 %v342_v48, 0.0  ;;  %s2581_s28 = sld [smem:[#allocation8 + $0x102]]  ;;  %s2583_s29 = sld [smem:[#allocation7 + $0x103]] }
  0x35   :  { %v126_v14 = vrot.slane %v55_v11, %v2510_v7  ;;  %v137_v16 = vrot.slane %v55_v11, %v77_v6  ;;  %v148_v21 = vrot.slane %v56_v17, %v2510_v7  ;;  %v159_v30 = vrot.slane %v56_v17, %v77_v6  ;;  %s2585_s30 = sld [smem:[#allocation8 + $0x103]]  ;;  %s2587_s5 = sld [smem:[#allocation7 + $0x104]] }
  0x36   :  { %v175_v19 = vrot.slane %v55_v11, %v2519_v18  ;;  %v197_v20 = vrot.slane %v56_v17, %v2519_v18  ;;  %v244_v40 = vrot.slane %v55_v11, %v243_v31  ;;  %v255_v46 = vrot.slane %v55_v11, %v254_v41  ;;  %5530 = sst [smem:[#allocation18_spill]] %s2562_s1  ;;  %s1020_s3 = smul.f32 %s2562_s1, %s2562_s1 }
  0x37   :  { %v343_v47 = vmax.f32 %v341_v42, 0.0  ;;  %v266_v50 = vrot.slane %v56_v17, %v243_v31  ;;  %v277_v53 = vrot.slane %v56_v17, %v254_v41  ;;  %v348_v55 = vrot.slane %v344_v52, 1  ;;  %s2590_s7 = sld [smem:[#allocation8 + $0x104]]  ;;  %s2592_s8 = sld [smem:[#allocation7 + $0x105]] }
  0x38   :  { %v183_v22 = vrot.slane %v175_v19, %v2519_v18  ;;  %v176_v23 = vcombine.high %v175_v19, %v175_v19  ;;  %v205_v24 = vrot.slane %v197_v20, %v2519_v18  ;;  %v198_v25 = vcombine.high %v197_v20, %v197_v20  ;;  %s1021_s18 = smul.f32 %s2562_s1, %s1020_s3  ;;  %s2594_s9 = sld [smem:[#allocation8 + $0x105]] }
  0x39   :  { %v347_v51 = vrot.slane %v343_v47, 1  ;;  %v352_v57 = vmul.f32 %v348_v55, %v344_v52  ;;  %s2598_s10 = sld [smem:[#allocation7 + $0x106]]  ;;  %s2602_s12 = sld [smem:[#allocation7 + $0x107]]  ;;  %v2656_v1 = vstv %s2570_s22 }
  0x3a   :  { %v2527_v26 = vrot.slane %v183_v22, %v2510_v7  ;;  %v190_v27 = vrot.slane %v176_v23, %v2519_v18  ;;  %v2531_v28 = vrot.slane %v205_v24, %v2510_v7  ;;  %v212_v29 = vrot.slane %v198_v25, %v2519_v18  ;;  %s1022_s19 = smul.f32 %s2562_s1, %s1021_s18  ;;  %s2600_s11 = sld [smem:[#allocation8 + $0x106]] }
  0x3b   :  { %v285_v33 = vcombine.high %v183_v22, %v183_v22  ;;  %v287_v39 = vcombine.high %v205_v24, %v205_v24  ;;  %v351_v54 = vmul.f32 %v347_v51, %v343_v47  ;;  %v2558_v58 = vrot.slane %v352_v57, %v243_v31  ;;  %s2604_s0 = sld [smem:[#allocation8 + $0x107]]  ;;  %s2609_s14 = sld [smem:[#allocation7 + $0x108]] }
  0x3c   :  { %v2339_v2 = vpop.eup %2338  ;;  %v2536_v34 = vrot.slane %v190_v27, %v2510_v7  ;;  %v2539_v35 = vrot.slane %v212_v29, %v2510_v7  ;;  %v286_v36 = vcombine.high %v190_v27, %v190_v27  ;;  %v288_v45 = vcombine.high %v212_v29, %v212_v29  ;;  %s1023_s20 = smul.f32 %s2562_s1, %s1022_s19  ;;  %s2611_s15 = sld [smem:[#allocation8 + $0x108]] }
  0x3d   :  { %v61_v3 = vadd.f32 1.0, %v2339_v2  ;;  %v2542_v37 = vrot.slane %v285_v33, %v2510_v7  ;;  %v2549_v44 = vrot.slane %v287_v39, %v2510_v7  ;;  %v2554_v56 = vrot.slane %v351_v54, %v243_v31  ;;  %5529 = vst [vmem:[#allocation17_spill] sm:$0xff] %v2558_v58  ;;  %s2613_s16 = sld [smem:[#allocation7 + $0x109]]  ;;  %s2617_s17 = sld [smem:[#allocation7 + $0x10a]] }
  0x3e   :  { %v2545_v38 = vrot.slane %v286_v36, %v2510_v7  ;;  %v2552_v49 = vrot.slane %v288_v45, %v2510_v7  ;;  %s1024_s21 = smul.f32 %s2562_s1, %s1023_s20  ;;  %s2615_s2 = sld [smem:[#allocation8 + $0x109]]  ;;  %v2663_v2 = vstv %s2572_s23  ;;  %v2685_v11 = vstv %s2585_s30 }
  0x3f   :  { %2340 = vrcp.f32 %v61_v3  ;;  %5528 = vst [vmem:[#allocation16_spill] sm:$0xff] %v2554_v56  ;;  %s2619_s3 = sld [smem:[#allocation8 + $0x10a]]  ;;  %s2621_s18 = sld [smem:[#allocation7 + $0x10b]]  ;;  %v2666_v3 = vstv %s2575_s25  ;;  %v2688_v12 = vstv %s2587_s5  ;;  %v2695_v13 = vstv %s2590_s7 }
  0x40   :  { %s1025_s24 = smul.f32 %s2562_s1, %s1024_s21  ;;  %s2625_s20 = sld [smem:[#allocation8 + $0x10b]]  ;;  %v2701_v15 = vstv %s2594_s9  ;;  %v2711_v17 = vstv %s2600_s11 }
  0x41   :  { %s2627_s21 = sld [smem:[#allocation7 + $0x10c]]  ;;  %s2635_s4 = sld [smem:[#allocation8 + $0x10d]]  ;;  %v2717_v19 = vstv %s2604_s0  ;;  %v2720_v20 = vstv %s2609_s14 }
  0x42   :  { %s1026_s6 = smul.f32 %s2562_s1, %s1025_s24  ;;  %s2629_s24 = sld [smem:[#allocation8 + $0x10c]] }
  0x43   :  { %s2637_s19 = sld [smem:[#allocation7 + $0x10e]]  ;;  %s2676_s22 = sld [smem:[#allocation7 + $0x2]]  ;;  %v2730_v22 = vstv %s2613_s16  ;;  %v2736_v24 = vstv %s2617_s17 }
  0x44   :  { %s2607_s13 = smul.f32 %s2562_s1, %s1026_s6  ;;  %s2633_s6 = sld [smem:[#allocation7 + $0x10d]]  ;;  %v2733_v23 = vstv %s2615_s2 }
  0x45   :  { %s2641_s1 = sld [smem:[#allocation7 + $0x10f]]  ;;  %s2690_s23 = sld [smem:[#allocation8 + $0x2]]  ;;  %v2743_v25 = vstv %s2619_s3  ;;  %v2746_v27 = vstv %s2621_s18 }
  0x46   :  { %5531 = sst [smem:[#allocation19_spill]] %s2607_s13  ;;  %s2639_s13 = sld [smem:[#allocation8 + $0x10e]] }
  0x47   :  { %5532 = sst [smem:[#allocation20_spill]] %s2625_s20  ;;  %s2647_s20 = sld [smem:[#allocation7]]  ;;  %v2765_v33 = vstv %s2635_s4 }
  0x48   :  { %5533 = sst [smem:[#allocation21_spill]] %s2627_s21  ;;  %s2645_s21 = sld [smem:[#allocation8 + $0x110]] }
  0x49   :  { %v2512_v8 = vpop.eup %2340  ;;  %5534 = sst [smem:[#allocation22_spill]] %s2629_s24  ;;  %s2643_s24 = sld [smem:[#allocation8 + $0x10f]]  ;;  %v2768_v36 = vstv %s2637_s19 }
  0x4a   :  { %5527 = vst [vmem:[#allocation15_spill] sm:$0xff] %v2512_v8  ;;  %v78_v9 = vrot.slane %v2512_v8, %v77_v6  ;;  %v67_v10 = vrot.slane %v2512_v8, %v2510_v7  ;;  %v93_v59 = vrot.slane %v2512_v8, %v2519_v18  ;;  %v2669_v6 = vstv %s2577_s26  ;;  %s2692_s25 = sld [smem:[#allocation7 + $0x3]]  ;;  %s5540_s30 = sld [smem:[#allocation22_spill]]  ;;  %5546 = vst [vmem:[#allocation26_spill] sm:$0xff] %v2768_v36 }
  0x4b   :  { %5535 = sst [smem:[#allocation23_spill]] %s2641_s1  ;;  %s2658_s1 = sld [smem:[#allocation8]]  ;;  %v2762_v32 = vstv %s2633_s6  ;;  %v2818_v54 = vstv %s2690_s23 }
  0x4c   :  { %80 = vbcast.lane.b32.xlu1 %v78_v9, 256  ;;  %69 = vbcast.lane.b32.xlu0 %v67_v10, 256  ;;  %v94_v60 = vcombine.high %v93_v59, %v93_v59  ;;  %v101_v62 = vrot.slane %v93_v59, %v2519_v18  ;;  %s2706_s26 = sld [smem:[#allocation8 + $0x3]]  ;;  %s2722_s5 = sld [smem:[#allocation8 + $0x4]]  ;;  %v2775_v39 = vstv %s2639_s13  ;;  %5559 = vst [vmem:[#allocation38_spill] sm:$0xff] %v2818_v54 }
  0x4d   :  { %5537 = sst [smem:[#allocation25_spill]] %s2647_s20  ;;  %s2674_s20 = sld [smem:[#allocation8 + $0x1]]  ;;  %5547 = vst [vmem:[#allocation27_spill] sm:$0xff] %v2775_v39 }
  0x4e   :  { %v108_v61 = vrot.slane %v94_v60, %v2519_v18  ;;  %v2653_v0 = vrot.slane %v101_v62, %v2510_v7  ;;  %v2714_v18 = vstv %s2602_s12  ;;  %s2724_s7 = sld [smem:[#allocation7 + $0x5]]  ;;  %s2740_s11 = sld [smem:[#allocation7 + $0x6]]  ;;  %v2791_v43 = vstv %s2645_s21 }
  0x4f   :  { %5536 = sst [smem:[#allocation24_spill]] %s2643_s24  ;;  %s2660_s24 = sld [smem:[#allocation7 + $0x1]]  ;;  %5551 = vst [vmem:[#allocation31_spill] sm:$0xff] %v2791_v43 }
  0x50   :  { %84 = vbcast.lane.b32.xlu1 %v78_v9, 264  ;;  %73 = vbcast.lane.b32.xlu0 %v67_v10, 264  ;;  %v2650_v63 = vrot.slane %v108_v61, %v2510_v7  ;;  %v2672_v9 = vstv %s2579_s27  ;;  %v2679_v7 = vstv %s2581_s28  ;;  %v2682_v10 = vstv %s2583_s29  ;;  %s5538_s27 = sld [smem:[#allocation20_spill]]  ;;  %s2708_s28 = sld [smem:[#allocation7 + $0x4]] }
  0x51   :  { %s5539_s29 = sld [smem:[#allocation21_spill]]  ;;  %s2738_s9 = sld [smem:[#allocation8 + $0x5]]  ;;  %v2759_v31 = vstv %s5540_s30  ;;  %v2802_v47 = vstv %s2658_s1  ;;  %v2833_v61 = vstv %s2692_s25 }
  0x52   :  { %s5543_s12 = sld [smem:[#allocation18_spill]]  ;;  %s5544_s0 = sld [smem:[#allocation19_spill]]  ;;  %5555 = vst [vmem:[#allocation34_spill] sm:$0xff] %v2802_v47  ;;  %5560 = vst [vmem:[#allocation39_spill] sm:$0xff] %v2833_v61  ;;  %v2836_v62 = vstv %s2706_s26  ;;  %v2842_v8 = vstv %s2722_s5 }
  0x53   :  { %s2754_s14 = sld [smem:[#allocation8 + $0x6]]  ;;  %s2756_s16 = sld [smem:[#allocation7 + $0x7]]  ;;  %v2812_v52 = vstv %s2674_s20  ;;  %5561 = vst [vmem:[#allocation40_spill] sm:$0xff] %v2836_v62  ;;  %5563 = vst [vmem:[#allocation42_spill] sm:$0xff] %v2842_v8 }
  0x54   :  { %132 = vbcast.lane.b32.xlu1 %v126_v14, 264  ;;  %128 = vbcast.lane.b32.xlu0 %v126_v14, 256  ;;  %v2698_v14 = vstv %s2592_s8  ;;  %s5541_s8 = sld [smem:[#allocation23_spill]]  ;;  %s2770_s2 = sld [smem:[#allocation8 + $0x7]]  ;;  %5557 = vst [vmem:[#allocation36_spill] sm:$0xff] %v2812_v52  ;;  %v2853_v61 = vstv %s2724_s7 }
  0x55   :  { %s2772_s17 = sld [smem:[#allocation7 + $0x8]]  ;;  %s2788_s3 = sld [smem:[#allocation7 + $0x9]]  ;;  %v2809_v51 = vstv %s2660_s24  ;;  %5564 = vst [vmem:[#allocation43_spill] sm:$0xff] %v2853_v61 }
  0x56   :  { %v2749_v29 = vstv %s5538_s27  ;;  %s2786_s4 = sld [smem:[#allocation8 + $0x8]]  ;;  %s2804_s13 = sld [smem:[#allocation8 + $0x9]]  ;;  %5556 = vst [vmem:[#allocation35_spill] sm:$0xff] %v2809_v51  ;;  %v2839_v4 = vstv %s2708_s28 }
  0x57   :  { %s2806_s19 = sld [smem:[#allocation7 + $0xa]]  ;;  %s2822_s21 = sld [smem:[#allocation7 + $0xb]]  ;;  %5562 = vst [vmem:[#allocation41_spill] sm:$0xff] %v2839_v4  ;;  %v2856_v62 = vstv %s2738_s9  ;;  %v2859_v4 = vstv %s2740_s11 }
  0x58   :  { %143 = vbcast.lane.b32.xlu1 %v137_v16, 264  ;;  %139 = vbcast.lane.b32.xlu0 %v137_v16, 256  ;;  %v2704_v16 = vstv %s2598_s10  ;;  %s5542_s10 = sld [smem:[#allocation24_spill]]  ;;  %v2784_v42 = vstv %s5543_s12  ;;  %s5552_s18 = smul.f32 %s5543_s12, %s5544_s0  ;;  %5565 = vst [vmem:[#allocation44_spill] sm:$0xff] %v2856_v62  ;;  %5566 = vst [vmem:[#allocation45_spill] sm:$0xff] %v2859_v4 }
  0x59   :  { %5550 = vst [vmem:[#allocation30_spill] sm:$0xff] %v2784_v42  ;;  %s2820_s1 = sld [smem:[#allocation8 + $0xa]]  ;;  %s2828_s20 = sld [smem:[#allocation8 + $0xb]]  ;;  %v2862_v8 = vstv %s2754_s14 }
  0x5a   :  { %v2796_v45 = vstv %s5552_s18  ;;  %s2830_s24 = sld [smem:[#allocation7 + $0xc]]  ;;  %5567 = vst [vmem:[#allocation46_spill] sm:$0xff] %v2862_v8  ;;  %s2864_s23 = sld [smem:[#allocation8 + $0xd]] }
  0x5b   :  { %5553 = vst [vmem:[#allocation32_spill] sm:$0xff] %v2796_v45  ;;  %s2844_s6 = sld [smem:[#allocation8 + $0xc]]  ;;  %s2866_s25 = sld [smem:[#allocation7 + $0xe]] }
  0x5c   :  { %154 = vbcast.lane.b32.xlu1 %v148_v21, 264  ;;  %150 = vbcast.lane.b32.xlu0 %v148_v21, 256  ;;  %v2727_v21 = vstv %s2611_s15  ;;  %s5545_s15 = sld [smem:[#allocation25_spill]]  ;;  %s2872_s26 = sld [smem:[#allocation8 + $0xe]] }
  0x5d   :  { %s2888_s27 = sld [smem:[#allocation7 + $0xf]]  ;;  %s2910_s30 = sld [smem:[#allocation8 + $0x10]] }
  0x5e   :  { %v2781_v41 = vstv %s5542_s10  ;;  %s2890_s28 = sld [smem:[#allocation8 + $0xf]]  ;;  %s3672_s5 = sld [smem:[#allocation7 + $0x300]] }
  0x5f   :  { %5549 = vst [vmem:[#allocation29_spill] sm:$0xff] %v2781_v41  ;;  %v2924_v43 = vstv %s2828_s20  ;;  %s3674_s7 = sld [smem:[#allocation8 + $0x300]]  ;;  %s3683_s9 = sld [smem:[#allocation8 + $0x301]] }
  0x60   :  { %165 = vbcast.lane.b32.xlu1 %v159_v30, 264  ;;  %161 = vbcast.lane.b32.xlu0 %v159_v30, 256  ;;  %v2752_v30 = vstv %s5539_s29  ;;  %s2908_s29 = sld [smem:[#allocation7 + $0x10]]  ;;  %5579 = vst [vmem:[#allocation58_spill] sm:$0xff] %v2924_v43  ;;  %s3689_s10 = sld [smem:[#allocation7 + $0x302]] }
  0x61   :  { %s3691_s11 = sld [smem:[#allocation8 + $0x302]]  ;;  %s3697_s12 = sld [smem:[#allocation7 + $0x303]] }
  0x62   :  { %s3699_s0 = sld [smem:[#allocation8 + $0x303]]  ;;  %s3705_s14 = sld [smem:[#allocation7 + $0x304]] }
  0x63   :  { %s3745_s18 = sld [smem:[#allocation8 + $0x307]]  ;;  %s3780_s20 = sld [smem:[#allocation7 + $0x30a]] }
  0x64   :  { %250 = vbcast.lane.b32.xlu1 %v244_v40, 264  ;;  %246 = vbcast.lane.b32.xlu0 %v244_v40, 256  ;;  %v2778_v40 = vstv %s5541_s8  ;;  %s3681_s8 = sld [smem:[#allocation7 + $0x301]] }
  0x65   :  { %5548 = vst [vmem:[#allocation28_spill] sm:$0xff] %v2778_v40 }
  0x68   :  { %261 = vbcast.lane.b32.xlu1 %v255_v46, 264  ;;  %257 = vbcast.lane.b32.xlu0 %v255_v46, 256  ;;  %v2799_v46 = vstv %s5545_s15  ;;  %s3707_s15 = sld [smem:[#allocation8 + $0x304]] }
  0x69   :  { %5554 = vst [vmem:[#allocation33_spill] sm:$0xff] %v2799_v46 }
  0x6c   :  { %272 = vbcast.lane.b32.xlu1 %v266_v50, 264  ;;  %268 = vbcast.lane.b32.xlu0 %v266_v50, 256 }
  0x70   :  { %283 = vbcast.lane.b32.xlu1 %v277_v53, 264  ;;  %279 = vbcast.lane.b32.xlu0 %v277_v53, 256  ;;  %v2815_v53 = vstv %s2676_s22  ;;  %s2846_s22 = sld [smem:[#allocation7 + $0xd]] }
  0x71   :  { %5558 = vst [vmem:[#allocation37_spill] sm:$0xff] %v2815_v53 }
  0x74   :  { %362 = vbcast.lane.b32.xlu1 %v2554_v56, 264  ;;  %358 = vbcast.lane.b32.xlu0 %v2554_v56, 256  ;;  %v5591_v56 = vlaneseq }
  0x76   :  { %v2975_v36 = vand.u32 127, %v5591_v56 }
  0x78   :  { %373 = vbcast.lane.b32.xlu1 %v2558_v58, 264  ;;  %369 = vbcast.lane.b32.xlu0 %v2558_v58, 256  ;;  %v2913_v58 = vstv %s2820_s1  ;;  %5592 = vst [vmem:[#allocation70_spill] sm:$0xff] %v2975_v36  ;;  %s3763_s1 = sld [smem:[#allocation7 + $0x309]] }
  0x79   :  { %5576 = vst [vmem:[#allocation55_spill] sm:$0xff] %v2913_v58  ;;  %v2939_v58 = vstv %s2846_s22  ;;  %s3811_s22 = sld [smem:[#allocation8 + $0x30b]] }
  0x7a   :  { %5582 = vst [vmem:[#allocation61_spill] sm:$0xff] %v2939_v58 }
  0xbe   :  { %v81_v48 = vpop.permute.xlu1 %80  ;;  %v70_v50 = vpop.permute.xlu0 %69 }
  0xbf   :  { %v121_v55 = vmul.f32 %v2650_v63, %v81_v48  ;;  %v1013_v57 = vsub.f32 %v81_v48, %v2650_v63  ;;  %v119_v59 = vmul.f32 %v2653_v0, %v70_v50  ;;  %v1011_v60 = vsub.f32 %v70_v50, %v2653_v0 }
  0xc1   :  { %v2848_v48 = vmul.f32 16.0, %v121_v55  ;;  %v1017_v50 = vand.u32 2147483647, %v1013_v57  ;;  %v2850_v5 = vmul.f32 16.0, %v119_v59  ;;  %v1015_v54 = vand.u32 2147483647, %v1011_v60 }
  0xc2   :  { %v85_v53 = vpop.permute.xlu1 %84  ;;  %v74_v52 = vpop.permute.xlu0 %73  ;;  %v2870_v60 = vstv %s2756_s16  ;;  %s3713_s16 = sld [smem:[#allocation7 + $0x305]] }
  0xc3   :  { %v2304_v55 = vtrunc.f32 %v2848_v48  ;;  %v1031_v57 = vsub.f32 1.0, %v1017_v50  ;;  %v1029_v59 = vsub.f32 1.0, %v1015_v54  ;;  %5568 = vst [vmem:[#allocation47_spill] sm:$0xff] %v2870_v60  ;;  %v2300_v4 = vtrunc.f32 %v2850_v5 }
  0xc4   :  { %v122_v8 = vmul.f32 %v2650_v63, %v85_v53  ;;  %v120_v62 = vmul.f32 %v2653_v0, %v74_v52  ;;  %v1012_v61 = vsub.f32 %v74_v52, %v2653_v0  ;;  %v2883_v54 = vstv %s2770_s2  ;;  %s3715_s2 = sld [smem:[#allocation8 + $0x305]] }
  0xc5   :  { %v2878_v51 = vmul.f32 16.0, %v1031_v57  ;;  %v2880_v50 = vmul.f32 16.0, %v1029_v59  ;;  %5570 = vst [vmem:[#allocation49_spill] sm:$0xff] %v2883_v54  ;;  %v2886_v60 = vstv %s2772_s17  ;;  %v2897_v0 = vstv %s2786_s4  ;;  %s3725_s17 = sld [smem:[#allocation7 + $0x306]] }
  0xc6   :  { %5571 = vst [vmem:[#allocation50_spill] sm:$0xff] %v2886_v60  ;;  %v2892_v47 = vpop.permute.xlu1 %132  ;;  %v2894_v46 = vpop.permute.xlu0 %128  ;;  %5572 = vst [vmem:[#allocation51_spill] sm:$0xff] %v2897_v0  ;;  %v2900_v52 = vstv %s2788_s3  ;;  %v2903_v57 = vstv %s2804_s13  ;;  %v2906_v59 = vstv %s2806_s19  ;;  %v2305_v60 = vcvt.f32.s32 %v2304_v55  ;;  %s3727_s4 = sld [smem:[#allocation8 + $0x306]]  ;;  %s3733_s3 = sld [smem:[#allocation7 + $0x307]] }
  0xc7   :  { %5569 = vst [vmem:[#allocation48_spill] sm:$0xff] %v2878_v51  ;;  %5573 = vst [vmem:[#allocation52_spill] sm:$0xff] %v2900_v52  ;;  %v1016_v54 = vand.u32 2147483647, %v1012_v61  ;;  %v2916_v0 = vstv %s2822_s21  ;;  %v2320_v52 = vtrunc.f32 %v2878_v51  ;;  %v2301_v45 = vcvt.f32.s32 %v2300_v4  ;;  %s3747_s13 = sld [smem:[#allocation7 + $0x308]]  ;;  %s3778_s21 = sld [smem:[#allocation8 + $0x309]] }
  0xc8   :  { %5574 = vst [vmem:[#allocation53_spill] sm:$0xff] %v2903_v57  ;;  %5575 = vst [vmem:[#allocation54_spill] sm:$0xff] %v2906_v59  ;;  %v2316_v57 = vtrunc.f32 %v2880_v50  ;;  %v2920_v59 = vmul.f32 16.0, %v122_v8  ;;  %v1014_v42 = vsub.f32 %v85_v53, %v2650_v63  ;;  %v2927_v55 = vstv %s2830_s24  ;;  %s3761_s19 = sld [smem:[#allocation8 + $0x308]]  ;;  %s3796_s24 = sld [smem:[#allocation8 + $0x30a]] }
  0xc9   :  { %5577 = vst [vmem:[#allocation56_spill] sm:$0xff] %v2916_v0  ;;  %5580 = vst [vmem:[#allocation59_spill] sm:$0xff] %v2927_v55  ;;  %v2930_v61 = vstv %s2844_s6  ;;  %v2942_v8 = vstv %s2864_s23  ;;  %v2945_v51 = vstv %s2866_s25  ;;  %v409_v63 = vcvt.s32.f32 %v2305_v60  ;;  %s3798_s6 = sld [smem:[#allocation7 + $0x30b]]  ;;  %s3813_s23 = sld [smem:[#allocation7 + $0x30c]] }
  0xca   :  { %5578 = vst [vmem:[#allocation57_spill] sm:$0xff] %v2920_v59  ;;  %5581 = vst [vmem:[#allocation60_spill] sm:$0xff] %v2930_v61  ;;  %v2932_v41 = vcvt.f32.s32 %v2316_v57  ;;  %v2934_v0 = vpop.permute.xlu1 %143  ;;  %v2936_v4 = vpop.permute.xlu0 %139  ;;  %vm419_vm0 = vcmp.lt.s32.totalorder %v2305_v60, 16  ;;  %v1030_v53 = vsub.f32 1.0, %v1016_v54  ;;  %v2948_v61 = vstv %s2872_s26  ;;  %s3828_s25 = sld [smem:[#allocation8 + $0x30c]]  ;;  %s3830_s26 = sld [smem:[#allocation7 + $0x30d]] }
  0xcb   :  { %5583 = vst [vmem:[#allocation62_spill] sm:$0xff] %v2942_v8  ;;  %5584 = vst [vmem:[#allocation63_spill] sm:$0xff] %v2945_v51  ;;  %v2950_v57 = vcvt.f32.s32 %v2320_v52  ;;  %v407_v55 = vcvt.s32.f32 %v2301_v45  ;;  %v2306_v43 = vtrunc.f32 %v2920_v59  ;;  %v2954_v40 = vand.u32 2147483647, %v1014_v42 }
  0xcc   :  { %5585 = vst [vmem:[#allocation64_spill] sm:$0xff] %v2948_v61  ;;  %vm1049_vm1 = vcmp.lt.s32.totalorder %v2932_v41, 16  ;;  %v2956_v58 = vmul.f32 16.0, %v120_v62  ;;  %v2959_v8 = vstv %s2888_s27  ;;  %v2962_v51 = vstv %s2890_s28  ;;  %s3845_s27 = sld [smem:[#allocation8 + $0x30d]]  ;;  %s3847_s28 = sld [smem:[#allocation7 + $0x30e]] }
  0xcd   :  { %5587 = vst [vmem:[#allocation66_spill] sm:$0xff] %v2959_v8  ;;  %5588 = vst [vmem:[#allocation67_spill] sm:$0xff] %v2962_v51  ;;  %vm415_vm2 = vcmp.lt.s32.totalorder %v2301_v45, 16  ;;  %v2969_v52 = vstv %s2908_s29  ;;  %v2972_v61 = vstv %s2910_s30  ;;  %v2978_v42 = vsub.f32 %v2848_v48, %v409_v63  ;;  %s3862_s29 = sld [smem:[#allocation8 + $0x30e]]  ;;  %s3864_s30 = sld [smem:[#allocation7 + $0x30f]] }
  0xce   :  { %5586 = vst [vmem:[#allocation65_spill] sm:$0xff] %v2956_v58  ;;  %v2964_v39 = vpop.permute.xlu1 %154  ;;  %v2966_v54 = vpop.permute.xlu0 %150  ;;  %5589 = vst [vmem:[#allocation68_spill] sm:$0xff] %v2969_v52  ;;  %v2981_v62 = vsel %vm419_vm0, %v2305_v60, 16  ;;  %v2984_v51 = vsel %vm1049_vm1, %v2932_v41, 16  ;;  %v2986_v8 = vmul.f32 16.0, %v1030_v53  ;;  %vm1053_vm3 = vcmp.lt.s32.totalorder %v2950_v57, 16 }
  0xcf   :  { %5590 = vst [vmem:[#allocation69_spill] sm:$0xff] %v2972_v61  ;;  %5593 = vst [vmem:[#allocation71_spill] sm:$0xff] %v2978_v42  ;;  %v2990_v52 = vsub.f32 %v2850_v5, %v407_v55  ;;  %v2992_v61 = vcvt.f32.s32 %v2306_v43  ;;  %v2996_v48 = vsel %vm415_vm2, %v2301_v45, 16  ;;  %vm1057_vm4 = vcmp.eq.s32.totalorder %v2984_v51, 0 }
  0xd0   :  { %5594 = vst [vmem:[#allocation72_spill] sm:$0xff] %v2981_v62  ;;  %5596 = vst [vmem:[#allocation74_spill] sm:$0xff] %v2996_v48  ;;  %v2318_v62 = vtrunc.f32 %v2986_v8  ;;  %vm1073_vm5 = vcmp.eq.s32.totalorder %v2984_v51, 1  ;;  %v3011_v45 = vsel %vm1053_vm3, %v2950_v57, 16  ;;  %v1041_v55 = vcvt.s32.f32 %v2932_v41 }
  0xd1   :  { %5595 = vst [vmem:[#allocation73_spill] sm:$0xff] %v2990_v52  ;;  %v234_v63 = vmax.f32 %v2892_v47, %v2527_v26  ;;  %v1063_v56 = vsel %vm1057_vm4, %v2656_v1, 0.0  ;;  %v1069_v52 = vsel %vm1057_vm4, %v2663_v2, 0.0  ;;  %v233_v36 = vmax.f32 %v2894_v46, %v2527_v26 }
  0xd2   :  { %v3004_v5 = vpop.permute.xlu1 %165  ;;  %v3006_v43 = vpop.permute.xlu0 %161  ;;  %v236_v41 = vmax.f32 %v2934_v0, %v2536_v34  ;;  %v1079_v47 = vsel %vm1073_vm5, %v2666_v3, %v1063_v56  ;;  %vm1089_vm6 = vcmp.eq.s32.totalorder %v2984_v51, 2  ;;  %v3031_v42 = vcvt.f32.s32 %v2318_v62 }
  0xd3   :  { %v235_v53 = vmax.f32 %v2936_v4, %v2536_v34  ;;  %v1085_v26 = vsel %vm1073_vm5, %v2669_v6, %v1069_v52  ;;  %v1095_v46 = vsel %vm1089_vm6, %v2672_v9, %v1079_v47  ;;  %vm1105_vm7 = vcmp.eq.s32.totalorder %v2984_v51, 3 }
  0xd4   :  { %v1101_v56 = vsel %vm1089_vm6, %v2679_v7, %v1085_v26  ;;  %v1111_v62 = vsel %vm1105_vm7, %v2682_v10, %v1095_v46  ;;  %vm1121_vm8 = vcmp.eq.s32.totalorder %v2984_v51, 4  ;;  %vm1137_vm9 = vcmp.eq.s32.totalorder %v2984_v51, 5 }
  0xd5   :  { %v1117_v34 = vsel %vm1105_vm7, %v2685_v11, %v1101_v56  ;;  %v1127_v47 = vsel %vm1121_vm8, %v2688_v12, %v1111_v62  ;;  %vm1051_vm10 = vcmp.lt.s32.totalorder %v3031_v42, 16  ;;  %vm1153_vm11 = vcmp.eq.s32.totalorder %v2984_v51, 6 }
  0xd6   :  { %v251_v60 = vpop.permute.xlu1 %250  ;;  %v247_v48 = vpop.permute.xlu0 %246  ;;  %v1143_v46 = vsel %vm1137_vm9, %v2698_v14, %v1127_v47  ;;  %vm1169_vm12 = vcmp.eq.s32.totalorder %v2984_v51, 7  ;;  %vm1185_vm13 = vcmp.eq.s32.totalorder %v2984_v51, 8  ;;  %vm1201_vm14 = vcmp.eq.s32.totalorder %v2984_v51, 9 }
  0xd7   :  { %v310_v0 = vmin.f32 %v251_v60, %v2542_v37  ;;  %v309_v59 = vmin.f32 %v247_v48, %v2542_v37  ;;  %v1133_v60 = vsel %vm1121_vm8, %v2695_v13, %v1117_v34  ;;  %v3050_v37 = vsub.f32 %v2880_v50, %v1041_v55 }
  0xd8   :  { %v1149_v56 = vsel %vm1137_vm9, %v2701_v15, %v1133_v60  ;;  %v1159_v50 = vsel %vm1153_vm11, %v2704_v16, %v1143_v46  ;;  %vm1217_vm15 = vcmp.eq.s32.totalorder %v2984_v51, 10  ;;  %vm1233_vm0 = vcmp.eq.s32.totalorder %v2984_v51, 11 }
  0xd9   :  { %v318_v4 = vsub.f32 %v310_v0, %v234_v63  ;;  %v317_v52 = vsub.f32 %v309_v59, %v233_v36  ;;  %v1165_v59 = vsel %vm1153_vm11, %v2711_v17, %v1149_v56  ;;  %v1175_v62 = vsel %vm1169_vm12, %v2714_v18, %v1159_v50 }
  0xda   :  { %v262_v48 = vpop.permute.xlu1 %261  ;;  %v258_v26 = vpop.permute.xlu0 %257  ;;  %v1181_v34 = vsel %vm1169_vm12, %v2717_v19, %v1165_v59  ;;  %v5598_v50 = vmax.f32 %v2966_v54, %v2531_v28  ;;  %vm1249_vm1 = vcmp.eq.s32.totalorder %v2984_v51, 12  ;;  %vm1265_vm2 = vcmp.eq.s32.totalorder %v2984_v51, 13 }
  0xdb   :  { %v312_v58 = vmin.f32 %v262_v48, %v2545_v38  ;;  %v311_v63 = vmin.f32 %v258_v26, %v2545_v38  ;;  %v326_v36 = vmax.f32 %v318_v4, 0.0  ;;  %v325_v47 = vmax.f32 %v317_v52, 0.0 }
  0xdc   :  { %v1191_v48 = vsel %vm1185_vm13, %v2720_v20, %v1175_v62  ;;  %v1197_v26 = vsel %vm1185_vm13, %v2727_v21, %v1181_v34  ;;  %v5597_v52 = vmax.f32 %v2964_v39, %v2531_v28  ;;  %v3090_v62 = vsel %vm1051_vm10, %v3031_v42, 16 }
  0xdd   :  { %v320_v55 = vsub.f32 %v312_v58, %v236_v41  ;;  %v319_v0 = vsub.f32 %v311_v63, %v235_v53  ;;  %v1207_v53 = vsel %vm1201_vm14, %v2730_v22, %v1191_v48  ;;  %v1213_v41 = vsel %vm1201_vm14, %v2733_v23, %v1197_v26 }
  0xde   :  { %v273_v60 = vpop.permute.xlu1 %272  ;;  %v269_v38 = vpop.permute.xlu0 %268  ;;  %vm1281_vm3 = vcmp.eq.s32.totalorder %v2984_v51, 14  ;;  %v5599_v26 = vmax.f32 %v3004_v5, %v2539_v35  ;;  %vm1297_vm4 = vcmp.eq.s32.totalorder %v2984_v51, 15  ;;  %vm1058_vm5 = vcmp.eq.s32.totalorder %v3090_v62, 0  ;;  %v5602_v5 = vld [vmem:[#allocation16_spill] sm:$0xff] }
  0xdf   :  { %v328_v4 = vmax.f32 %v320_v55, 0.0  ;;  %v314_v46 = vmin.f32 %v273_v60, %v2549_v44  ;;  %v313_v56 = vmin.f32 %v269_v38, %v2549_v44  ;;  %v327_v58 = vmax.f32 %v319_v0, 0.0 }
  0xe0   :  { %v1223_v55 = vsel %vm1217_vm15, %v2736_v24, %v1207_v53  ;;  %v1042_v0 = vcvt.s32.f32 %v3031_v42  ;;  %v1229_v60 = vsel %vm1217_vm15, %v2743_v25, %v1213_v41  ;;  %vm1313_vm6 = vcmp.eq.s32.totalorder %v2984_v51, 16  ;;  %v5610_v51 = vld [vmem:[#allocation32_spill] sm:$0xff] }
  0xe1   :  { %v3076_v63 = vsub.f32 %v314_v46, %v5597_v52  ;;  %v3081_v59 = vsub.f32 %v313_v56, %v5598_v50  ;;  %v3083_v44 = vmul.f32 %v328_v4, %v326_v36  ;;  %v1239_v38 = vsel %vm1233_vm0, %v2746_v27, %v1223_v55  ;;  %v5601_v50 = vld [vmem:[#allocation26_spill] sm:$0xff] }
  0xe2   :  { %v284_v34 = vpop.permute.xlu1 %283  ;;  %v280_v39 = vpop.permute.xlu0 %279  ;;  %v1245_v36 = vsel %vm1233_vm0, %v2749_v29, %v1229_v60  ;;  %v1255_v48 = vsel %vm1249_vm1, %v2752_v30, %v1239_v38  ;;  %v3101_v42 = vmul.f32 %v327_v58, %v325_v47  ;;  %vm5423_vm7 = vcmask 80896   ;;  %v5605_v60 = vld [vmem:[#allocation29_spill] sm:$0xff] }
  0xe3   :  { %v316_v28 = vmin.f32 %v284_v34, %v2552_v49  ;;  %v315_v54 = vmin.f32 %v280_v39, %v2552_v49  ;;  %v5600_v49 = vmax.f32 %v3006_v43, %v2539_v35  ;;  %v1261_v56 = vsel %vm1249_vm1, %v2759_v31, %v1245_v36  ;;  %v5603_v34 = vld [vmem:[#allocation27_spill] sm:$0xff]  ;;  %v5604_v43 = vld [vmem:[#allocation28_spill] sm:$0xff] }
  0xe4   :  { %v1271_v53 = vsel %vm1265_vm2, %v2762_v32, %v1255_v48  ;;  %v1277_v52 = vsel %vm1265_vm2, %v2765_v33, %v1261_v56  ;;  %vm1074_vm8 = vcmp.eq.s32.totalorder %v3090_v62, 1  ;;  %v5606_v36 = vcvt.s32.f32 %v2950_v57  ;;  %v5607_v48 = vld [vmem:[#allocation48_spill] sm:$0xff]  ;;  %v5608_v56 = vld [vmem:[#allocation31_spill] sm:$0xff] }
  0xe5   :  { %v3106_v4 = vsub.f32 %v316_v28, %v5599_v26  ;;  %v3111_v46 = vsub.f32 %v315_v54, %v5600_v49  ;;  %v1287_v47 = vsel %vm1281_vm3, %v5601_v50, %v1271_v53  ;;  %v1293_v35 = vsel %vm1281_vm3, %v5603_v34, %v1277_v52 }
  0xe6   :  { %v363_v41 = vpop.permute.xlu1 %362  ;;  %v359_v58 = vpop.permute.xlu0 %358  ;;  %v1303_v39 = vsel %vm1297_vm4, %v5604_v43, %v1287_v47  ;;  %v1309_v38 = vsel %vm1297_vm4, %v5605_v60, %v1293_v35  ;;  %v1064_v54 = vsel %vm1058_vm5, %v2656_v1, 0.0  ;;  %v3130_v26 = vsub.f32 %v5607_v48, %v5606_v36  ;;  %v5609_v35 = vld [vmem:[#allocation30_spill] sm:$0xff] }
  0xe7   :  { %v376_v55 = vadd.f32 %v363_v41, %v5602_v5  ;;  %v375_v28 = vadd.f32 %v359_v58, %v5602_v5  ;;  %v1324_v53 = vsel %vm1313_vm6, %v5608_v56, %v1309_v38  ;;  %v1070_v41 = vsel %vm1058_vm5, %v2663_v2, 0.0 }
  0xe8   :  { %v3138_v52 = vsub.f32 %v2986_v8, %v1042_v0  ;;  %v1328_v47 = vmul.f32 %v1324_v53, %v3050_v37  ;;  %v1080_v58 = vsel %vm1074_vm8, %v2666_v3, %v1064_v54  ;;  %v1086_v57 = vsel %vm1074_vm8, %v2669_v6, %v1070_v41 }
  0xe9   :  { %v380_v49 = vsub.f32 %v376_v55, %v3083_v44  ;;  %v330_v5 = vmax.f32 %v3076_v63, 0.0  ;;  %v1318_v55 = vsel %vm1313_vm6, %v5609_v35, %v1303_v39  ;;  %v379_v36 = vsub.f32 %v375_v28, %v3101_v42 }
  0xea   :  { %vm1090_vm9 = vcmp.eq.s32.totalorder %v3090_v62, 2  ;;  %v1332_v38 = vadd.f32 %v1328_v47, %v1318_v55  ;;  %vm1106_vm10 = vcmp.eq.s32.totalorder %v3090_v62, 3  ;;  %vm1122_vm11 = vcmp.eq.s32.totalorder %v3090_v62, 4 }
  0xeb   :  { %v1096_v8 = vsel %vm1090_vm9, %v2672_v9, %v1080_v58  ;;  %v1102_v0 = vsel %vm1090_vm9, %v2679_v7, %v1086_v57  ;;  %v384_v37 = vadd.f32 1e-12, %v380_v49  ;;  %vm1138_vm12 = vcmp.eq.s32.totalorder %v3090_v62, 5 }
  0xec   :  { %v1112_v54 = vsel %vm1106_vm10, %v2682_v10, %v1096_v8  ;;  %v1118_v63 = vsel %vm1106_vm10, %v2685_v11, %v1102_v0  ;;  %v1337_v39 = vmul.f32 %v5610_v51, %v1332_v38  ;;  %v383_v53 = vadd.f32 1e-12, %v379_v36 }
  0xed   :  { %v1128_v28 = vsel %vm1122_vm11, %v2688_v12, %v1112_v54  ;;  %v1134_v48 = vsel %vm1122_vm11, %v2695_v13, %v1118_v63  ;;  %vm1154_vm13 = vcmp.eq.s32.totalorder %v3090_v62, 6  ;;  %vm421_vm14 = vcmp.lt.s32.totalorder %v2992_v61, 16 }
  0xee   :  { %v1144_v41 = vsel %vm1138_vm12, %v2698_v14, %v1128_v28  ;;  %v1150_v47 = vsel %vm1138_vm12, %v2701_v15, %v1134_v48  ;;  %v1342_v49 = vsel %vm5423_vm7, %v1337_v39, 0.0  ;;  %vm1170_vm15 = vcmp.eq.s32.totalorder %v3090_v62, 7 }
  0xef   :  { %v1160_v58 = vsel %vm1154_vm13, %v2704_v16, %v1144_v41  ;;  %v1166_v57 = vsel %vm1154_vm13, %v2711_v17, %v1150_v47  ;;  %v332_v55 = vmax.f32 %v3106_v4, 0.0  ;;  %1343 = vadd.xlane.f32.xlu0 %v1342_v49  ;;  %vm1186_vm0 = vcmp.eq.s32.totalorder %v3090_v62, 8  ;;  %v374_v47 = vpop.permute.xlu1 %373 }
  0xf0   :  { %v1176_v36 = vsel %vm1170_vm15, %v2714_v18, %v1160_v58  ;;  %v1182_v38 = vsel %vm1170_vm15, %v2717_v19, %v1166_v57  ;;  %2342 = vrcp.f32 %v384_v37  ;;  %vm1202_vm1 = vcmp.eq.s32.totalorder %v3090_v62, 9 }
  0xf1   :  { %v1192_v8 = vsel %vm1186_vm0, %v2720_v20, %v1176_v36  ;;  %v1198_v0 = vsel %vm1186_vm0, %v2727_v21, %v1182_v38  ;;  %2344 = vrcp.f32 %v383_v53  ;;  %vm1218_vm2 = vcmp.eq.s32.totalorder %v3090_v62, 10 }
  0xf2   :  { %v1208_v54 = vsel %vm1202_vm1, %v2730_v22, %v1192_v8  ;;  %v1214_v63 = vsel %vm1202_vm1, %v2733_v23, %v1198_v0  ;;  %vm1234_vm3 = vcmp.eq.s32.totalorder %v3090_v62, 11  ;;  %vm1250_vm4 = vcmp.eq.s32.totalorder %v3090_v62, 12  ;;  %v5611_v0 = vld [vmem:[#allocation17_spill] sm:$0xff] }
  0xf3   :  { %v1224_v4 = vsel %vm1218_vm2, %v2736_v24, %v1208_v54  ;;  %v1230_v39 = vsel %vm1218_vm2, %v2743_v25, %v1214_v63  ;;  %vm1266_vm5 = vcmp.eq.s32.totalorder %v3090_v62, 13  ;;  %v3184_v48 = vmul.f32 %v332_v55, %v330_v5 }
  0xf4   :  { %v1240_v37 = vsel %vm1234_vm3, %v2746_v27, %v1224_v4  ;;  %v1246_v28 = vsel %vm1234_vm3, %v2749_v29, %v1230_v39  ;;  %vm1282_vm6 = vcmp.eq.s32.totalorder %v3090_v62, 14  ;;  %vm1059_vm8 = vcmp.eq.s32.totalorder %v3011_v45, 0  ;;  %v5613_v39 = vld [vmem:[#allocation65_spill] sm:$0xff] }
  0xf5   :  { %v1256_v53 = vsel %vm1250_vm4, %v2752_v30, %v1240_v37  ;;  %v1262_v41 = vsel %vm1250_vm4, %v2759_v31, %v1246_v28  ;;  %v1065_v57 = vsel %vm1059_vm8, %v2656_v1, 0.0  ;;  %vm1075_vm9 = vcmp.eq.s32.totalorder %v3011_v45, 1 }
  0xf6   :  { %v1272_v49 = vsel %vm1266_vm5, %v2762_v32, %v1256_v53  ;;  %v1278_v58 = vsel %vm1266_vm5, %v2765_v33, %v1262_v41  ;;  %vm1298_vm10 = vcmp.eq.s32.totalorder %v3090_v62, 15  ;;  %vm5440_vm11 = vcmask 74752  }
  0xf7   :  { %v1288_v5 = vsel %vm1282_vm6, %v5601_v50, %v1272_v49  ;;  %v1294_v55 = vsel %vm1282_vm6, %v5603_v34, %v1278_v58  ;;  %v1071_v36 = vsel %vm1059_vm8, %v2663_v2, 0.0  ;;  %vm1314_vm12 = vcmp.eq.s32.totalorder %v3090_v62, 16  ;;  %v5616_v58 = vld [vmem:[#allocation57_spill] sm:$0xff] }
  0xf8   :  { %v1304_v38 = vsel %vm1298_vm10, %v5604_v43, %v1288_v5  ;;  %v1310_v8 = vsel %vm1298_vm10, %v5605_v60, %v1294_v55  ;;  %v378_v54 = vadd.f32 %v374_v47, %v5611_v0  ;;  %v5612_v63 = vsub.f32 1.0, %v2954_v40 }
  0xf9   :  { %v5614_v37 = vtrunc.f32 %v5613_v39  ;;  %v1325_v53 = vsel %vm1314_vm12, %v5608_v56, %v1310_v8  ;;  %v1081_v41 = vsel %vm1075_vm9, %v2666_v3, %v1065_v57  ;;  %v5615_v49 = vcvt.s32.f32 %v2992_v61 }
  0xfa   :  { %v3204_v4 = vmul.f32 16.0, %v5612_v63  ;;  %v3222_v40 = vsel %vm421_vm14, %v2992_v61, 16  ;;  %v1329_v47 = vmul.f32 %v1325_v53, %v3138_v52  ;;  %v1087_v5 = vsel %vm1075_vm9, %v2669_v6, %v1071_v36  ;;  %v2343_v55 = vpop.eup %2342 }
  0xfb   :  { %v3208_v28 = vcvt.f32.s32 %v5614_v37  ;;  %v3217_v62 = vsub.f32 %v5616_v58, %v5615_v49  ;;  %5618 = vst [vmem:[#allocation16_spill] sm:$0xff] %v3222_v40  ;;  %v1319_v8 = vsel %vm1314_vm12, %v5609_v35, %v1304_v38  ;;  %vm1091_vm13 = vcmp.eq.s32.totalorder %v3011_v45, 2  ;;  %v2345_v57 = vpop.eup %2344 }
  0xfc   :  { %vm1107_vm15 = vcmp.eq.s32.totalorder %v3011_v45, 3  ;;  %vm1123_vm0 = vcmp.eq.s32.totalorder %v3011_v45, 4  ;;  %v1333_v63 = vadd.f32 %v1329_v47, %v1319_v8  ;;  %v382_v61 = vsub.f32 %v378_v54, %v3184_v48 }
  0xfd   :  { %5617 = vst [vmem:[#allocation26_spill] sm:$0xff] %v3217_v62  ;;  %v1097_v37 = vsel %vm1091_vm13, %v2672_v9, %v1081_v41  ;;  %v1103_v52 = vsel %vm1091_vm13, %v2679_v7, %v1087_v5  ;;  %v2322_v53 = vtrunc.f32 %v3204_v4  ;;  %v408_v36 = vcvt.s32.f32 %v3208_v28 }
  0xfe   :  { %v1113_v38 = vsel %vm1107_vm15, %v2682_v10, %v1097_v37  ;;  %v1119_v49 = vsel %vm1107_vm15, %v2685_v11, %v1103_v52  ;;  %v1338_v58 = vmul.f32 %v5610_v51, %v1333_v63  ;;  %vm1139_vm14 = vcmp.eq.s32.totalorder %v3011_v45, 5 }
  0xff   :  { %v1129_v62 = vsel %vm1123_vm0, %v2688_v12, %v1113_v38  ;;  %v1135_v47 = vsel %vm1123_vm0, %v2695_v13, %v1119_v49  ;;  %vm417_vm1 = vcmp.lt.s32.totalorder %v3208_v28, 16  ;;  %vm1155_vm2 = vcmp.eq.s32.totalorder %v3011_v45, 6 }
 0x100   :  { %v1145_v54 = vsel %vm1139_vm14, %v2698_v14, %v1129_v62  ;;  %v1151_v41 = vsel %vm1139_vm14, %v2701_v15, %v1135_v47  ;;  %v1346_v5 = vsel %vm5440_vm11, %v1338_v58, 0.0  ;;  %v386_v8 = vadd.f32 1e-12, %v382_v61 }
 0x101   :  { %v1161_v37 = vsel %vm1155_vm2, %v2704_v16, %v1145_v54  ;;  %v1167_v63 = vsel %vm1155_vm2, %v2711_v17, %v1151_v41  ;;  %v3250_v52 = vcvt.f32.s32 %v2322_v53  ;;  %v329_v38 = vmax.f32 %v3081_v59, 0.0  ;;  %1347 = vadd.xlane.f32.xlu1 %v1346_v5 }
 0x102   :  { %v331_v49 = vmax.f32 %v3111_v46, 0.0  ;;  %vm1171_vm3 = vcmp.eq.s32.totalorder %v3011_v45, 7  ;;  %v392_v62 = vmul.f32 %v2343_v55, %v3083_v44  ;;  %vm1187_vm4 = vcmp.eq.s32.totalorder %v3011_v45, 8 }
 0x103   :  { %v1177_v47 = vsel %vm1171_vm3, %v2714_v18, %v1161_v37  ;;  %v1183_v58 = vsel %vm1171_vm3, %v2717_v19, %v1167_v63  ;;  %v391_v61 = vmul.f32 %v2345_v57, %v3101_v42  ;;  %vm1203_vm5 = vcmp.eq.s32.totalorder %v3011_v45, 9 }
 0x104   :  { %v1193_v53 = vsel %vm1187_vm4, %v2720_v20, %v1177_v47  ;;  %v1199_v54 = vsel %vm1187_vm4, %v2727_v21, %v1183_v58  ;;  %2346 = vrcp.f32 %v386_v8  ;;  %vm1219_vm6 = vcmp.eq.s32.totalorder %v3011_v45, 10 }
 0x105   :  { %v1209_v59 = vsel %vm1203_vm5, %v2730_v22, %v1193_v53  ;;  %v1215_v46 = vsel %vm1203_vm5, %v2733_v23, %v1199_v54  ;;  %v3269_v44 = vsel %vm417_vm1, %v3208_v28, 16  ;;  %vm1235_vm8 = vcmp.eq.s32.totalorder %v3011_v45, 11 }
 0x106   :  { %5619 = vst [vmem:[#allocation27_spill] sm:$0xff] %v3269_v44  ;;  %v1225_v42 = vsel %vm1219_vm6, %v2736_v24, %v1209_v59  ;;  %v1231_v55 = vsel %vm1219_vm6, %v2743_v25, %v1215_v46  ;;  %v396_v57 = vsub.f32 1.0, %v392_v62  ;;  %vm1251_vm9 = vcmp.eq.s32.totalorder %v3011_v45, 12  ;;  %v5621_v46 = vld [vmem:[#allocation33_spill] sm:$0xff] }
 0x107   :  { %v1241_v41 = vsel %vm1235_vm8, %v2746_v27, %v1225_v42  ;;  %v1247_v5 = vsel %vm1235_vm8, %v2749_v29, %v1231_v55  ;;  %v395_v8 = vsub.f32 1.0, %v391_v61  ;;  %vm1267_vm10 = vcmp.eq.s32.totalorder %v3011_v45, 13  ;;  %v5620_v61 = vld [vmem:[#allocation74_spill] sm:$0xff] }
 0x108   :  { %v1257_v37 = vsel %vm1251_vm9, %v2752_v30, %v1241_v41  ;;  %v1263_v63 = vsel %vm1251_vm9, %v2759_v31, %v1247_v5  ;;  %vm1283_vm12 = vcmp.eq.s32.totalorder %v3011_v45, 14  ;;  %v3283_v62 = vmul.f32 %v331_v49, %v329_v38  ;;  %v5623_v55 = vld [vmem:[#allocation34_spill] sm:$0xff] }
 0x109   :  { %v1273_v28 = vsel %vm1267_vm10, %v2762_v32, %v1257_v37  ;;  %v1279_v47 = vsel %vm1267_vm10, %v2765_v33, %v1263_v63  ;;  %vm1299_vm13 = vcmp.eq.s32.totalorder %v3011_v45, 15  ;;  %vm423_vm15 = vcmp.eq.s32.totalorder %v5620_v61, 0 }
 0x10a   :  { %v1289_v58 = vsel %vm1283_vm12, %v5601_v50, %v1273_v28  ;;  %v1295_v53 = vsel %vm1283_vm12, %v5603_v34, %v1279_v47  ;;  %vm1315_vm0 = vcmp.eq.s32.totalorder %v3011_v45, 16  ;;  %v429_v42 = vsel %vm423_vm15, %v5621_v46, 0.0  ;;  %v5624_v28 = vld [vmem:[#allocation35_spill] sm:$0xff] }
 0x10b   :  { %v1305_v54 = vsel %vm1299_vm13, %v5604_v43, %v1289_v58  ;;  %v1311_v59 = vsel %vm1299_vm13, %v5605_v60, %v1295_v53  ;;  %vm1055_vm14 = vcmp.lt.s32.totalorder %v3250_v52, 16  ;;  %v3295_v38 = vsub.f32 %v5613_v39, %v408_v36  ;;  %v5625_v58 = vld [vmem:[#allocation36_spill] sm:$0xff] }
 0x10c   :  { %v1326_v49 = vsel %vm1315_vm0, %v5608_v56, %v1311_v59  ;;  %v435_v41 = vsel %vm423_vm15, %v5623_v55, 0.0  ;;  %v3299_v5 = vmul.f32 16.0, %v396_v57  ;;  %v3301_v37 = vmul.f32 16.0, %v395_v8  ;;  %v5626_v59 = vld [vmem:[#allocation37_spill] sm:$0xff]  ;;  %v5627_v57 = vld [vmem:[#allocation38_spill] sm:$0xff] }
 0x10d   :  { %5622 = vst [vmem:[#allocation28_spill] sm:$0xff] %v3295_v38  ;;  %v1330_v63 = vmul.f32 %v1326_v49, %v3130_v26  ;;  %vm439_vm1 = vcmp.eq.s32.totalorder %v5620_v61, 1  ;;  %v1320_v45 = vsel %vm1315_vm0, %v5609_v35, %v1305_v54  ;;  %vm455_vm2 = vcmp.eq.s32.totalorder %v5620_v61, 2  ;;  %v5628_v54 = vld [vmem:[#allocation39_spill] sm:$0xff]  ;;  %v5629_v49 = vld [vmem:[#allocation40_spill] sm:$0xff]  ;;  %v5630_v26 = vld [vmem:[#allocation41_spill] sm:$0xff] }
 0x10e   :  { %v445_v47 = vsel %vm439_vm1, %v5624_v28, %v429_v42  ;;  %v451_v53 = vsel %vm439_vm1, %v5625_v58, %v435_v41  ;;  %v2347_v39 = vpop.eup %2346  ;;  %vm471_vm3 = vcmp.eq.s32.totalorder %v5620_v61, 3  ;;  %v3316_v8 = vsel %vm1055_vm14, %v3250_v52, 16 }
 0x10f   :  { %v1334_v36 = vadd.f32 %v1330_v63, %v1320_v45  ;;  %v461_v38 = vsel %vm455_vm2, %v5626_v59, %v445_v47  ;;  %v467_v40 = vsel %vm455_vm2, %v5627_v57, %v451_v53  ;;  %v370_v47 = vpop.permute.xlu0 %369  ;;  %vm487_vm4 = vcmp.eq.s32.totalorder %v5620_v61, 4  ;;  %v5631_v59 = vld [vmem:[#allocation42_spill] sm:$0xff] }
 0x110   :  { %v477_v42 = vsel %vm471_vm3, %v5628_v54, %v461_v38  ;;  %v483_v41 = vsel %vm471_vm3, %v5629_v49, %v467_v40  ;;  %v3325_v53 = vmul.f32 %v2347_v39, %v3184_v48  ;;  %vm503_vm5 = vcmp.eq.s32.totalorder %v5620_v61, 5  ;;  %v5632_v38 = vld [vmem:[#allocation43_spill] sm:$0xff]  ;;  %v5633_v49 = vld [vmem:[#allocation44_spill] sm:$0xff]  ;;  %v5634_v48 = vld [vmem:[#allocation45_spill] sm:$0xff] }
 0x111   :  { %v1339_v45 = vmul.f32 %v5610_v51, %v1334_v36  ;;  %v493_v57 = vsel %vm487_vm4, %v5630_v26, %v477_v42  ;;  %v499_v56 = vsel %vm487_vm4, %v5631_v59, %v483_v41  ;;  %vm519_vm6 = vcmp.eq.s32.totalorder %v5620_v61, 6  ;;  %v5635_v51 = vld [vmem:[#allocation46_spill] sm:$0xff]  ;;  %v5636_v41 = vld [vmem:[#allocation47_spill] sm:$0xff]  ;;  %v5637_v26 = vld [vmem:[#allocation49_spill] sm:$0xff] }
 0x112   :  { %v509_v44 = vsel %vm503_vm5, %v5632_v38, %v493_v57  ;;  %v515_v63 = vsel %vm503_vm5, %v5633_v49, %v499_v56  ;;  %v3335_v36 = vadd.f32 %v370_v47, %v5611_v0  ;;  %vm535_vm8 = vcmp.eq.s32.totalorder %v5620_v61, 7  ;;  %v5638_v56 = vld [vmem:[#allocation50_spill] sm:$0xff]  ;;  %v5640_v0 = vld [vmem:[#allocation52_spill] sm:$0xff] }
 0x113   :  { %v1349_v40 = vsel %vm5423_vm7, %v1339_v45, 0.0  ;;  %v525_v39 = vsel %vm519_vm6, %v5634_v48, %v509_v44  ;;  %v531_v42 = vsel %vm519_vm6, %v5635_v51, %v515_v63  ;;  %vm551_vm9 = vcmp.eq.s32.totalorder %v5620_v61, 8  ;;  %v5641_v63 = vld [vmem:[#allocation53_spill] sm:$0xff]  ;;  %v5648_v51 = vld [vmem:[#allocation59_spill] sm:$0xff]  ;;  %v5651_v38 = vld [vmem:[#allocation62_spill] sm:$0xff] }
 0x114   :  { %1350 = vadd.xlane.f32.xlu0 %v1349_v40  ;;  %v541_v59 = vsel %vm535_vm8, %v5636_v41, %v525_v39  ;;  %v547_v45 = vsel %vm535_vm8, %v5637_v26, %v531_v42  ;;  %vm567_vm10 = vcmp.eq.s32.totalorder %v5620_v61, 9  ;;  %v5639_v40 = vld [vmem:[#allocation51_spill] sm:$0xff]  ;;  %vm583_vm12 = vcmp.eq.s32.totalorder %v5620_v61, 10  ;;  %v5642_v39 = vld [vmem:[#allocation54_spill] sm:$0xff] }
 0x115   :  { %v557_v57 = vsel %vm551_vm9, %v5638_v56, %v541_v59  ;;  %v563_v49 = vsel %vm551_vm9, %v5639_v40, %v547_v45  ;;  %vm599_vm13 = vcmp.eq.s32.totalorder %v5620_v61, 11  ;;  %vm615_vm15 = vcmp.eq.s32.totalorder %v5620_v61, 12  ;;  %v5643_v26 = vld [vmem:[#allocation55_spill] sm:$0xff]  ;;  %v5644_v59 = vld [vmem:[#allocation70_spill] sm:$0xff]  ;;  %v5646_v40 = vld [vmem:[#allocation56_spill] sm:$0xff] }
 0x116   :  { %v573_v44 = vsel %vm567_vm10, %v5640_v0, %v557_v57  ;;  %v579_v47 = vsel %vm567_vm10, %v5641_v63, %v563_v49  ;;  %vm631_vm0 = vcmp.eq.s32.totalorder %v5620_v61, 13  ;;  %vm647_vm14 = vcmp.eq.s32.totalorder %v5620_v61, 14  ;;  %v5645_v45 = vld [vmem:[#allocation14_spill] sm:$0xff] }
 0x117   :  { %v589_v42 = vsel %vm583_vm12, %v5642_v39, %v573_v44  ;;  %v595_v41 = vsel %vm583_vm12, %v5643_v26, %v579_v47  ;;  %vm1419_vm1 = vcmp.eq.s32.totalorder %v5645_v45, %v5644_v59  ;;  %vm1060_vm2 = vcmp.eq.s32.totalorder %v3316_v8, 0  ;;  %v5647_v57 = vld [vmem:[#allocation58_spill] sm:$0xff]  ;;  %v5649_v44 = vld [vmem:[#allocation60_spill] sm:$0xff]  ;;  %v5650_v47 = vld [vmem:[#allocation61_spill] sm:$0xff] }
 0x118   :  { %v605_v56 = vsel %vm599_vm13, %v5646_v40, %v589_v42  ;;  %v611_v0 = vsel %vm599_vm13, %v5647_v57, %v595_v41  ;;  %v1066_v49 = vsel %vm1060_vm2, %v2656_v1, 0.0  ;;  %v1072_v63 = vsel %vm1060_vm2, %v2663_v2, 0.0  ;;  %v5652_v57 = vld [vmem:[#allocation63_spill] sm:$0xff]  ;;  %v5653_v2 = vld [vmem:[#allocation64_spill] sm:$0xff] }
 0x119   :  { %v621_v48 = vsel %vm615_vm15, %v5648_v51, %v605_v56  ;;  %v627_v39 = vsel %vm615_vm15, %v5649_v44, %v611_v0  ;;  %vm663_vm3 = vcmp.eq.s32.totalorder %v5620_v61, 15  ;;  %vm1076_vm4 = vcmp.eq.s32.totalorder %v3316_v8, 1  ;;  %v5654_v0 = vld [vmem:[#allocation66_spill] sm:$0xff] }
 0x11a   :  { %v637_v26 = vsel %vm631_vm0, %v5650_v47, %v621_v48  ;;  %v643_v54 = vsel %vm631_vm0, %v5651_v38, %v627_v39  ;;  %v1082_v42 = vsel %vm1076_vm4, %v2666_v3, %v1066_v49  ;;  %v1088_v41 = vsel %vm1076_vm4, %v2669_v6, %v1072_v63  ;;  %v5655_v47 = vld [vmem:[#allocation67_spill] sm:$0xff]  ;;  %v5656_v49 = vld [vmem:[#allocation69_spill] sm:$0xff] }
 0x11b   :  { %v653_v1 = vsel %vm647_vm14, %v5652_v57, %v637_v26  ;;  %v659_v56 = vsel %vm647_vm14, %v5653_v2, %v643_v54  ;;  %vm679_vm5 = vcmp.eq.s32.totalorder %v5620_v61, 16  ;;  %vm1092_vm6 = vcmp.eq.s32.totalorder %v3316_v8, 2  ;;  %v5657_v61 = vld [vmem:[#allocation73_spill] sm:$0xff] }
 0x11c   :  { %v669_v48 = vsel %vm663_vm3, %v5654_v0, %v653_v1  ;;  %v675_v39 = vsel %vm663_vm3, %v5655_v47, %v659_v56  ;;  %v1098_v3 = vsel %vm1092_vm6, %v2672_v9, %v1082_v42  ;;  %v1104_v6 = vsel %vm1092_vm6, %v2679_v7, %v1088_v41  ;;  %v5658_v9 = vld [vmem:[#allocation68_spill] sm:$0xff] }
 0x11d   :  { %v398_v63 = vsub.f32 1.0, %v3325_v53  ;;  %v381_v26 = vsub.f32 %v3335_v36, %v3283_v62  ;;  %v691_v57 = vsel %vm679_vm5, %v5656_v49, %v675_v39  ;;  %vm1108_vm8 = vcmp.eq.s32.totalorder %v3316_v8, 3 }
 0x11e   :  { %v695_v54 = vmul.f32 %v691_v57, %v5657_v61  ;;  %v1114_v2 = vsel %vm1108_vm8, %v2682_v10, %v1098_v3  ;;  %v1120_v1 = vsel %vm1108_vm8, %v2685_v11, %v1104_v6  ;;  %vm1124_vm9 = vcmp.eq.s32.totalorder %v3316_v8, 4 }
 0x11f   :  { %v685_v42 = vsel %vm679_vm5, %v5658_v9, %v669_v48  ;;  %v1130_v7 = vsel %vm1124_vm9, %v2688_v12, %v1114_v2  ;;  %v1136_v53 = vsel %vm1124_vm9, %v2695_v13, %v1120_v1  ;;  %vm1140_vm10 = vcmp.eq.s32.totalorder %v3316_v8, 5 }
 0x120   :  { %v3395_v36 = vadd.f32 %v695_v54, %v685_v42  ;;  %v1146_v41 = vsel %vm1140_vm10, %v2698_v14, %v1130_v7  ;;  %v1152_v57 = vsel %vm1140_vm10, %v2701_v15, %v1136_v53  ;;  %vm1156_vm12 = vcmp.eq.s32.totalorder %v3316_v8, 6  ;;  %v5663_v42 = vld [vmem:[#allocation31_spill] sm:$0xff]  ;;  %v5664_v53 = vld [vmem:[#allocation37_spill] sm:$0xff] }
 0x121   :  { %v5659_v10 = vcvt.s32.f32 %v3250_v52  ;;  %v1162_v56 = vsel %vm1156_vm12, %v2704_v16, %v1146_v41  ;;  %v1168_v12 = vsel %vm1156_vm12, %v2711_v17, %v1152_v57  ;;  %vm1172_vm13 = vcmp.eq.s32.totalorder %v3316_v8, 7  ;;  %v5665_v41 = vld [vmem:[#allocation38_spill] sm:$0xff] }
 0x122   :  { %v1425_v13 = vsel %vm1419_vm1, %v3395_v36, 0.0  ;;  %v1178_v14 = vsel %vm1172_vm13, %v2714_v18, %v1162_v56  ;;  %v1184_v15 = vsel %vm1172_vm13, %v2717_v19, %v1168_v12  ;;  %vm1188_vm15 = vcmp.eq.s32.totalorder %v3316_v8, 8  ;;  %v5668_v12 = vld [vmem:[#allocation41_spill] sm:$0xff] }
 0x123   :  { %v1048_v11 = vsub.f32 %v3204_v4, %v5659_v10  ;;  %v5660_v52 = vtrunc.f32 %v3299_v5  ;;  %v5661_v16 = vtrunc.f32 %v3301_v37  ;;  %v1429_v2 = vsel %vm5423_vm7, %v1425_v13, 0.0  ;;  %v5667_v10 = vld [vmem:[#allocation40_spill] sm:$0xff] }
 0x124   :  { %v1194_v48 = vsel %vm1188_vm15, %v2720_v20, %v1178_v14  ;;  %v3423_v39 = vmul.f32 16.0, %v398_v63  ;;  %v3425_v3 = vadd.f32 1e-12, %v381_v26  ;;  %1430 = vadd.xlane.f32.xlu1 %v1429_v2  ;;  %v1200_v18 = vsel %vm1188_vm15, %v2727_v21, %v1184_v15  ;;  %v5669_v14 = vld [vmem:[#allocation42_spill] sm:$0xff] }
 0x125   :  { %v3415_v4 = vcvt.f32.s32 %v5660_v52  ;;  %v3419_v17 = vcvt.f32.s32 %v5661_v16  ;;  %vm1204_vm0 = vcmp.eq.s32.totalorder %v3316_v8, 9  ;;  %vm1220_vm14 = vcmp.eq.s32.totalorder %v3316_v8, 10  ;;  %v5671_v16 = vld [vmem:[#allocation44_spill] sm:$0xff] }
 0x126   :  { %v1210_v19 = vsel %vm1204_vm0, %v2730_v22, %v1194_v48  ;;  %v1216_v6 = vsel %vm1204_vm0, %v2733_v23, %v1200_v18  ;;  %vm1236_vm2 = vcmp.eq.s32.totalorder %v3316_v8, 11  ;;  %vm1252_vm3 = vcmp.eq.s32.totalorder %v3316_v8, 12  ;;  %v5672_v48 = vld [vmem:[#allocation32_spill] sm:$0xff] }
 0x127   :  { %v1226_v61 = vsel %vm1220_vm14, %v2736_v24, %v1210_v19  ;;  %v1232_v20 = vsel %vm1220_vm14, %v2743_v25, %v1216_v6  ;;  %vm1268_vm4 = vcmp.eq.s32.totalorder %v3316_v8, 13  ;;  %vm1284_vm5 = vcmp.eq.s32.totalorder %v3316_v8, 14  ;;  %v5662_v24 = vld [vmem:[#allocation72_spill] sm:$0xff]  ;;  %v5673_v19 = vld [vmem:[#allocation45_spill] sm:$0xff] }
 0x128   :  { %v1242_v21 = vsel %vm1236_vm2, %v2746_v27, %v1226_v61  ;;  %v1248_v63 = vsel %vm1236_vm2, %v2749_v29, %v1232_v20  ;;  %vm1300_vm6 = vcmp.eq.s32.totalorder %v3316_v8, 15  ;;  %vm1316_vm8 = vcmp.eq.s32.totalorder %v3316_v8, 16  ;;  %v5674_v61 = vld [vmem:[#allocation46_spill] sm:$0xff] }
 0x129   :  { %v1258_v22 = vsel %vm1252_vm3, %v2752_v30, %v1242_v21  ;;  %v1264_v23 = vsel %vm1252_vm3, %v2759_v31, %v1248_v63  ;;  %vm425_vm9 = vcmp.eq.s32.totalorder %v5662_v24, 0  ;;  %vm441_vm10 = vcmp.eq.s32.totalorder %v5662_v24, 1  ;;  %v5675_v21 = vld [vmem:[#allocation47_spill] sm:$0xff] }
 0x12a   :  { %v1274_v25 = vsel %vm1268_vm4, %v2762_v32, %v1258_v22  ;;  %v1280_v26 = vsel %vm1268_vm4, %v2765_v33, %v1264_v23  ;;  %v431_v27 = vsel %vm425_vm9, %v5621_v46, 0.0  ;;  %v437_v29 = vsel %vm425_vm9, %v5623_v55, 0.0  ;;  %v5676_v22 = vld [vmem:[#allocation49_spill] sm:$0xff] }
 0x12b   :  { %v1290_v54 = vsel %vm1284_vm5, %v5601_v50, %v1274_v25  ;;  %v1296_v1 = vsel %vm1284_vm5, %v5603_v34, %v1280_v26  ;;  %vm457_vm12 = vcmp.eq.s32.totalorder %v5662_v24, 2  ;;  %v447_v32 = vsel %vm441_vm10, %v5624_v28, %v431_v27  ;;  %v5677_v26 = vld [vmem:[#allocation50_spill] sm:$0xff] }
 0x12c   :  { %v1306_v30 = vsel %vm1300_vm6, %v5604_v43, %v1290_v54  ;;  %v1312_v31 = vsel %vm1300_vm6, %v5605_v60, %v1296_v1  ;;  %v453_v33 = vsel %vm441_vm10, %v5625_v58, %v437_v29  ;;  %v463_v50 = vsel %vm457_vm12, %v5664_v53, %v447_v32  ;;  %v5666_v43 = vld [vmem:[#allocation39_spill] sm:$0xff]  ;;  %v5679_v1 = vld [vmem:[#allocation52_spill] sm:$0xff] }
 0x12d   :  { %v1321_v8 = vsel %vm1316_vm8, %v5609_v35, %v1306_v30  ;;  %v1327_v7 = vsel %vm1316_vm8, %v5663_v42, %v1312_v31  ;;  %v469_v34 = vsel %vm457_vm12, %v5665_v41, %v453_v33  ;;  %vm473_vm13 = vcmp.eq.s32.totalorder %v5662_v24, 3  ;;  %v5678_v29 = vld [vmem:[#allocation51_spill] sm:$0xff]  ;;  %v5680_v31 = vld [vmem:[#allocation53_spill] sm:$0xff]  ;;  %v5681_v33 = vld [vmem:[#allocation54_spill] sm:$0xff] }
 0x12e   :  { %v1331_v57 = vmul.f32 %v1327_v7, %v1048_v11  ;;  %vm489_vm15 = vcmp.eq.s32.totalorder %v5662_v24, 4  ;;  %vm505_vm0 = vcmp.eq.s32.totalorder %v5662_v24, 5  ;;  %v479_v60 = vsel %vm473_vm13, %v5666_v43, %v463_v50  ;;  %v5670_v11 = vld [vmem:[#allocation43_spill] sm:$0xff] }
 0x12f   :  { %v485_v56 = vsel %vm473_vm13, %v5667_v10, %v469_v34  ;;  %vm521_vm14 = vcmp.eq.s32.totalorder %v5662_v24, 6  ;;  %vm537_vm2 = vcmp.eq.s32.totalorder %v5662_v24, 7  ;;  %v495_v13 = vsel %vm489_vm15, %v5668_v12, %v479_v60  ;;  %v5682_v42 = vld [vmem:[#allocation55_spill] sm:$0xff] }
 0x130   :  { %v1335_v35 = vadd.f32 %v1331_v57, %v1321_v8  ;;  %v501_v15 = vsel %vm489_vm15, %v5669_v14, %v485_v56  ;;  %vm553_vm3 = vcmp.eq.s32.totalorder %v5662_v24, 8  ;;  %v511_v52 = vsel %vm505_vm0, %v5670_v11, %v495_v13  ;;  %v5683_v50 = vld [vmem:[#allocation27_spill] sm:$0xff]  ;;  %v5684_v57 = vld [vmem:[#allocation58_spill] sm:$0xff] }
 0x131   :  { %v517_v2 = vsel %vm505_vm0, %v5671_v16, %v501_v15  ;;  %vm569_vm4 = vcmp.eq.s32.totalorder %v5662_v24, 9  ;;  %vm585_vm5 = vcmp.eq.s32.totalorder %v5662_v24, 10  ;;  %v527_v6 = vsel %vm521_vm14, %v5673_v19, %v511_v52 }
 0x132   :  { %v1340_v18 = vmul.f32 %v5672_v48, %v1335_v35  ;;  %v533_v20 = vsel %vm521_vm14, %v5674_v61, %v517_v2  ;;  %vm601_vm6 = vcmp.eq.s32.totalorder %v5662_v24, 11  ;;  %v543_v63 = vsel %vm537_vm2, %v5675_v21, %v527_v6  ;;  %v5685_v48 = vld [vmem:[#allocation61_spill] sm:$0xff] }
 0x133   :  { %v549_v23 = vsel %vm537_vm2, %v5676_v22, %v533_v20  ;;  %vm617_vm8 = vcmp.eq.s32.totalorder %v5662_v24, 12  ;;  %vm633_vm9 = vcmp.eq.s32.totalorder %v5662_v24, 13  ;;  %v559_v27 = vsel %vm553_vm3, %v5677_v26, %v543_v63  ;;  %v5686_v20 = vld [vmem:[#allocation63_spill] sm:$0xff] }
 0x134   :  { %v1352_v25 = vsel %vm5440_vm11, %v1340_v18, 0.0  ;;  %v565_v54 = vsel %vm553_vm3, %v5678_v29, %v549_v23  ;;  %vm649_vm10 = vcmp.eq.s32.totalorder %v5662_v24, 14  ;;  %v575_v30 = vsel %vm569_vm4, %v5679_v1, %v559_v27  ;;  %v5687_v23 = vld [vmem:[#allocation64_spill] sm:$0xff] }
 0x135   :  { %1353 = vadd.xlane.f32.xlu0 %v1352_v25  ;;  %v581_v32 = vsel %vm569_vm4, %v5680_v31, %v565_v54  ;;  %vm665_vm12 = vcmp.eq.s32.totalorder %v5662_v24, 15  ;;  %vm681_vm13 = vcmp.eq.s32.totalorder %v5662_v24, 16  ;;  %v591_v8 = vsel %vm585_vm5, %v5681_v33, %v575_v30 }
 0x136   :  { %v597_v7 = vsel %vm585_vm5, %v5682_v42, %v581_v32  ;;  %vm424_vm15 = vcmp.eq.s32.totalorder %v5683_v50, 0  ;;  %vm440_vm0 = vcmp.eq.s32.totalorder %v5683_v50, 1  ;;  %v607_v34 = vsel %vm601_vm6, %v5646_v40, %v591_v8 }
 0x137   :  { %v613_v60 = vsel %vm601_vm6, %v5684_v57, %v597_v7  ;;  %v430_v56 = vsel %vm424_vm15, %v5621_v46, 0.0  ;;  %v436_v35 = vsel %vm424_vm15, %v5623_v55, 0.0  ;;  %v623_v13 = vsel %vm617_vm8, %v5648_v51, %v607_v34 }
 0x138   :  { %v629_v15 = vsel %vm617_vm8, %v5649_v44, %v613_v60  ;;  %v446_v52 = vsel %vm440_vm0, %v5624_v28, %v430_v56  ;;  %v452_v2 = vsel %vm440_vm0, %v5625_v58, %v436_v35  ;;  %v639_v18 = vsel %vm633_vm9, %v5685_v48, %v623_v13  ;;  %v5688_v56 = vld [vmem:[#allocation71_spill] sm:$0xff] }
 0x139   :  { %v645_v6 = vsel %vm633_vm9, %v5651_v38, %v629_v15  ;;  %vm456_vm14 = vcmp.eq.s32.totalorder %v5683_v50, 2  ;;  %vm472_vm2 = vcmp.eq.s32.totalorder %v5683_v50, 3  ;;  %v655_v63 = vsel %vm649_vm10, %v5686_v20, %v639_v18 }
 0x13a   :  { %v661_v25 = vsel %vm649_vm10, %v5687_v23, %v645_v6  ;;  %v462_v27 = vsel %vm456_vm14, %v5664_v53, %v446_v52  ;;  %v468_v54 = vsel %vm456_vm14, %v5665_v41, %v452_v2  ;;  %v671_v30 = vsel %vm665_vm12, %v5654_v0, %v655_v63 }
 0x13b   :  { %v677_v32 = vsel %vm665_vm12, %v5655_v47, %v661_v25  ;;  %v478_v8 = vsel %vm472_vm2, %v5666_v43, %v462_v27  ;;  %v484_v7 = vsel %vm472_vm2, %v5667_v10, %v468_v54  ;;  %2348 = vrcp.f32 %v3425_v3 }
 0x13c   :  { %v687_v34 = vsel %vm681_vm13, %v5658_v9, %v671_v30  ;;  %v693_v60 = vsel %vm681_vm13, %v5656_v49, %v677_v32  ;;  %vm488_vm3 = vcmp.eq.s32.totalorder %v5683_v50, 4  ;;  %vm504_vm4 = vcmp.eq.s32.totalorder %v5683_v50, 5 }
 0x13d   :  { %v697_v35 = vmul.f32 %v693_v60, %v5688_v56  ;;  %v494_v13 = vsel %vm488_vm3, %v5668_v12, %v478_v8  ;;  %v500_v15 = vsel %vm488_vm3, %v5669_v14, %v484_v7  ;;  %vm520_vm5 = vcmp.eq.s32.totalorder %v5683_v50, 6 }
 0x13e   :  { %v510_v3 = vsel %vm504_vm4, %v5670_v11, %v494_v13  ;;  %v516_v52 = vsel %vm504_vm4, %v5671_v16, %v500_v15  ;;  %vm536_vm6 = vcmp.eq.s32.totalorder %v5683_v50, 7  ;;  %vm552_vm8 = vcmp.eq.s32.totalorder %v5683_v50, 8  ;;  %v5690_v15 = vld [vmem:[#allocation16_spill] sm:$0xff] }
 0x13f   :  { %v3559_v24 = vadd.f32 %v697_v35, %v687_v34  ;;  %v526_v2 = vsel %vm520_vm5, %v5673_v19, %v510_v3  ;;  %v532_v18 = vsel %vm520_vm5, %v5674_v61, %v516_v52  ;;  %vm568_vm9 = vcmp.eq.s32.totalorder %v5683_v50, 9 }
 0x140   :  { %v542_v6 = vsel %vm536_vm6, %v5675_v21, %v526_v2  ;;  %v548_v63 = vsel %vm536_vm6, %v5676_v22, %v532_v18  ;;  %vm584_vm10 = vcmp.eq.s32.totalorder %v5683_v50, 10  ;;  %vm600_vm12 = vcmp.eq.s32.totalorder %v5683_v50, 11 }
 0x141   :  { %5689 = vst [vmem:[#allocation29_spill] sm:$0xff] %v3559_v24  ;;  %v1427_v25 = vsel %vm1419_vm1, %v3559_v24, 0.0  ;;  %v558_v27 = vsel %vm552_vm8, %v5677_v26, %v542_v6  ;;  %v564_v54 = vsel %vm552_vm8, %v5678_v29, %v548_v63  ;;  %vm616_vm13 = vcmp.eq.s32.totalorder %v5683_v50, 12 }
 0x142   :  { %v1435_v30 = vsel %vm5423_vm7, %v1427_v25, 0.0  ;;  %v574_v32 = vsel %vm568_vm9, %v5679_v1, %v558_v27  ;;  %v580_v8 = vsel %vm568_vm9, %v5680_v31, %v564_v54  ;;  %vm632_vm1 = vcmp.eq.s32.totalorder %v5683_v50, 13 }
 0x143   :  { %1436 = vadd.xlane.f32.xlu1 %v1435_v30  ;;  %v590_v7 = vsel %vm584_vm10, %v5681_v33, %v574_v32  ;;  %v596_v34 = vsel %vm584_vm10, %v5682_v42, %v580_v8  ;;  %vm648_vm15 = vcmp.eq.s32.totalorder %v5683_v50, 14  ;;  %vm664_vm0 = vcmp.eq.s32.totalorder %v5683_v50, 15 }
 0x144   :  { %v606_v60 = vsel %vm600_vm12, %v5646_v40, %v590_v7  ;;  %v612_v56 = vsel %vm600_vm12, %v5684_v57, %v596_v34  ;;  %vm680_vm14 = vcmp.eq.s32.totalorder %v5683_v50, 16  ;;  %vm721_vm2 = vcmp.lt.s32.totalorder %v3415_v4, 16 }
 0x145   :  { %v622_v35 = vsel %vm616_vm13, %v5648_v51, %v606_v60  ;;  %v628_v13 = vsel %vm616_vm13, %v5649_v44, %v612_v56  ;;  %vm426_vm3 = vcmp.eq.s32.totalorder %v5690_v15, 0  ;;  %vm442_vm4 = vcmp.eq.s32.totalorder %v5690_v15, 1  ;;  %v2349_v3 = vpop.eup %2348  ;;  %v5691_v60 = vld [vmem:[#allocation28_spill] sm:$0xff] }
 0x146   :  { %v638_v52 = vsel %vm632_vm1, %v5685_v48, %v622_v35  ;;  %v644_v2 = vsel %vm632_vm1, %v5651_v38, %v628_v13  ;;  %v3595_v18 = vadd.s32 8, %v5645_v45  ;;  %v432_v6 = vsel %vm426_vm3, %v5621_v46, 0.0 }
 0x147   :  { %vm719_vm5 = vcmp.lt.s32.totalorder %v3419_v17, 16  ;;  %v654_v63 = vsel %vm648_vm15, %v5686_v20, %v638_v52  ;;  %v660_v25 = vsel %vm648_vm15, %v5687_v23, %v644_v2  ;;  %v438_v27 = vsel %vm426_vm3, %v5623_v55, 0.0 }
 0x148   :  { %v448_v54 = vsel %vm442_vm4, %v5624_v28, %v432_v6  ;;  %v670_v30 = vsel %vm664_vm0, %v5654_v0, %v654_v63  ;;  %v676_v46 = vsel %vm664_vm0, %v5655_v47, %v660_v25  ;;  %v454_v32 = vsel %vm442_vm4, %v5625_v58, %v438_v27 }
 0x149   :  { %vm458_vm6 = vcmp.eq.s32.totalorder %v5690_v15, 2  ;;  %v393_v8 = vmul.f32 %v2349_v3, %v3283_v62  ;;  %v692_v55 = vsel %vm680_vm14, %v5656_v49, %v676_v46  ;;  %v2314_v34 = vtrunc.f32 %v3423_v39 }
 0x14a   :  { %v464_v28 = vsel %vm458_vm6, %v5664_v53, %v448_v54  ;;  %v470_v7 = vsel %vm458_vm6, %v5665_v41, %v454_v32  ;;  %v696_v56 = vmul.f32 %v692_v55, %v5691_v60  ;;  %vm474_vm8 = vcmp.eq.s32.totalorder %v5690_v15, 3 }
 0x14b   :  { %vm490_vm9 = vcmp.eq.s32.totalorder %v5690_v15, 4  ;;  %v686_v62 = vsel %vm680_vm14, %v5658_v9, %v670_v30  ;;  %vm1420_vm10 = vcmp.eq.s32.totalorder %v3595_v18, %v5644_v59  ;;  %v480_v58 = vsel %vm474_vm8, %v5666_v43, %v464_v28 }
 0x14c   :  { %v486_v53 = vsel %vm474_vm8, %v5667_v10, %v470_v7  ;;  %v3632_v41 = vadd.f32 %v696_v56, %v686_v62  ;;  %v496_v35 = vsel %vm490_vm9, %v5668_v12, %v480_v58  ;;  %vm506_vm12 = vcmp.eq.s32.totalorder %v5690_v15, 5 }
 0x14d   :  { %v502_v13 = vsel %vm490_vm9, %v5669_v14, %v486_v53  ;;  %v397_v3 = vsub.f32 1.0, %v393_v8  ;;  %v512_v52 = vsel %vm506_vm12, %v5670_v11, %v496_v35  ;;  %vm522_vm13 = vcmp.eq.s32.totalorder %v5690_v15, 6 }
 0x14e   :  { %v518_v50 = vsel %vm506_vm12, %v5671_v16, %v502_v13  ;;  %v1426_v43 = vsel %vm1420_vm10, %v3632_v41, 0.0  ;;  %v528_v10 = vsel %vm522_vm13, %v5673_v19, %v512_v52  ;;  %vm538_vm1 = vcmp.eq.s32.totalorder %v5690_v15, 7 }
 0x14f   :  { %v534_v12 = vsel %vm522_vm13, %v5674_v61, %v518_v50  ;;  %v1432_v14 = vsel %vm5440_vm11, %v1426_v43, 0.0  ;;  %v544_v2 = vsel %vm538_vm1, %v5675_v21, %v528_v10  ;;  %vm554_vm15 = vcmp.eq.s32.totalorder %v5690_v15, 8 }
 0x150   :  { %v550_v11 = vsel %vm538_vm1, %v5676_v22, %v534_v12  ;;  %v3654_v16 = vsel %vm721_vm2, %v3415_v4, 16  ;;  %1433 = vadd.xlane.f32.xlu0 %v1432_v14  ;;  %v560_v19 = vsel %vm554_vm15, %v5677_v26, %v544_v2  ;;  %vm570_vm0 = vcmp.eq.s32.totalorder %v5690_v15, 9 }
 0x151   :  { %v566_v61 = vsel %vm554_vm15, %v5678_v29, %v550_v11  ;;  %v3659_v6 = vmul.f32 16.0, %v397_v3  ;;  %v576_v21 = vsel %vm570_vm0, %v5679_v1, %v560_v19  ;;  %vm586_vm14 = vcmp.eq.s32.totalorder %v5690_v15, 10 }
 0x152   :  { %v582_v22 = vsel %vm570_vm0, %v5680_v31, %v566_v61  ;;  %v3667_v63 = vsel %vm719_vm5, %v3419_v17, 16  ;;  %v592_v25 = vsel %vm586_vm14, %v5681_v33, %v576_v21  ;;  %vm602_vm2 = vcmp.eq.s32.totalorder %v5690_v15, 11 }
 0x153   :  { %v598_v26 = vsel %vm586_vm14, %v5682_v42, %v582_v22  ;;  %v3676_v29 = vcvt.f32.s32 %v2314_v34  ;;  %v608_v1 = vsel %vm602_vm2, %v5646_v40, %v592_v25  ;;  %vm618_vm3 = vcmp.eq.s32.totalorder %v5690_v15, 12 }
 0x154   :  { %v614_v31 = vsel %vm602_vm2, %v5684_v57, %v598_v26  ;;  %v624_v33 = vsel %vm618_vm3, %v5648_v51, %v608_v1  ;;  %vm634_vm4 = vcmp.eq.s32.totalorder %v5690_v15, 13  ;;  %v712_v27 = vcvt.s32.f32 %v3415_v4 }
 0x155   :  { %v630_v42 = vsel %vm618_vm3, %v5649_v44, %v614_v31  ;;  %v2312_v40 = vtrunc.f32 %v3659_v6  ;;  %v640_v57 = vsel %vm634_vm4, %v5685_v48, %v624_v33  ;;  %vm650_vm5 = vcmp.eq.s32.totalorder %v5690_v15, 14 }
 0x156   :  { %v646_v54 = vsel %vm634_vm4, %v5651_v38, %v630_v42  ;;  %v656_v51 = vsel %vm650_vm5, %v5686_v20, %v640_v57  ;;  %vm666_vm6 = vcmp.eq.s32.totalorder %v5690_v15, 15  ;;  %vm682_vm8 = vcmp.eq.s32.totalorder %v5690_v15, 16 }
 0x157   :  { %v662_v44 = vsel %vm650_vm5, %v5687_v23, %v646_v54  ;;  %v672_v38 = vsel %vm666_vm6, %v5654_v0, %v656_v51  ;;  %vm728_vm9 = vcmp.eq.s32.totalorder %v3654_v16, 0  ;;  %vm744_vm12 = vcmp.eq.s32.totalorder %v3654_v16, 1 }
 0x158   :  { %v678_v4 = vsel %vm666_vm6, %v5655_v47, %v662_v44  ;;  %v3721_v20 = vsub.f32 %v3299_v5, %v712_v27  ;;  %vm760_vm13 = vcmp.eq.s32.totalorder %v3654_v16, 2  ;;  %vm5426_vm1 = vcmp.eq.s32.totalorder %v3654_v16, 3  ;;  %v5692_v47 = vld [vmem:[#allocation26_spill] sm:$0xff] }
 0x159   :  { %v694_v48 = vsel %vm682_vm8, %v5656_v49, %v678_v4  ;;  %vm5424_vm15 = vcmp.eq.s32.totalorder %v3654_v16, 4  ;;  %vm5425_vm0 = vcmp.eq.s32.totalorder %v3654_v16, 5  ;;  %vm5437_vm14 = vcmp.eq.s32.totalorder %v3654_v16, 6 }
 0x15a   :  { %v698_v0 = vmul.f32 %v694_v48, %v5692_v47  ;;  %v688_v5 = vsel %vm682_vm8, %v5658_v9, %v672_v38  ;;  %vm5436_vm2 = vcmp.eq.s32.totalorder %v3654_v16, 7  ;;  %v3740_v49 = vstv %s3672_s5  ;;  %s3879_s5 = sld [smem:[#allocation8 + $0x30f]] }
 0x15b   :  { %v3743_v23 = vstv %s3674_s7  ;;  %vm5435_vm3 = vcmp.eq.s32.totalorder %v3654_v16, 8  ;;  %v1676_v9 = vsel %vm728_vm9, %v3740_v49, 0.0  ;;  %v3759_v46 = vstv %s3681_s8  ;;  %s3881_s7 = sld [smem:[#allocation7 + $0x310]] }
 0x15c   :  { %v3749_v30 = vadd.f32 %v698_v0, %v688_v5  ;;  %v1682_v15 = vsel %vm728_vm9, %v3743_v23, 0.0  ;;  %vm5434_vm4 = vcmp.eq.s32.totalorder %v3654_v16, 9  ;;  %v1688_v32 = vsel %vm744_vm12, %v3759_v46, %v1676_v9  ;;  %s3897_s8 = sld [smem:[#allocation8 + $0x310]] }
 0x15d   :  { %v3770_v8 = vstv %s3683_s9  ;;  %v3773_v55 = vstv %s3689_s10  ;;  %v3776_v28 = vstv %s3691_s11  ;;  %vm5433_vm5 = vcmp.eq.s32.totalorder %v3654_v16, 10  ;;  %s3999_s9 = sld [smem:[#allocation7 + $0x80]]  ;;  %s4014_s11 = sld [smem:[#allocation7 + $0x81]] }
 0x15e   :  { %5693 = vst [vmem:[#allocation48_spill] sm:$0xff] %v3749_v30  ;;  %5694 = vst [vmem:[#allocation30_spill] sm:$0xff] %v3776_v28  ;;  %v1428_v7 = vsel %vm1420_vm10, %v3749_v30, 0.0  ;;  %v1694_v34 = vsel %vm744_vm12, %v3770_v8, %v1682_v15  ;;  %v1700_v60 = vsel %vm760_vm13, %v3773_v55, %v1688_v32  ;;  %v3794_v56 = vstv %s3697_s12  ;;  %s4012_s10 = sld [smem:[#allocation8 + $0x80]]  ;;  %s4021_s12 = sld [smem:[#allocation8 + $0x81]] }
 0x15f   :  { %5695 = vst [vmem:[#allocation17_spill] sm:$0xff] %v3794_v56  ;;  %v1438_v18 = vsel %vm5440_vm11, %v1428_v7, 0.0  ;;  %vm5432_vm10 = vcmp.eq.s32.totalorder %v3654_v16, 11  ;;  %v1706_v62 = vsel %vm760_vm13, %v3776_v28, %v1694_v34  ;;  %v1712_v58 = vsel %vm5426_vm1, %v3794_v56, %v1700_v60 }
 0x160   :  { %v3809_v53 = vstv %s3699_s0  ;;  %1439 = vadd.xlane.f32.xlu0 %v1438_v18  ;;  %vm5431_vm6 = vcmp.eq.s32.totalorder %v3654_v16, 12  ;;  %v3820_v13 = vstv %s3705_s14  ;;  %v3823_v3 = vstv %s3707_s15  ;;  %s4027_s0 = sld [smem:[#allocation7 + $0x82]]  ;;  %s4044_s15 = sld [smem:[#allocation7 + $0x83]] }
 0x161   :  { %5696 = vst [vmem:[#allocation65_spill] sm:$0xff] %v3809_v53  ;;  %v1718_v35 = vsel %vm5426_vm1, %v3809_v53, %v1706_v62  ;;  %5697 = vst [vmem:[#allocation57_spill] sm:$0xff] %v3820_v13  ;;  %v3826_v52 = vstv %s3713_s16  ;;  %vm5430_vm8 = vcmp.eq.s32.totalorder %v3654_v16, 13  ;;  %v1724_v50 = vsel %vm5424_vm15, %v3820_v13, %v1712_v58  ;;  %s4034_s14 = sld [smem:[#allocation8 + $0x82]]  ;;  %s4066_s16 = sld [smem:[#allocation8 + $0x83]] }
 0x162   :  { %5698 = vst [vmem:[#allocation74_spill] sm:$0xff] %v3823_v3  ;;  %5699 = vst [vmem:[#allocation33_spill] sm:$0xff] %v3826_v52  ;;  %v1730_v43 = vsel %vm5424_vm15, %v3823_v3, %v1718_v35  ;;  %v3840_v10 = vstv %s3715_s2  ;;  %v3843_v12 = vstv %s3725_s17  ;;  %vm5429_vm7 = vcmp.eq.s32.totalorder %v3654_v16, 14  ;;  %s4068_s2 = sld [smem:[#allocation7 + $0x84]] }
 0x163   :  { %5700 = vst [vmem:[#allocation34_spill] sm:$0xff] %v3840_v10  ;;  %5701 = vst [vmem:[#allocation35_spill] sm:$0xff] %v3843_v12  ;;  %v1736_v14 = vsel %vm5425_vm0, %v3826_v52, %v1724_v50  ;;  %v1742_v2 = vsel %vm5425_vm0, %v3840_v10, %v1730_v43  ;;  %v3857_v11 = vstv %s3727_s4  ;;  %v3860_v19 = vstv %s3733_s3  ;;  %s4094_s17 = sld [smem:[#allocation8 + $0x84]]  ;;  %s4096_s4 = sld [smem:[#allocation7 + $0x85]] }
 0x164   :  { %5702 = vst [vmem:[#allocation36_spill] sm:$0xff] %v3857_v11  ;;  %5703 = vst [vmem:[#allocation14_spill] sm:$0xff] %v3860_v19  ;;  %vm5427_vm15 = vcmp.eq.s32.totalorder %v3654_v16, 15  ;;  %v1748_v61 = vsel %vm5437_vm14, %v3843_v12, %v1736_v14  ;;  %v1754_v21 = vsel %vm5437_vm14, %v3857_v11, %v1742_v2  ;;  %v3874_v22 = vstv %s3745_s18  ;;  %s4136_s3 = sld [smem:[#allocation8 + $0x85]]  ;;  %s4138_s18 = sld [smem:[#allocation7 + $0x86]] }
 0x165   :  { %5704 = vst [vmem:[#allocation56_spill] sm:$0xff] %v3874_v22  ;;  %v3877_v25 = vstv %s3747_s13  ;;  %vm725_vm0 = vcmp.lt.s32.totalorder %v3676_v29, 16  ;;  %vm5428_vm1 = vcmp.eq.s32.totalorder %v3654_v16, 16  ;;  %v1760_v26 = vsel %vm5436_vm2, %v3860_v19, %v1748_v61  ;;  %s4152_s13 = sld [smem:[#allocation8 + $0x86]] }
 0x166   :  { %5705 = vst [vmem:[#allocation59_spill] sm:$0xff] %v3877_v25  ;;  %v1766_v1 = vsel %vm5436_vm2, %v3874_v22, %v1754_v21  ;;  %v3892_v31 = vstv %s3761_s19  ;;  %v3895_v33 = vstv %s3763_s1  ;;  %v1772_v42 = vsel %vm5435_vm3, %v3877_v25, %v1760_v26  ;;  %s4166_s19 = sld [smem:[#allocation7 + $0x87]] }
 0x167   :  { %5706 = vst [vmem:[#allocation60_spill] sm:$0xff] %v3892_v31  ;;  %5707 = vst [vmem:[#allocation62_spill] sm:$0xff] %v3895_v33  ;;  %v1778_v27 = vsel %vm5435_vm3, %v3892_v31, %v1766_v1  ;;  %v3906_v57 = vstv %s3778_s21  ;;  %v3909_v54 = vstv %s3780_s20  ;;  %v1784_v51 = vsel %vm5434_vm4, %v3895_v33, %v1772_v42  ;;  %s4168_s1 = sld [smem:[#allocation8 + $0x87]]  ;;  %s4182_s21 = sld [smem:[#allocation7 + $0x88]] }
 0x168   :  { %5708 = vst [vmem:[#allocation66_spill] sm:$0xff] %v3906_v57  ;;  %5709 = vst [vmem:[#allocation67_spill] sm:$0xff] %v3909_v54  ;;  %v1790_v44 = vsel %vm5434_vm4, %v3906_v57, %v1778_v27  ;;  %v3918_v38 = vstv %s3796_s24  ;;  %v3921_v4 = vstv %s3798_s6  ;;  %v1796_v48 = vsel %vm5433_vm5, %v3909_v54, %v1784_v51  ;;  %s4184_s20 = sld [smem:[#allocation8 + $0x88]]  ;;  %s4198_s24 = sld [smem:[#allocation7 + $0x89]] }
 0x169   :  { %5710 = vst [vmem:[#allocation69_spill] sm:$0xff] %v3918_v38  ;;  %5711 = vst [vmem:[#allocation73_spill] sm:$0xff] %v3921_v4  ;;  %v1802_v47 = vsel %vm5433_vm5, %v3918_v38, %v1790_v44  ;;  %v3930_v0 = vstv %s3811_s22  ;;  %v3933_v5 = vstv %s3813_s23  ;;  %v1808_v9 = vsel %vm5432_vm10, %v3921_v4, %v1796_v48  ;;  %s4200_s6 = sld [smem:[#allocation8 + $0x89]]  ;;  %s4214_s22 = sld [smem:[#allocation7 + $0x8a]] }
 0x16a   :  { %5712 = vst [vmem:[#allocation68_spill] sm:$0xff] %v3930_v0  ;;  %5713 = vst [vmem:[#allocation72_spill] sm:$0xff] %v3933_v5  ;;  %v1814_v15 = vsel %vm5432_vm10, %v3930_v0, %v1802_v47  ;;  %v3942_v32 = vstv %s3828_s25  ;;  %v3945_v7 = vstv %s3830_s26  ;;  %v1820_v34 = vsel %vm5431_vm6, %v3933_v5, %v1808_v9  ;;  %s4216_s23 = sld [smem:[#allocation8 + $0x8a]]  ;;  %s4232_s25 = sld [smem:[#allocation7 + $0x8b]] }
 0x16b   :  { %5714 = vst [vmem:[#allocation31_spill] sm:$0xff] %v3942_v32  ;;  %5715 = vst [vmem:[#allocation37_spill] sm:$0xff] %v3945_v7  ;;  %v1826_v60 = vsel %vm5431_vm6, %v3942_v32, %v1814_v15  ;;  %v3954_v18 = vstv %s3845_s27  ;;  %v3957_v62 = vstv %s3847_s28  ;;  %v1832_v58 = vsel %vm5430_vm8, %v3945_v7, %v1820_v34  ;;  %s4246_s26 = sld [smem:[#allocation8 + $0x8b]]  ;;  %s4248_s27 = sld [smem:[#allocation7 + $0x8c]] }
 0x16c   :  { %5716 = vst [vmem:[#allocation38_spill] sm:$0xff] %v3954_v18  ;;  %5717 = vst [vmem:[#allocation39_spill] sm:$0xff] %v3957_v62  ;;  %v1838_v35 = vsel %vm5430_vm8, %v3954_v18, %v1826_v60  ;;  %v3966_v50 = vstv %s3862_s29  ;;  %v3969_v43 = vstv %s3864_s30  ;;  %v1844_v14 = vsel %vm5429_vm7, %v3957_v62, %v1832_v58  ;;  %s4262_s28 = sld [smem:[#allocation8 + $0x8c]]  ;;  %s4264_s29 = sld [smem:[#allocation7 + $0x8d]] }
 0x16d   :  { %5718 = vst [vmem:[#allocation40_spill] sm:$0xff] %v3966_v50  ;;  %5719 = vst [vmem:[#allocation41_spill] sm:$0xff] %v3969_v43  ;;  %v1850_v2 = vsel %vm5429_vm7, %v3966_v50, %v1838_v35  ;;  %v3978_v61 = vstv %s3879_s5  ;;  %v3981_v21 = vstv %s3881_s7  ;;  %v1856_v26 = vsel %vm5427_vm15, %v3969_v43, %v1844_v14  ;;  %s4278_s30 = sld [smem:[#allocation8 + $0x8d]]  ;;  %s4280_s5 = sld [smem:[#allocation7 + $0x8e]] }
 0x16e   :  { %5720 = vst [vmem:[#allocation42_spill] sm:$0xff] %v3978_v61  ;;  %5721 = vst [vmem:[#allocation43_spill] sm:$0xff] %v3981_v21  ;;  %v1862_v1 = vsel %vm5427_vm15, %v3978_v61, %v1850_v2  ;;  %v3990_v42 = vstv %s3897_s8  ;;  %v711_v27 = vcvt.s32.f32 %v3419_v17  ;;  %v1868_v51 = vsel %vm5428_vm1, %v3981_v21, %v1856_v26  ;;  %s4292_s7 = sld [smem:[#allocation8 + $0x8e]]  ;;  %s4306_s8 = sld [smem:[#allocation7 + $0x8f]] }
 0x16f   :  { %5722 = vst [vmem:[#allocation44_spill] sm:$0xff] %v3990_v42  ;;  %v1874_v44 = vsel %vm5428_vm1, %v3990_v42, %v1862_v1  ;;  %v4005_v47 = vsel %vm725_vm0, %v3676_v29, 16  ;;  %v4009_v17 = vcvt.f32.s32 %v2312_v40  ;;  %vm727_vm15 = vcmp.eq.s32.totalorder %v3667_v63, 0 }
 0x170   :  { %v1878_v48 = vmul.f32 %v1874_v44, %v3721_v20  ;;  %v4017_v15 = vsub.f32 %v3301_v37, %v711_v27  ;;  %vm5438_vm1 = vcmp.eq.s32.totalorder %v3667_v63, 1  ;;  %vm5439_vm7 = vcmp.eq.s32.totalorder %v3667_v63, 2 }
 0x171   :  { %vm775_vm0 = vcmp.eq.s32.totalorder %v3667_v63, 3  ;;  %vm5441_vm8 = vcmp.eq.s32.totalorder %v3667_v63, 4  ;;  %vm807_vm6 = vcmp.eq.s32.totalorder %v3667_v63, 5  ;;  %vm823_vm10 = vcmp.eq.s32.totalorder %v3667_v63, 6 }
 0x172   :  { %v1882_v9 = vadd.f32 %v1878_v48, %v1868_v51  ;;  %vm839_vm5 = vcmp.eq.s32.totalorder %v3667_v63, 7  ;;  %vm855_vm4 = vcmp.eq.s32.totalorder %v3667_v63, 8  ;;  %v1675_v37 = vsel %vm727_vm15, %v3740_v49, 0.0 }
 0x173   :  { %vm5443_vm3 = vcmp.eq.s32.totalorder %v3667_v63, 9  ;;  %v1681_v34 = vsel %vm727_vm15, %v3743_v23, 0.0  ;;  %v1687_v60 = vsel %vm5438_vm1, %v3759_v46, %v1675_v37  ;;  %vm903_vm14 = vcmp.eq.s32.totalorder %v3667_v63, 11 }
 0x174   :  { %v2263_v40 = vadd.f32 -0.5, %v1882_v9  ;;  %v1693_v35 = vsel %vm5438_vm1, %v3770_v8, %v1681_v34  ;;  %v1699_v14 = vsel %vm5439_vm7, %v3773_v55, %v1687_v60  ;;  %vm919_vm2 = vcmp.eq.s32.totalorder %v3667_v63, 12 }
 0x175   :  { %v1705_v2 = vsel %vm5439_vm7, %v3776_v28, %v1693_v35  ;;  %v1711_v26 = vsel %vm775_vm0, %v3794_v56, %v1699_v14  ;;  %v4061_v1 = vadd.s32 4294967288, %v5644_v59  ;;  %v4064_v27 = vstv %s3999_s9  ;;  %s4308_s9 = sld [smem:[#allocation8 + $0x8f]] }
 0x176   :  { %v1890_v58 = vand.u32 2147483647, %v2263_v40  ;;  %vm935_vm1 = vcmp.eq.s32.totalorder %v3667_v63, 13  ;;  %v1717_v44 = vsel %vm775_vm0, %v3809_v53, %v1705_v2  ;;  %v1723_v48 = vsel %vm5441_vm8, %v3820_v13, %v1711_v26 }
 0x177   :  { %v734_v9 = vsel %vm728_vm9, %v4064_v27, 0.0  ;;  %vm951_vm7 = vcmp.eq.s32.totalorder %v3667_v63, 14  ;;  %v1729_v40 = vsel %vm5441_vm8, %v3823_v3, %v1717_v44  ;;  %v1735_v37 = vsel %vm807_vm6, %v3826_v52, %v1723_v48 }
 0x178   :  { %v1901_v51 = vsel %vm5440_vm11, %v1890_v58, 0.0  ;;  %v4089_v34 = vstv %s4012_s10  ;;  %v4092_v60 = vstv %s4014_s11  ;;  %vm5487_vm11 = vcmp.eq.s32.totalorder %v3667_v63, 15  ;;  %s4319_s10 = sld [smem:[#allocation7 + $0x90]] }
 0x179   :  { %1902 = vadd.xlane.f32.xlu0 %v1901_v51  ;;  %v1741_v58 = vsel %vm807_vm6, %v3840_v10, %v1729_v40  ;;  %v1747_v35 = vsel %vm823_vm10, %v3843_v12, %v1735_v37  ;;  %v740_v14 = vsel %vm728_vm9, %v4089_v34, 0.0  ;;  %v750_v2 = vsel %vm744_vm12, %v4092_v60, %v734_v9  ;;  %s4321_s11 = sld [smem:[#allocation8 + $0x90]] }
 0x17a   :  { %vm5472_vm8 = vcmp.eq.s32.totalorder %v3667_v63, 16  ;;  %v1753_v26 = vsel %vm823_vm10, %v3857_v11, %v1741_v58  ;;  %v1759_v51 = vsel %vm839_vm5, %v3860_v19, %v1747_v35  ;;  %v4119_v44 = vstv %s4021_s12  ;;  %s2194_s12 = sld [smem:[#allocation8 + $0x280]] }
 0x17b   :  { %v4122_v48 = vstv %s4027_s0  ;;  %v1765_v40 = vsel %vm839_vm5, %v3874_v22, %v1753_v26  ;;  %v1771_v9 = vsel %vm855_vm4, %v3877_v25, %v1759_v51  ;;  %v756_v37 = vsel %vm744_vm12, %v4119_v44, %v740_v14  ;;  %s2196_s0 = sld [smem:[#allocation8 + $0x281]] }
 0x17c   :  { %v766_v58 = vsel %vm760_vm13, %v4122_v48, %v750_v2  ;;  %v1777_v35 = vsel %vm855_vm4, %v3892_v31, %v1765_v40  ;;  %v1783_v26 = vsel %vm5443_vm3, %v3895_v33, %v1771_v9  ;;  %v4147_v51 = vstv %s4034_s14  ;;  %s2193_s14 = sld [smem:[#allocation7 + $0x280]] }
 0x17d   :  { %v4150_v14 = vstv %s4044_s15  ;;  %v1789_v2 = vsel %vm5443_vm3, %v3906_v57, %v1777_v35  ;;  %vm5723_vm9 = vcmp.eq.s32.totalorder %v3667_v63, 10  ;;  %v772_v40 = vsel %vm760_vm13, %v4147_v51, %v756_v37  ;;  %s2198_s15 = sld [smem:[#allocation8 + $0x282]] }
 0x17e   :  { %v1795_v30 = vsel %vm5723_vm9, %v3909_v54, %v1783_v26  ;;  %vm5724_vm12 = vcmp.eq.s32.totalorder %v3654_v16, 3  ;;  %vm5725_vm3 = vmmov %vm5723_vm9  ;;  %v4177_v24 = vstv %s4066_s16  ;;  %v4180_v37 = vstv %s4068_s2  ;;  %s2195_s16 = sld [smem:[#allocation7 + $0x281]]  ;;  %s2200_s2 = sld [smem:[#allocation8 + $0x283]] }
 0x17f   :  { %v782_v9 = vsel %vm5724_vm12, %v4150_v14, %v766_v58  ;;  %v1801_v35 = vsel %vm5725_vm3, %v3918_v38, %v1789_v2  ;;  %v1807_v26 = vsel %vm903_vm14, %v3921_v4, %v1795_v30  ;;  %vm5726_vm13 = vmmov %vm5724_vm12  ;;  %vm5727_vm3 = vcmp.eq.s32.totalorder %v3654_v16, 4 }
 0x180   :  { %v1813_v58 = vsel %vm903_vm14, %v3930_v0, %v1801_v35  ;;  %v1819_v2 = vsel %vm919_vm2, %v3933_v5, %v1807_v26  ;;  %v788_v30 = vsel %vm5726_vm13, %v4177_v24, %v772_v40  ;;  %v798_v4 = vsel %vm5727_vm3, %v4180_v37, %v782_v9  ;;  %vm5729_vm9 = vmmov %vm5727_vm3 }
 0x181   :  { %v1825_v35 = vsel %vm919_vm2, %v3942_v32, %v1813_v58  ;;  %v1831_v26 = vsel %vm935_vm1, %v3945_v7, %v1819_v2  ;;  %v4209_v5 = vstv %s4094_s17  ;;  %v4212_v0 = vstv %s4096_s4  ;;  %s2197_s17 = sld [smem:[#allocation7 + $0x282]]  ;;  %s2202_s4 = sld [smem:[#allocation8 + $0x284]] }
 0x182   :  { %v1837_v40 = vsel %vm935_vm1, %v3954_v18, %v1825_v35  ;;  %v1843_v9 = vsel %vm951_vm7, %v3957_v62, %v1831_v26  ;;  %v4226_v58 = vsub.s32 %v5644_v59, %v5645_v45  ;;  %v4230_v2 = vsub.s32 %v4061_v1, %v5645_v45 }
 0x183   :  { %v1849_v7 = vsel %vm951_vm7, %v3966_v50, %v1837_v40  ;;  %v1855_v35 = vsel %vm5487_vm11, %v3969_v43, %v1843_v9  ;;  %v804_v26 = vsel %vm5729_vm9, %v4209_v5, %v788_v30  ;;  %vm5730_vm12 = vcmp.eq.s32.totalorder %v3654_v16, 5 }
 0x184   :  { %5728 = vst [vmem:[#allocation32_spill] sm:$0xff] %v4230_v2  ;;  %v814_v45 = vsel %vm5730_vm12, %v4212_v0, %v798_v4  ;;  %v1861_v1 = vsel %vm5487_vm11, %v3978_v61, %v1849_v7  ;;  %v1867_v40 = vsel %vm5472_vm8, %v3981_v21, %v1855_v35  ;;  %v4257_v9 = vstv %s4136_s3  ;;  %vm5731_vm13 = vmmov %vm5730_vm12  ;;  %s2199_s3 = sld [smem:[#allocation7 + $0x283]] }
 0x185   :  { %v4260_v30 = vstv %s4138_s18  ;;  %v1873_v4 = vsel %vm5472_vm8, %v3990_v42, %v1861_v1  ;;  %v820_v7 = vsel %vm5731_vm13, %v4257_v9, %v804_v26  ;;  %vm5732_vm3 = vcmp.eq.s32.totalorder %v3654_v16, 6  ;;  %s2204_s18 = sld [smem:[#allocation8 + $0x285]] }
 0x186   :  { %v830_v35 = vsel %vm5732_vm3, %v4260_v30, %v814_v45  ;;  %v4276_v59 = vstv %s4152_s13  ;;  %v1877_v21 = vmul.f32 %v1873_v4, %v4017_v15  ;;  %vm5733_vm9 = vmmov %vm5732_vm3  ;;  %v4287_v43 = vstv %s4166_s19  ;;  %s2201_s13 = sld [smem:[#allocation7 + $0x284]]  ;;  %s2206_s19 = sld [smem:[#allocation8 + $0x286]] }
 0x187   :  { %v836_v1 = vsel %vm5733_vm9, %v4276_v59, %v820_v7  ;;  %v4290_v26 = vstv %s4168_s1  ;;  %vm5734_vm12 = vcmp.eq.s32.totalorder %v3654_v16, 7  ;;  %v4301_v42 = vstv %s4182_s21  ;;  %s2203_s1 = sld [smem:[#allocation7 + $0x285]]  ;;  %s2208_s21 = sld [smem:[#allocation8 + $0x287]] }
 0x188   :  { %v846_v45 = vsel %vm5734_vm12, %v4287_v43, %v830_v35  ;;  %vm5735_vm13 = vmmov %vm5734_vm12  ;;  %v4304_v7 = vstv %s4184_s20  ;;  %v1881_v62 = vadd.f32 %v1877_v21, %v1867_v40  ;;  %vm5736_vm3 = vcmp.eq.s32.totalorder %v3654_v16, 8  ;;  %s2205_s20 = sld [smem:[#allocation7 + $0x286]] }
 0x189   :  { %v852_v4 = vsel %vm5735_vm13, %v4290_v26, %v836_v1  ;;  %v862_v61 = vsel %vm5736_vm3, %v4301_v42, %v846_v45  ;;  %vm5737_vm9 = vmmov %vm5736_vm3  ;;  %v4317_v1 = vstv %s4198_s24  ;;  %vm5738_vm12 = vcmp.eq.s32.totalorder %v3654_v16, 9  ;;  %s2210_s24 = sld [smem:[#allocation8 + $0x288]] }
 0x18a   :  { %v868_v35 = vsel %vm5737_vm9, %v4304_v7, %v852_v4  ;;  %v878_v21 = vsel %vm5738_vm12, %v4317_v1, %v862_v61  ;;  %v4327_v40 = vstv %s4200_s6  ;;  %v4330_v45 = vstv %s4214_s22  ;;  %vm5739_vm3 = vmmov %vm5738_vm12  ;;  %s2207_s6 = sld [smem:[#allocation7 + $0x287]]  ;;  %s2212_s22 = sld [smem:[#allocation8 + $0x289]] }
 0x18b   :  { %v4333_v50 = vstv %s4216_s23  ;;  %v2262_v4 = vadd.f32 -0.5, %v1881_v62  ;;  %vm5508_vm13 = vcmask 130112   ;;  %v884_v18 = vsel %vm5739_vm3, %v4327_v40, %v868_v35  ;;  %s2209_s23 = sld [smem:[#allocation7 + $0x288]] }
 0x18c   :  { %vm5740_vm9 = vcmp.eq.s32.totalorder %v3654_v16, 10  ;;  %v4342_v32 = vstv %s4232_s25  ;;  %vm5742_vm8 = vcmp.eq.s32.totalorder %v3654_v16, 11  ;;  %v4351_v54 = vstv %s4246_s26  ;;  %s2214_s25 = sld [smem:[#allocation8 + $0x28a]]  ;;  %s2211_s26 = sld [smem:[#allocation7 + $0x289]] }
 0x18d   :  { %v894_v61 = vsel %vm5740_vm9, %v4330_v45, %v878_v21  ;;  %vm5741_vm12 = vmmov %vm5740_vm9  ;;  %v4354_v57 = vstv %s4248_s27  ;;  %v1889_v35 = vand.u32 2147483647, %v2262_v4  ;;  %vm5744_vm9 = vcmp.eq.s32.totalorder %v3654_v16, 12  ;;  %s2216_s27 = sld [smem:[#allocation8 + $0x28b]] }
 0x18e   :  { %v900_v38 = vsel %vm5741_vm12, %v4333_v50, %v884_v18  ;;  %v910_v62 = vsel %vm5742_vm8, %v4342_v32, %v894_v61  ;;  %vm5743_vm3 = vmmov %vm5742_vm8  ;;  %v4363_v18 = vstv %s4262_s28  ;;  %v4369_v31 = vstv %s4264_s29  ;;  %v4425_v3 = vpop.xlane.xlu1 %1347  ;;  %s2213_s28 = sld [smem:[#allocation7 + $0x28a]]  ;;  %s2218_s29 = sld [smem:[#allocation8 + $0x28c]] }
 0x18f   :  { %v916_v21 = vsel %vm5743_vm3, %v4351_v54, %v900_v38  ;;  %v926_v33 = vsel %vm5744_vm9, %v4354_v57, %v910_v62  ;;  %vm5745_vm8 = vmmov %vm5744_vm9  ;;  %v4372_v4 = vstv %s4278_s30  ;;  %v4375_v25 = vstv %s4280_s5  ;;  %s2215_s30 = sld [smem:[#allocation7 + $0x28b]]  ;;  %s2220_s5 = sld [smem:[#allocation8 + $0x28d]] }
 0x190   :  { %v932_v61 = vsel %vm5745_vm8, %v4363_v18, %v916_v21  ;;  %vm5746_vm12 = vcmask 80896   ;;  %vm5747_vm3 = vcmp.eq.s32.totalorder %v3654_v16, 13  ;;  %v4385_v19 = vstv %s4292_s7  ;;  %s2217_s7 = sld [smem:[#allocation7 + $0x28c]] }
 0x191   :  { %v1898_v38 = vsel %vm5746_vm12, %v1889_v35, 0.0  ;;  %v942_v62 = vsel %vm5747_vm3, %v4369_v31, %v926_v33  ;;  %vm5748_vm9 = vmmov %vm5747_vm3  ;;  %vm5749_vm8 = vcmp.eq.s32.totalorder %v3654_v16, 14  ;;  %v4394_v35 = vstv %s4306_s8  ;;  %v4399_v33 = vpop.xlane.xlu0 %1343  ;;  %s2222_s8 = sld [smem:[#allocation8 + $0x28e]] }
 0x192   :  { %v948_v22 = vsel %vm5748_vm9, %v4372_v4, %v932_v61  ;;  %1899 = vadd.xlane.f32.xlu1 %v1898_v38  ;;  %v958_v21 = vsel %vm5749_vm8, %v4375_v25, %v942_v62  ;;  %vm5750_vm11 = vmmov %vm5749_vm8  ;;  %v4397_v12 = vstv %s4308_s9  ;;  %vm5751_vm12 = vcmp.eq.s32.totalorder %v3654_v16, 15  ;;  %s2219_s9 = sld [smem:[#allocation7 + $0x28d]] }
 0x193   :  { %v964_v11 = vsel %vm5750_vm11, %v4385_v19, %v948_v22  ;;  %v974_v61 = vsel %vm5751_vm12, %v4394_v35, %v958_v21  ;;  %vm5752_vm3 = vmmov %vm5751_vm12  ;;  %v4408_v10 = vstv %s4319_s10  ;;  %v4411_v62 = vstv %s4321_s11  ;;  %s2224_s10 = sld [smem:[#allocation8 + $0x28f]]  ;;  %s2221_s11 = sld [smem:[#allocation7 + $0x28e]] }
 0x194   :  { %v980_v38 = vsel %vm5752_vm3, %v4397_v12, %v964_v11  ;;  %vm5753_vm11 = vcmp.eq.s32.totalorder %v3654_v16, 16  ;;  %v733_v21 = vsel %vm727_vm15, %v4064_v27, 0.0  ;;  %v739_v11 = vsel %vm727_vm15, %v4089_v34, 0.0 }
 0x195   :  { %v990_v22 = vsel %vm5753_vm11, %v4408_v10, %v974_v61  ;;  %vm5754_vm9 = vmmov %vm5753_vm11  ;;  %vm5755_vm8 = vcmp.eq.s32.totalorder %v3667_v63, 1  ;;  %vm730_vm3 = vcmp.eq.s32.totalorder %v4005_v47, 0  ;;  %v1369_v53 = vrot.slane %v4425_v3, %v4230_v2 }
 0x196   :  { %v996_v52 = vsel %vm5754_vm9, %v4411_v62, %v980_v38  ;;  %v749_v61 = vsel %vm5755_vm8, %v4092_v60, %v733_v21  ;;  %vm5756_vm12 = vmmov %vm5755_vm8  ;;  %v1364_v38 = vrot.slane %v4399_v33, %v4226_v58  ;;  %vm5757_vm15 = vcmp.eq.s32.totalorder %v3667_v63, 2 }
 0x197   :  { %v1000_v13 = vmul.f32 %v996_v52, %v3721_v20  ;;  %v755_v16 = vsel %vm5756_vm12, %v4119_v44, %v739_v11  ;;  %v765_v20 = vsel %vm5757_vm15, %v4122_v48, %v749_v61  ;;  %vm5758_vm11 = vmmov %vm5757_vm15  ;;  %v736_v2 = vsel %vm730_vm3, %v4064_v27, 0.0 }
 0x198   :  { %v771_v52 = vsel %vm5758_vm11, %v4147_v51, %v755_v16  ;;  %v781_v11 = vsel %vm775_vm0, %v4150_v14, %v765_v20  ;;  %v1371_v28 = vsel %vm5508_vm13, %v1369_v53, %v1364_v38  ;;  %vm5759_vm9 = vcmp.eq.s32.totalorder %v3667_v63, 4 }
 0x199   :  { %v1004_v21 = vadd.f32 %v1000_v13, %v990_v22  ;;  %v787_v56 = vsel %vm775_vm0, %v4177_v24, %v771_v52  ;;  %v797_v61 = vsel %vm5759_vm9, %v4180_v37, %v781_v11  ;;  %vm5760_vm8 = vmmov %vm5759_vm9  ;;  %v742_v22 = vsel %vm730_vm3, %v4089_v34, 0.0 }
 0x19a   :  { %v803_v13 = vsel %vm5760_vm8, %v4209_v5, %v787_v56  ;;  %v1404_v16 = vmul.f32 %v1371_v28, %v4399_v33  ;;  %v1405_v20 = vmul.f32 %v1371_v28, %v4425_v3  ;;  %v813_v53 = vsel %vm807_vm6, %v4212_v0, %v797_v61 }
 0x19b   :  { %v1008_v52 = vmul.f32 %v1004_v21, %v3632_v41  ;;  %v819_v38 = vsel %vm807_vm6, %v4257_v9, %v803_v13  ;;  %v829_v56 = vsel %vm823_vm10, %v4260_v30, %v813_v53  ;;  %vm746_vm0 = vcmp.eq.s32.totalorder %v4005_v47, 1 }
 0x19c   :  { %vm762_vm12 = vcmp.eq.s32.totalorder %v4005_v47, 2  ;;  %2350 = vrcp.f32 %v1404_v16  ;;  %v835_v41 = vsel %vm823_vm10, %v4276_v59, %v819_v38  ;;  %v845_v28 = vsel %vm839_vm5, %v4287_v43, %v829_v56 }
 0x19d   :  { %v752_v21 = vsel %vm746_vm0, %v4092_v60, %v736_v2  ;;  %2352 = vrcp.f32 %v1405_v20  ;;  %v851_v11 = vsel %vm839_vm5, %v4290_v26, %v835_v41  ;;  %v861_v61 = vsel %vm855_vm4, %v4301_v42, %v845_v28 }
 0x19e   :  { %v758_v13 = vsel %vm746_vm0, %v4119_v44, %v742_v22  ;;  %v867_v16 = vsel %vm855_vm4, %v4304_v7, %v851_v11  ;;  %vm5761_vm10 = vcmp.eq.s32.totalorder %v3667_v63, 9  ;;  %v768_v20 = vsel %vm762_vm12, %v4122_v48, %v752_v21 }
 0x19f   :  { %v877_v2 = vsel %vm5761_vm10, %v4317_v1, %v861_v61  ;;  %v774_v53 = vsel %vm762_vm12, %v4147_v51, %v758_v13  ;;  %vm5762_vm5 = vmmov %vm5761_vm10  ;;  %vm5763_vm6 = vcmp.eq.s32.totalorder %v3667_v63, 10  ;;  %vm778_vm4 = vcmp.eq.s32.totalorder %v4005_v47, 3 }
 0x1a0   :  { %v883_v22 = vsel %vm5762_vm5, %v4327_v40, %v867_v16  ;;  %v893_v38 = vsel %vm5763_vm6, %v4330_v45, %v877_v2  ;;  %vm794_vm15 = vcmp.eq.s32.totalorder %v4005_v47, 4  ;;  %vm5764_vm11 = vmmov %vm5763_vm6  ;;  %v784_v28 = vsel %vm778_vm4, %v4150_v14, %v768_v20 }
 0x1a1   :  { %v899_v56 = vsel %vm5764_vm11, %v4333_v50, %v883_v22  ;;  %v909_v41 = vsel %vm903_vm14, %v4342_v32, %v893_v38  ;;  %v790_v21 = vsel %vm778_vm4, %v4177_v24, %v774_v53  ;;  %v800_v13 = vsel %vm794_vm15, %v4180_v37, %v784_v28 }
 0x1a2   :  { %v915_v11 = vsel %vm903_vm14, %v4351_v54, %v899_v56  ;;  %v925_v61 = vsel %vm919_vm2, %v4354_v57, %v909_v41  ;;  %v806_v16 = vsel %vm794_vm15, %v4209_v5, %v790_v21  ;;  %vm810_vm14 = vcmp.eq.s32.totalorder %v4005_v47, 5 }
 0x1a3   :  { %v931_v2 = vsel %vm919_vm2, %v4363_v18, %v915_v11  ;;  %v941_v20 = vsel %vm935_vm1, %v4369_v31, %v925_v61  ;;  %vm826_vm9 = vcmp.eq.s32.totalorder %v4005_v47, 6  ;;  %v816_v38 = vsel %vm810_vm14, %v4212_v0, %v800_v13 }
 0x1a4   :  { %v947_v53 = vsel %vm935_vm1, %v4372_v4, %v931_v2  ;;  %v957_v22 = vsel %vm951_vm7, %v4375_v25, %v941_v20  ;;  %v822_v56 = vsel %vm810_vm14, %v4257_v9, %v806_v16  ;;  %vm5765_vm2 = vcmp.eq.s32.totalorder %v3667_v63, 15 }
 0x1a5   :  { %v963_v41 = vsel %vm951_vm7, %v4385_v19, %v947_v53  ;;  %v973_v28 = vsel %vm5765_vm2, %v4394_v35, %v957_v22  ;;  %v832_v21 = vsel %vm826_vm9, %v4260_v30, %v816_v38  ;;  %v838_v11 = vsel %vm826_vm9, %v4276_v59, %v822_v56  ;;  %vm5766_vm1 = vmmov %vm5765_vm2 }
 0x1a6   :  { %v979_v61 = vsel %vm5766_vm1, %v4397_v12, %v963_v41  ;;  %vm5767_vm8 = vcmp.eq.s32.totalorder %v3667_v63, 16  ;;  %vm5517_vm7 = vcmp.eq.s32.totalorder %v4005_v47, 7  ;;  %vm5512_vm10 = vcmp.eq.s32.totalorder %v4005_v47, 8  ;;  %v2351_v16 = vpop.eup %2350 }
 0x1a7   :  { %v989_v13 = vsel %vm5767_vm8, %v4408_v10, %v973_v28  ;;  %vm5768_vm5 = vmmov %vm5767_vm8  ;;  %v848_v20 = vsel %vm5517_vm7, %v4287_v43, %v832_v21  ;;  %v854_v53 = vsel %vm5517_vm7, %v4290_v26, %v838_v11  ;;  %vm5511_vm6 = vcmp.eq.s32.totalorder %v4005_v47, 9  ;;  %v2353_v22 = vpop.eup %2352 }
 0x1a8   :  { %v995_v2 = vsel %vm5768_vm5, %v4411_v62, %v979_v61  ;;  %v864_v56 = vsel %vm5512_vm10, %v4301_v42, %v848_v20  ;;  %v870_v63 = vsel %vm5512_vm10, %v4304_v7, %v854_v53  ;;  %vm723_vm11 = vcmp.lt.s32.totalorder %v4009_v17, 16 }
 0x1a9   :  { %v999_v38 = vmul.f32 %v995_v2, %v4017_v15  ;;  %v1413_v41 = vmul.f32 %v2353_v22, %v1008_v52  ;;  %v886_v28 = vsel %vm5511_vm6, %v4327_v40, %v870_v63  ;;  %vm5509_vm2 = vcmp.eq.s32.totalorder %v4005_v47, 10 }
 0x1aa   :  { %v880_v15 = vsel %vm5511_vm6, %v4317_v1, %v864_v56  ;;  %vm5769_vm1 = vcmask 74752   ;;  %v4607_v61 = vsel %vm723_vm11, %v4009_v17, 16  ;;  %v902_v52 = vsel %vm5509_vm2, %v4333_v50, %v886_v28 }
 0x1ab   :  { %v1003_v21 = vadd.f32 %v999_v38, %v989_v13  ;;  %v1452_v11 = vsel %vm5769_vm1, %v1413_v41, 0.0  ;;  %vm5510_vm8 = vcmp.eq.s32.totalorder %v4005_v47, 11  ;;  %v896_v13 = vsel %vm5509_vm2, %v4330_v45, %v880_v15 }
 0x1ac   :  { %1453 = vadd.xlane.f32.xlu0 %v1452_v11  ;;  %v918_v53 = vsel %vm5510_vm8, %v4351_v54, %v902_v52  ;;  %vm5518_vm5 = vcmp.eq.s32.totalorder %v4005_v47, 12  ;;  %vm729_vm11 = vcmp.eq.s32.totalorder %v4607_v61, 0  ;;  %vm5513_vm1 = vcmp.eq.s32.totalorder %v4607_v61, 1 }
 0x1ad   :  { %v1007_v2 = vmul.f32 %v1003_v21, %v3395_v36  ;;  %v714_v36 = vcvt.s32.f32 %v3676_v29  ;;  %vm5770_vm13 = vcmask 80896   ;;  %v912_v38 = vsel %vm5510_vm8, %v4342_v32, %v896_v13 }
 0x1ae   :  { %vm938_vm2 = vcmp.eq.s32.totalorder %v4005_v47, 13  ;;  %v741_v56 = vsel %vm729_vm11, %v4089_v34, 0.0  ;;  %v934_v63 = vsel %vm5518_vm5, %v4363_v18, %v918_v53  ;;  %vm5515_vm8 = vcmp.eq.s32.totalorder %v4607_v61, 3 }
 0x1af   :  { %v1412_v20 = vmul.f32 %v2351_v16, %v1007_v2  ;;  %v735_v16 = vsel %vm729_vm11, %v4064_v27, 0.0  ;;  %v757_v27 = vsel %vm5513_vm1, %v4119_v44, %v741_v56  ;;  %vm5516_vm6 = vcmp.eq.s32.totalorder %v4607_v61, 4  ;;  %v4711_v2 = vpop.xlane.xlu0 %1350  ;;  %v5772_v56 = vld [vmem:[#allocation17_spill] sm:$0xff] }
 0x1b0   :  { %v751_v29 = vsel %vm5513_vm1, %v4092_v60, %v735_v16  ;;  %vm5520_vm10 = vcmp.eq.s32.totalorder %v4607_v61, 5  ;;  %vm954_vm1 = vcmp.eq.s32.totalorder %v4005_v47, 14  ;;  %vm970_vm7 = vcmp.eq.s32.totalorder %v4005_v47, 15 }
 0x1b1   :  { %v1449_v22 = vsel %vm5770_vm13, %v1412_v20, 0.0  ;;  %vm5514_vm13 = vcmp.eq.s32.totalorder %v4607_v61, 2  ;;  %v1375_v53 = vrot.slane %v4711_v2, %v4226_v58 }
 0x1b2   :  { %1450 = vadd.xlane.f32.xlu1 %v1449_v22  ;;  %v767_v41 = vsel %vm5514_vm13, %v4122_v48, %v751_v29  ;;  %v773_v34 = vsel %vm5514_vm13, %v4147_v51, %v757_v27  ;;  %vm5519_vm13 = vcmp.eq.s32.totalorder %v4607_v61, 6  ;;  %v950_v51 = vsel %vm938_vm2, %v4372_v4, %v934_v63  ;;  %v5773_v27 = vld [vmem:[#allocation65_spill] sm:$0xff] }
 0x1b3   :  { %v783_v60 = vsel %vm5515_vm8, %v4150_v14, %v767_v41  ;;  %v789_v44 = vsel %vm5515_vm8, %v4177_v24, %v773_v34  ;;  %vm5521_vm8 = vcmp.eq.s32.totalorder %v4607_v61, 7  ;;  %v928_v24 = vsel %vm5518_vm5, %v4354_v57, %v912_v38  ;;  %v5771_v38 = vld [vmem:[#allocation30_spill] sm:$0xff]  ;;  %v5774_v34 = vld [vmem:[#allocation57_spill] sm:$0xff] }
 0x1b4   :  { %v799_v48 = vsel %vm5516_vm6, %v4180_v37, %v783_v60  ;;  %v805_v14 = vsel %vm5516_vm6, %v4209_v5, %v789_v44  ;;  %vm5522_vm6 = vcmp.eq.s32.totalorder %v4607_v61, 8  ;;  %vm873_vm5 = vcmp.eq.s32.totalorder %v4607_v61, 9  ;;  %v5775_v60 = vld [vmem:[#allocation74_spill] sm:$0xff] }
 0x1b5   :  { %v815_v28 = vsel %vm5520_vm10, %v4212_v0, %v799_v48  ;;  %v821_v37 = vsel %vm5520_vm10, %v4257_v9, %v805_v14  ;;  %v966_v9 = vsel %vm954_vm1, %v4385_v19, %v950_v51  ;;  %vm5523_vm10 = vcmp.eq.s32.totalorder %v4607_v61, 11  ;;  %v5776_v48 = vld [vmem:[#allocation33_spill] sm:$0xff]  ;;  %v5777_v14 = vld [vmem:[#allocation34_spill] sm:$0xff] }
 0x1b6   :  { %v831_v21 = vsel %vm5519_vm13, %v4260_v30, %v815_v28  ;;  %v837_v0 = vsel %vm5519_vm13, %v4276_v59, %v821_v37  ;;  %vm889_vm13 = vcmp.eq.s32.totalorder %v4607_v61, 10  ;;  %v4704_v59 = vsub.f32 %v3423_v39, %v714_v36 }
 0x1b7   :  { %v847_v5 = vsel %vm5521_vm8, %v4287_v43, %v831_v21  ;;  %v853_v30 = vsel %vm5521_vm8, %v4290_v26, %v837_v0  ;;  %v713_v43 = vcvt.s32.f32 %v4009_v17  ;;  %v944_v26 = vsel %vm938_vm2, %v4369_v31, %v928_v24  ;;  %v5778_v24 = vld [vmem:[#allocation35_spill] sm:$0xff] }
 0x1b8   :  { %v863_v15 = vsel %vm5522_vm6, %v4301_v42, %v847_v5  ;;  %v869_v11 = vsel %vm5522_vm6, %v4304_v7, %v853_v30  ;;  %vm5524_vm8 = vcmp.eq.s32.totalorder %v4005_v47, 16  ;;  %v1678_v42 = vsel %vm730_vm3, %v3740_v49, 0.0  ;;  %v5779_v5 = vld [vmem:[#allocation36_spill] sm:$0xff] }
 0x1b9   :  { %v885_v39 = vsel %vm873_vm5, %v4327_v40, %v869_v11  ;;  %v982_v17 = vsel %vm970_vm7, %v4397_v12, %v966_v9  ;;  %v879_v7 = vsel %vm873_vm5, %v4317_v1, %v863_v15  ;;  %v1684_v40 = vsel %vm730_vm3, %v3743_v23, 0.0  ;;  %v5780_v9 = vld [vmem:[#allocation14_spill] sm:$0xff]  ;;  %v5784_v11 = vld [vmem:[#allocation59_spill] sm:$0xff] }
 0x1ba   :  { %v901_v52 = vsel %vm889_vm13, %v4333_v50, %v885_v39  ;;  %vm921_vm6 = vcmp.eq.s32.totalorder %v4607_v61, 12  ;;  %v1690_v20 = vsel %vm746_vm0, %v3759_v46, %v1678_v42  ;;  %v1696_v1 = vsel %vm746_vm0, %v3770_v8, %v1684_v40  ;;  %v5788_v42 = vld [vmem:[#allocation60_spill] sm:$0xff]  ;;  %v5793_v40 = vld [vmem:[#allocation66_spill] sm:$0xff] }
 0x1bb   :  { %v917_v13 = vsel %vm5523_vm10, %v4351_v54, %v901_v52  ;;  %v4746_v50 = vsub.f32 %v3659_v6, %v713_v43  ;;  %v960_v54 = vsel %vm954_vm1, %v4375_v25, %v944_v26  ;;  %v1702_v36 = vsel %vm762_vm12, %v3773_v55, %v1690_v20  ;;  %v5782_v43 = vld [vmem:[#allocation56_spill] sm:$0xff] }
 0x1bc   :  { %v998_v22 = vsel %vm5524_vm8, %v4411_v62, %v982_v17  ;;  %v895_v6 = vsel %vm889_vm13, %v4330_v45, %v879_v7  ;;  %v1708_v16 = vsel %vm762_vm12, %v5771_v38, %v1696_v1  ;;  %v1714_v29 = vsel %vm778_vm4, %v5772_v56, %v1702_v36  ;;  %v5790_v7 = vld [vmem:[#allocation62_spill] sm:$0xff]  ;;  %v5799_v36 = vld [vmem:[#allocation69_spill] sm:$0xff] }
 0x1bd   :  { %v933_v63 = vsel %vm921_vm6, %v4363_v18, %v917_v13  ;;  %vm937_vm3 = vcmp.eq.s32.totalorder %v4607_v61, 13  ;;  %v1720_v41 = vsel %vm778_vm4, %v5773_v27, %v1708_v16  ;;  %v1726_v45 = vsel %vm794_vm15, %v5774_v34, %v1714_v29  ;;  %v5795_v13 = vld [vmem:[#allocation67_spill] sm:$0xff]  ;;  %v5801_v16 = vld [vmem:[#allocation73_spill] sm:$0xff] }
 0x1be   :  { %vm953_vm0 = vcmp.eq.s32.totalorder %v4607_v61, 14  ;;  %vm969_vm12 = vcmp.eq.s32.totalorder %v4607_v61, 15  ;;  %v1732_v44 = vsel %vm794_vm15, %v5775_v60, %v1720_v41  ;;  %v1738_v18 = vsel %vm810_vm14, %v5776_v48, %v1726_v45  ;;  %v5806_v41 = vld [vmem:[#allocation72_spill] sm:$0xff] }
 0x1bf   :  { %v911_v51 = vsel %vm5523_vm10, %v4342_v32, %v895_v6  ;;  %vm985_vm4 = vcmp.eq.s32.totalorder %v4607_v61, 16  ;;  %v1744_v28 = vsel %vm810_vm14, %v5777_v14, %v1732_v44  ;;  %v1750_v37 = vsel %vm826_vm9, %v5778_v24, %v1738_v18  ;;  %v5810_v18 = vld [vmem:[#allocation31_spill] sm:$0xff] }
 0x1c0   :  { %v1677_v21 = vsel %vm729_vm11, %v3740_v49, 0.0  ;;  %v949_v0 = vsel %vm937_vm3, %v4372_v4, %v933_v63  ;;  %v1756_v32 = vsel %vm826_vm9, %v5779_v5, %v1744_v28  ;;  %vm5781_vm15 = vcmp.eq.s32.totalorder %v4005_v47, 7  ;;  %v5804_v63 = vld [vmem:[#allocation68_spill] sm:$0xff] }
 0x1c1   :  { %v1762_v30 = vsel %vm5781_vm15, %v5780_v9, %v1750_v37  ;;  %v1683_v15 = vsel %vm729_vm11, %v3743_v23, 0.0  ;;  %vm5783_vm14 = vmmov %vm5781_vm15  ;;  %vm5785_vm10 = vcmp.eq.s32.totalorder %v4005_v47, 8  ;;  %vm5786_vm8 = vcmp.eq.s32.totalorder %v4607_v61, 1  ;;  %v5814_v37 = vld [vmem:[#allocation38_spill] sm:$0xff] }
 0x1c2   :  { %v1768_v49 = vsel %vm5783_vm14, %v5782_v43, %v1756_v32  ;;  %v1774_v4 = vsel %vm5785_vm10, %v5784_v11, %v1762_v30  ;;  %v1689_v26 = vsel %vm5786_vm8, %v3759_v46, %v1677_v21  ;;  %vm5787_vm9 = vmmov %vm5786_vm8  ;;  %v927_v23 = vsel %vm921_vm6, %v4354_v57, %v911_v51  ;;  %v5817_v32 = vld [vmem:[#allocation37_spill] sm:$0xff]  ;;  %v5818_v30 = vld [vmem:[#allocation40_spill] sm:$0xff] }
 0x1c3   :  { %v1695_v39 = vsel %vm5787_vm9, %v3770_v8, %v1683_v15  ;;  %vm5789_vm11 = vmmov %vm5785_vm10  ;;  %vm5791_vm15 = vcmp.eq.s32.totalorder %v4005_v47, 9  ;;  %vm5792_vm10 = vcmp.eq.s32.totalorder %v4607_v61, 2  ;;  %vm5796_vm14 = vcmp.eq.s32.totalorder %v4005_v47, 10 }
 0x1c4   :  { %v1780_v17 = vsel %vm5789_vm11, %v5788_v42, %v1768_v49  ;;  %v1786_v52 = vsel %vm5791_vm15, %v5790_v7, %v1774_v4  ;;  %v1701_v46 = vsel %vm5792_vm10, %v3773_v55, %v1689_v26  ;;  %vm5794_vm8 = vmmov %vm5791_vm15  ;;  %vm5798_vm11 = vcmp.eq.s32.totalorder %v4607_v61, 3  ;;  %v5821_v49 = vld [vmem:[#allocation32_spill] sm:$0xff] }
 0x1c5   :  { %v1792_v8 = vsel %vm5794_vm8, %v5793_v40, %v1780_v17  ;;  %v1798_v57 = vsel %vm5796_vm14, %v5795_v13, %v1786_v52  ;;  %vm5797_vm9 = vmmov %vm5792_vm10  ;;  %v1713_v1 = vsel %vm5798_vm11, %v5772_v56, %v1701_v46  ;;  %v965_v55 = vsel %vm953_vm0, %v4385_v19, %v949_v0  ;;  %v4895_v0 = vpop.xlane.xlu0 %1353 }
 0x1c6   :  { %v1707_v20 = vsel %vm5797_vm9, %v5771_v38, %v1695_v39  ;;  %vm5800_vm15 = vmmov %vm5796_vm14  ;;  %vm5802_vm10 = vcmp.eq.s32.totalorder %v4005_v47, 11  ;;  %vm5807_vm9 = vcmp.eq.s32.totalorder %v4005_v47, 12  ;;  %v976_v4 = vsel %vm970_vm7, %v4394_v35, %v960_v54 }
 0x1c7   :  { %v1804_v6 = vsel %vm5800_vm15, %v5799_v36, %v1792_v8  ;;  %v1810_v29 = vsel %vm5802_vm10, %v5801_v16, %v1798_v57  ;;  %vm5803_vm8 = vmmov %vm5798_vm11  ;;  %vm5808_vm11 = vcmp.eq.s32.totalorder %v4607_v61, 4  ;;  %v1002_v26 = vmul.f32 %v998_v22, %v4704_v59  ;;  %v5826_v22 = vld [vmem:[#allocation39_spill] sm:$0xff]  ;;  %v5827_v57 = vld [vmem:[#allocation44_spill] sm:$0xff] }
 0x1c8   :  { %v1719_v38 = vsel %vm5803_vm8, %v5773_v27, %v1707_v20  ;;  %vm5805_vm14 = vmmov %vm5802_vm10  ;;  %v1822_v19 = vsel %vm5807_vm9, %v5806_v41, %v1810_v29  ;;  %v1725_v45 = vsel %vm5808_vm11, %v5774_v34, %v1713_v1  ;;  %v943_v27 = vsel %vm937_vm3, %v4369_v31, %v927_v23  ;;  %v5822_v23 = vld [vmem:[#allocation42_spill] sm:$0xff]  ;;  %v5831_v1 = vld [vmem:[#allocation41_spill] sm:$0xff] }
 0x1c9   :  { %v1816_v56 = vsel %vm5805_vm14, %v5804_v63, %v1804_v6  ;;  %vm5809_vm15 = vmmov %vm5808_vm11  ;;  %vm5812_vm8 = vcmp.eq.s32.totalorder %v4607_v61, 5  ;;  %v959_v39 = vsel %vm953_vm0, %v4375_v25, %v943_v27 }
 0x1ca   :  { %v1731_v44 = vsel %vm5809_vm15, %v5775_v60, %v1719_v38  ;;  %vm5811_vm10 = vmmov %vm5807_vm9  ;;  %v1737_v28 = vsel %vm5812_vm8, %v5776_v48, %v1725_v45  ;;  %v981_v60 = vsel %vm969_vm12, %v4397_v12, %v965_v55  ;;  %vm5815_vm9 = vcmp.eq.s32.totalorder %v4607_v61, 6  ;;  %v5833_v45 = vld [vmem:[#allocation43_spill] sm:$0xff] }
 0x1cb   :  { %v1828_v51 = vsel %vm5811_vm10, %v5810_v18, %v1816_v56  ;;  %vm5813_vm14 = vmmov %vm5812_vm8  ;;  %v1749_v21 = vsel %vm5815_vm9, %v5778_v24, %v1737_v28  ;;  %vm5819_vm15 = vcmp.eq.s32.totalorder %v4607_v61, 7 }
 0x1cc   :  { %v1743_v34 = vsel %vm5813_vm14, %v5777_v14, %v1731_v44  ;;  %v1840_v31 = vsel %vm938_vm2, %v5814_v37, %v1828_v51  ;;  %vm5816_vm11 = vmmov %vm5815_vm9  ;;  %v1834_v14 = vsel %vm938_vm2, %v5817_v32, %v1822_v19  ;;  %v1761_v15 = vsel %vm5819_vm15, %v5780_v9, %v1749_v21 }
 0x1cd   :  { %v1755_v48 = vsel %vm5816_vm11, %v5779_v5, %v1743_v34  ;;  %v1852_v12 = vsel %vm954_vm1, %v5818_v30, %v1840_v31  ;;  %vm5820_vm10 = vmmov %vm5819_vm15  ;;  %v1379_v5 = vrot.slane %v4895_v0, %v5821_v49  ;;  %v997_v9 = vsel %vm985_vm4, %v4411_v62, %v981_v60 }
 0x1ce   :  { %v1767_v24 = vsel %vm5820_vm10, %v5782_v43, %v1755_v48  ;;  %v1864_v43 = vsel %vm970_vm7, %v5822_v23, %v1852_v12  ;;  %vm5823_vm2 = vcmp.eq.s32.totalorder %v4607_v61, 8  ;;  %vm5825_vm14 = vcmask 130112  }
 0x1cf   :  { %v1773_v17 = vsel %vm5823_vm2, %v5784_v11, %v1761_v15  ;;  %vm5824_vm8 = vmmov %vm5823_vm2  ;;  %v1380_v25 = vsel %vm5825_vm14, %v1379_v5, %v1375_v53  ;;  %v1846_v62 = vsel %vm954_vm1, %v5826_v22, %v1834_v14  ;;  %vm5828_vm1 = vcmp.eq.s32.totalorder %v4005_v47, 16 }
 0x1d0   :  { %v1779_v54 = vsel %vm5824_vm8, %v5788_v42, %v1767_v24  ;;  %v1785_v52 = vsel %vm873_vm5, %v5790_v7, %v1773_v17  ;;  %v1406_v46 = vmul.f32 %v1380_v25, %v4711_v2  ;;  %v1407_v42 = vmul.f32 %v1380_v25, %v4895_v0 }
 0x1d1   :  { %v1791_v11 = vsel %vm873_vm5, %v5793_v40, %v1779_v54  ;;  %v1797_v53 = vsel %vm889_vm13, %v5795_v13, %v1785_v52  ;;  %v975_v7 = vsel %vm969_vm12, %v4394_v35, %v959_v39  ;;  %v1876_v40 = vsel %vm5828_vm1, %v5827_v57, %v1864_v43 }
 0x1d2   :  { %v1803_v8 = vsel %vm889_vm13, %v5799_v36, %v1791_v11  ;;  %vm5829_vm5 = vcmp.eq.s32.totalorder %v4607_v61, 11  ;;  %2354 = vrcp.f32 %v1406_v46  ;;  %v1858_v55 = vsel %vm970_vm7, %v5831_v1, %v1846_v62  ;;  %vm5832_vm7 = vmmov %vm5828_vm1 }
 0x1d3   :  { %v1809_v20 = vsel %vm5829_vm5, %v5801_v16, %v1797_v53  ;;  %vm5830_vm9 = vmmov %vm5829_vm5  ;;  %2356 = vrcp.f32 %v1407_v42  ;;  %v1001_v6 = vmul.f32 %v997_v9, %v4746_v50  ;;  %v991_v38 = vsel %vm985_vm4, %v4408_v10, %v975_v7  ;;  %v1431_v9 = vpop.xlane.xlu1 %1430 }
 0x1d4   :  { %v1815_v13 = vsel %vm5830_vm9, %v5804_v63, %v1803_v8  ;;  %v1821_v35 = vsel %vm921_vm6, %v5806_v41, %v1809_v20  ;;  %v1880_v63 = vmul.f32 %v1876_v40, %v4704_v59  ;;  %v992_v19 = vsel %vm5832_vm7, %v4408_v10, %v976_v4  ;;  %v5844_v40 = vld [vmem:[#allocation15_spill] sm:$0xff] }
 0x1d5   :  { %v1827_v36 = vsel %vm921_vm6, %v5810_v18, %v1815_v13  ;;  %v1833_v16 = vsel %vm937_vm3, %v5817_v32, %v1821_v35  ;;  %vm5834_vm6 = vmmov %vm5828_vm1  ;;  %v1005_v51 = vadd.f32 %v1001_v6, %v991_v38  ;;  %v1006_v28 = vadd.f32 %v1002_v26, %v992_v19  ;;  %v5836_v32 = vld [vmem:[#allocation48_spill] sm:$0xff] }
 0x1d6   :  { %v1839_v29 = vsel %vm937_vm3, %v5814_v37, %v1827_v36  ;;  %v1845_v56 = vsel %vm953_vm0, %v5826_v22, %v1833_v16  ;;  %v1870_v44 = vsel %vm5834_vm6, %v5833_v45, %v1858_v55  ;;  %2358 = vrcp.f32 %v4399_v33  ;;  %v5835_v37 = vld [vmem:[#allocation29_spill] sm:$0xff] }
 0x1d7   :  { %v1851_v41 = vsel %vm953_vm0, %v5818_v30, %v1839_v29  ;;  %v1857_v59 = vsel %vm969_vm12, %v5831_v1, %v1845_v56  ;;  %v1884_v34 = vadd.f32 %v1880_v63, %v1870_v44  ;;  %2360 = vrcp.f32 %v4425_v3  ;;  %v1437_v11 = vpop.xlane.xlu1 %1436 }
 0x1d8   :  { %v1863_v27 = vsel %vm969_vm12, %v5822_v23, %v1851_v41  ;;  %v1869_v18 = vsel %vm985_vm4, %v5833_v45, %v1857_v59  ;;  %v1009_v31 = vmul.f32 %v1005_v51, %v5835_v37  ;;  %v1010_v14 = vmul.f32 %v1006_v28, %v5836_v32 }
 0x1d9   :  { %v1875_v10 = vsel %vm985_vm4, %v5827_v57, %v1863_v27  ;;  %v2265_v30 = vadd.f32 -0.5, %v1884_v34  ;;  %vm5837_vm13 = vcmask 80896   ;;  %vm5838_vm3 = vcmask 74752   ;;  %vm5841_vm4 = vmmov %vm5825_vm14 }
 0x1da   :  { %v1879_v47 = vmul.f32 %v1875_v10, %v4746_v50  ;;  %vm5839_vm0 = vmmov %vm5837_vm13  ;;  %2362 = vrcp.f32 %v4711_v2  ;;  %vm1381_vm11 = vcmask 1041409   ;;  %v5027_v20 = vmul.f32 16.0, %v5844_v40 }
 0x1db   :  { %v1892_v33 = vand.u32 2147483647, %v2265_v30  ;;  %vm5840_vm12 = vmmov %vm5838_vm3  ;;  %2364 = vrcp.f32 %v4895_v0  ;;  %v1555_v35 = vstv %s2194_s12  ;;  %v1562_v6 = vstv %s2196_s0  ;;  %s2226_s12 = sld [smem:[#allocation8 + $0x290]]  ;;  %s2223_s0 = sld [smem:[#allocation7 + $0x28f]] }
 0x1dc   :  { %v1883_v60 = vadd.f32 %v1879_v47, %v1869_v18  ;;  %v2355_v48 = vpop.eup %2354  ;;  %vm5842_vm15 = vmmov %vm5841_vm4  ;;  %v2326_v13 = vtrunc.f32 %v5027_v20  ;;  %v1552_v16 = vstv %s2193_s14  ;;  %v1569_v38 = vstv %s2198_s15  ;;  %s2225_s14 = sld [smem:[#allocation7 + $0x290]] }
 0x1dd   :  { %v2357_v12 = vpop.eup %2356  ;;  %v1414_v61 = vmul.f32 %v2355_v48, %v1009_v31  ;;  %v1907_v26 = vsel %vm5840_vm12, %v1892_v33, 0.0  ;;  %v1434_v43 = vpop.xlane.xlu0 %1433  ;;  %vm5843_vm10 = vmmov %vm5838_vm3  ;;  %v1559_v56 = vstv %s2195_s16  ;;  %v1576_v19 = vstv %s2200_s2  ;;  %s5120_s15 = sld [smem:[#allocation8 + $0x380]]  ;;  %s5122_s16 = sld [smem:[#allocation8 + $0x381]] }
 0x1de   :  { %v2264_v21 = vadd.f32 -0.5, %v1883_v60  ;;  %v1415_v15 = vmul.f32 %v2357_v12, %v1010_v14  ;;  %v5030_v1 = vcvt.f32.s32 %v2326_v13  ;;  %v1566_v44 = vstv %s2197_s17  ;;  %s5124_s2 = sld [smem:[#allocation8 + $0x382]]  ;;  %s5126_s17 = sld [smem:[#allocation8 + $0x383]] }
 0x1df   :  { %v1455_v24 = vsel %vm5837_vm13, %v1414_v61, 0.0  ;;  %v1583_v27 = vstv %s2202_s4  ;;  %v1573_v10 = vstv %s2199_s3  ;;  %v1590_v47 = vstv %s2204_s18  ;;  %s5130_s4 = sld [smem:[#allocation8 + $0x384]]  ;;  %s5132_s3 = sld [smem:[#allocation8 + $0x385]] }
 0x1e0   :  { %v1891_v50 = vand.u32 2147483647, %v2264_v21  ;;  %v1458_v5 = vsel %vm5838_vm3, %v1415_v15, 0.0  ;;  %1456 = vadd.xlane.f32.xlu1 %v1455_v24  ;;  %v2359_v4 = vpop.eup %2358  ;;  %vm1548_vm2 = vcmp.lt.s32.totalorder %v5030_v1, 16  ;;  %v1580_v34 = vstv %s2201_s13  ;;  %s5134_s18 = sld [smem:[#allocation8 + $0x386]]  ;;  %s5136_s13 = sld [smem:[#allocation8 + $0x387]] }
 0x1e1   :  { %1459 = vadd.xlane.f32.xlu0 %v1458_v5  ;;  %v2361_v39 = vpop.eup %2360  ;;  %v1445_v23 = vmul.f32 %v2359_v4, %v1431_v9  ;;  %v5034_v55 = vsel %vm1548_vm2, %v5030_v1, 16  ;;  %v1597_v37 = vstv %s2206_s19  ;;  %v1587_v21 = vstv %s2203_s1  ;;  %s5139_s19 = sld [smem:[#allocation8 + $0x388]]  ;;  %s5141_s1 = sld [smem:[#allocation8 + $0x389]] }
 0x1e2   :  { %v1904_v3 = vsel %vm5839_vm0, %v1891_v50, 0.0  ;;  %v1446_v17 = vmul.f32 %v2361_v39, %v1434_v43  ;;  %vm1550_vm8 = vcmp.eq.s32.totalorder %v5034_v55, 0  ;;  %vm1557_vm14 = vcmp.eq.s32.totalorder %v5034_v55, 1 }
 0x1e3   :  { %v1495_v54 = vrot.slane %v1445_v23, %v4226_v58  ;;  %v1556_v36 = vsel %vm1550_vm8, %v1555_v35, 0.0  ;;  %vm1564_vm1 = vcmp.eq.s32.totalorder %v5034_v55, 2  ;;  %v1553_v63 = vsel %vm1550_vm8, %v1552_v16, 0.0 }
 0x1e4   :  { %1905 = vadd.xlane.f32.xlu1 %v1904_v3  ;;  %v1499_v25 = vrot.slane %v1446_v17, %v5821_v49  ;;  %v2363_v62 = vpop.eup %2362  ;;  %v1563_v29 = vsel %vm1557_vm14, %v1562_v6, %v1556_v36  ;;  %vm1571_vm5 = vcmp.eq.s32.totalorder %v5034_v55, 3  ;;  %v1560_v45 = vsel %vm1557_vm14, %v1559_v56, %v1553_v63 }
 0x1e5   :  { %1908 = vadd.xlane.f32.xlu0 %v1907_v26  ;;  %v2365_v52 = vpop.eup %2364  ;;  %v1447_v46 = vmul.f32 %v2363_v62, %v1437_v11  ;;  %v1570_v41 = vsel %vm1564_vm1, %v1569_v38, %v1563_v29  ;;  %vm1578_vm9 = vcmp.eq.s32.totalorder %v5034_v55, 4  ;;  %v1567_v18 = vsel %vm1564_vm1, %v1566_v44, %v1560_v45 }
 0x1e6   :  { %v1500_v22 = vsel %vm5841_vm4, %v1499_v25, %v1495_v54  ;;  %v1577_v59 = vsel %vm1571_vm5, %v1576_v19, %v1570_v41  ;;  %vm1585_vm7 = vcmp.eq.s32.totalorder %v5034_v55, 5  ;;  %v1574_v28 = vsel %vm1571_vm5, %v1573_v10, %v1567_v18 }
 0x1e7   :  { %v1504_v8 = vrot.slane %v1447_v46, %v4226_v58  ;;  %v1584_v51 = vsel %vm1578_vm9, %v1583_v27, %v1577_v59  ;;  %vm1592_vm6 = vcmp.eq.s32.totalorder %v5034_v55, 6  ;;  %v1581_v31 = vsel %vm1578_vm9, %v1580_v34, %v1574_v28 }
 0x1e8   :  { %v1591_v60 = vsel %vm1585_vm7, %v1590_v47, %v1584_v51  ;;  %vm1599_vm13 = vcmp.eq.s32.totalorder %v5034_v55, 7  ;;  %v1604_v32 = vstv %s2208_s21  ;;  %v1588_v14 = vsel %vm1585_vm7, %v1587_v21, %v1581_v31  ;;  %s5143_s21 = sld [smem:[#allocation8 + $0x38a]] }
 0x1e9   :  { %v1598_v48 = vsel %vm1592_vm6, %v1597_v37, %v1591_v60  ;;  %v1594_v30 = vstv %s2205_s20  ;;  %vm1606_vm3 = vcmp.eq.s32.totalorder %v5034_v55, 8  ;;  %v1611_v61 = vstv %s2210_s24  ;;  %s5145_s20 = sld [smem:[#allocation8 + $0x38b]]  ;;  %s5147_s24 = sld [smem:[#allocation8 + $0x38c]] }
 0x1ea   :  { %v1605_v12 = vsel %vm1599_vm13, %v1604_v32, %v1598_v48  ;;  %v1595_v15 = vsel %vm1592_vm6, %v1594_v30, %v1588_v14  ;;  %v1601_v24 = vstv %s2207_s6  ;;  %vm1613_vm0 = vcmp.eq.s32.totalorder %v5034_v55, 9  ;;  %s5149_s6 = sld [smem:[#allocation8 + $0x38d]] }
 0x1eb   :  { %v1612_v50 = vsel %vm1606_vm3, %v1611_v61, %v1605_v12  ;;  %v1618_v5 = vstv %s2212_s22  ;;  %v1602_v33 = vsel %vm1599_vm13, %v1601_v24, %v1595_v15  ;;  %v1608_v4 = vstv %s2209_s23  ;;  %s5151_s22 = sld [smem:[#allocation8 + $0x38e]]  ;;  %s5153_s23 = sld [smem:[#allocation8 + $0x38f]] }
 0x1ec   :  { %v1619_v3 = vsel %vm1613_vm0, %v1618_v5, %v1612_v50  ;;  %vm1620_vm12 = vcmp.eq.s32.totalorder %v5034_v55, 10  ;;  %v1625_v26 = vstv %s2214_s25  ;;  %v1609_v39 = vsel %vm1606_vm3, %v1608_v4, %v1602_v33  ;;  %s5155_s25 = sld [smem:[#allocation8 + $0x390]] }
 0x1ed   :  { %v1440_v42 = vpop.xlane.xlu0 %1439  ;;  %v1615_v9 = vstv %s2211_s26  ;;  %v1626_v23 = vsel %vm1620_vm12, %v1625_v26, %v1619_v3  ;;  %vm1627_vm4 = vcmp.eq.s32.totalorder %v5034_v55, 11  ;;  %v1632_v43 = vstv %s2216_s27  ;;  %s5157_s26 = sld [smem:[#allocation7 + $0x380]]  ;;  %s5159_s27 = sld [smem:[#allocation7 + $0x381]] }
 0x1ee   :  { %v1448_v53 = vmul.f32 %v2365_v52, %v1440_v42  ;;  %v1616_v17 = vsel %vm1613_vm0, %v1615_v9, %v1609_v39  ;;  %v1622_v54 = vstv %s2213_s28  ;;  %v1633_v25 = vsel %vm1627_vm4, %v1632_v43, %v1626_v23  ;;  %s5161_s28 = sld [smem:[#allocation7 + $0x382]] }
 0x1ef   :  { %v1623_v62 = vsel %vm1620_vm12, %v1622_v54, %v1616_v17  ;;  %v1629_v52 = vstv %s2215_s30  ;;  %v1646_v46 = vstv %s2220_s5  ;;  %vm1648_vm2 = vcmp.eq.s32.totalorder %v5034_v55, 14  ;;  %s5167_s30 = sld [smem:[#allocation7 + $0x384]]  ;;  %s5171_s5 = sld [smem:[#allocation7 + $0x385]] }
 0x1f0   :  { %v1508_v7 = vrot.slane %v1448_v53, %v5821_v49  ;;  %v1630_v42 = vsel %vm1627_vm4, %v1629_v52, %v1623_v62  ;;  %v1636_v53 = vstv %s2217_s7  ;;  %vm1655_vm8 = vcmp.eq.s32.totalorder %v5034_v55, 15  ;;  %s5173_s7 = sld [smem:[#allocation7 + $0x386]] }
 0x1f1   :  { %v1660_v40 = vstv %s2224_s10  ;;  %v1546_v13 = vcvt.s32.f32 %v5030_v1  ;;  %v1650_v36 = vstv %s2221_s11  ;;  %vm1662_vm14 = vcmp.eq.s32.totalorder %v5034_v55, 16  ;;  %s5192_s10 = sld [smem:[#allocation7 + $0x389]]  ;;  %s5198_s11 = sld [smem:[#allocation7 + $0x38a]] }
 0x1f2   :  { %v1509_v2 = vsel %vm5842_vm15, %v1508_v7, %v1504_v8  ;;  %vm1634_vm15 = vcmp.eq.s32.totalorder %v5034_v55, 12  ;;  %v1653_v7 = vstv %s2222_s8  ;;  %v1667_v16 = vstv %s2226_s12  ;;  %s5179_s8 = sld [smem:[#allocation7 + $0x387]]  ;;  %s5209_s12 = sld [smem:[#allocation7 + $0x38b]] }
 0x1f3   :  { %v1510_v57 = vsel %vm1381_vm11, %v1509_v2, %v1500_v22  ;;  %v1639_v22 = vstv %s2218_s29  ;;  %v1637_v2 = vsel %vm1634_vm15, %v1636_v53, %v1630_v42  ;;  %v1657_v38 = vstv %s2223_s0  ;;  %s5165_s29 = sld [smem:[#allocation7 + $0x383]]  ;;  %s5220_s0 = sld [smem:[#allocation7 + $0x38c]] }
 0x1f4   :  { %v1512_v0 = vsel %vm5843_vm10, %v1510_v57, 0.0  ;;  %v1640_v11 = vsel %vm1634_vm15, %v1639_v22, %v1633_v25  ;;  %vm1641_vm10 = vcmp.eq.s32.totalorder %v5034_v55, 13  ;;  %v1643_v57 = vstv %s2219_s9  ;;  %s5185_s9 = sld [smem:[#allocation7 + $0x388]] }
 0x1f5   :  { %1513 = vadd.xlane.f32.xlu0 %v1512_v0  ;;  %v1647_v8 = vsel %vm1641_vm10, %v1646_v46, %v1640_v11  ;;  %v1644_v35 = vsel %vm1641_vm10, %v1643_v57, %v1637_v2  ;;  %v1547_v63 = vsub.f32 %v5027_v20, %v1546_v13  ;;  %v1664_v45 = vstv %s2225_s14  ;;  %s5257_s14 = sld [smem:[#allocation7 + $0x38d]] }
 0x1f6   :  { %v1654_v0 = vsel %vm1648_vm2, %v1653_v7, %v1647_v8  ;;  %v1651_v29 = vsel %vm1648_vm2, %v1650_v36, %v1644_v35  ;;  %vm5845_vm1 = vcmask 130112   ;;  %vm5847_vm9 = vcmask 74752  }
 0x1f7   :  { %v1661_v6 = vsel %vm1655_vm8, %v1660_v40, %v1654_v0  ;;  %v1658_v19 = vsel %vm1655_vm8, %v1657_v38, %v1651_v29  ;;  %vm5846_vm5 = vmmov %vm5845_vm1  ;;  %v1954_v46 = vstv %s5120_s15  ;;  %v1961_v42 = vstv %s5122_s16  ;;  %s5278_s15 = sld [smem:[#allocation7 + $0x38e]]  ;;  %s5287_s16 = sld [smem:[#allocation7 + $0x38f]] }
 0x1f8   :  { %v1668_v56 = vsel %vm1662_vm14, %v1667_v16, %v1661_v6  ;;  %v1665_v27 = vsel %vm1662_vm14, %v1664_v45, %v1658_v19  ;;  %vm5848_vm7 = vmmov %vm5847_vm9  ;;  %v1968_v53 = vstv %s5124_s2  ;;  %v1975_v8 = vstv %s5126_s17  ;;  %s5289_s2 = sld [smem:[#allocation7 + $0x390]]  ;;  %s2449_s17 = smov [#allocation9]  }
 0x1f9   :  { %v1669_v59 = vmul.f32 %v1668_v56, %v1547_v63  ;;  %vm5849_vm6 = vmmov %vm5845_vm1  ;;  %v1982_v7 = vstv %s5130_s4  ;;  %v1989_v57 = vstv %s5132_s3  ;;  %v1996_v0 = vstv %s5134_s18  ;;  %s2079_s4 = sshll.u32 %s2449_s17, 4  ;;  %s2080_s4 = int_to_ptr.vmem [resolvable:$true] %s2079_s4 }
 0x1fa   :  { %vm5850_vm13 = vmmov %vm5845_vm1  ;;  %v2003_v40 = vstv %s5136_s13  ;;  %v2010_v13 = vstv %s5139_s19  ;;  %v2017_v36 = vstv %s5141_s1  ;;  %v2024_v6 = vstv %s5143_s21  ;;  %s2412_s3 = scalar_lea.vmem %s2080_s4, 32  ;;  %p2417_p3 = scmp.lt.s32.totalorder %s2080_s4, %s2080_s4 }
 0x1fb   :  { %v1670_v10 = vadd.f32 %v1669_v59, %v1665_v27  ;;  %vm5851_vm3 = vmmov %vm5848_vm7  ;;  %v2031_v16 = vstv %s5145_s20  ;;  %v2038_v38 = vstv %s5147_s24  ;;  %v2045_v63 = vstv %s5149_s6  ;;  %p2413_p2 = scmp.ne.s32.totalorder %s2080_s4, %s2412_s3  ;;  %p2418_p4 = scmp.lt.s32.totalorder %s2412_s3, %s2412_s3 }
 0x1fc   :  { %v2052_v56 = vstv %s5151_s22  ;;  %v2066_v19 = vstv %s5155_s25  ;;  %v1951_v59 = vstv %s5157_s26  ;;  %v1958_v27 = vstv %s5159_s27 }
 0x1fd   :  { %v2227_v28 = vadd.f32 -0.5, %v1670_v10  ;;  %v1979_v10 = vstv %s5167_s30  ;;  %p2419_p5 = por %p2418_p4, %p2417_p3 }
 0x1ff   :  { %v1672_v14 = vand.u32 2147483647, %v2227_v28  ;;  %p2420_p6 = pnand %p2419_p5, %p2413_p2 }
 0x201   :  { %v1893_v3 = vsel %vm5848_vm7, %v1672_v14, 0.0 }
 0x206   :  { %v1903_v44 = vpop.xlane.xlu0 %1902 }
 0x207   :  { %v1911_v37 = vmul.f32 0.1, %v1903_v44 }
 0x209   :  { %v1925_v24 = vrot.slane %v1911_v37, %v5821_v49 }
 0x21f   :  { %v1900_v41 = vpop.xlane.xlu1 %1899 }
 0x220   :  { %v1910_v20 = vmul.f32 0.1, %v1900_v41  ;;  %v2059_v41 = vstv %s5153_s23 }
 0x222   :  { %v1921_v15 = vrot.slane %v1910_v20, %v4226_v58 }
 0x224   :  { %v1926_v26 = vsel %vm5849_vm6, %v1925_v24, %v1921_v15 }
 0x239   :  { %v1454_v18 = vpop.xlane.xlu0 %1453 }
 0x23a   :  { %v1472_v47 = vrot.slane %v1454_v18, %v5821_v49  ;;  %v1972_v18 = vstv %s5165_s29 }
 0x23f   :  { %v1451_v1 = vpop.xlane.xlu1 %1450 }
 0x240   :  { %v1468_v51 = vrot.slane %v1451_v1, %v4226_v58  ;;  %v1965_v1 = vstv %s5161_s28 }
 0x242   :  { %v1473_v48 = vsel %vm5845_vm1, %v1472_v47, %v1468_v51  ;;  %v1986_v47 = vstv %s5171_s5 }
 0x26d   :  { %v1457_v55 = vpop.xlane.xlu1 %1456 }
 0x26e   :  { %v1477_v34 = vrot.slane %v1457_v55, %v4226_v58  ;;  %v1460_v60 = vpop.xlane.xlu0 %1459  ;;  %v1993_v55 = vstv %s5173_s7 }
 0x26f   :  { %v1481_v31 = vrot.slane %v1460_v60, %v5821_v49  ;;  %v2000_v60 = vstv %s5179_s8 }
 0x271   :  { %v1906_v21 = vpop.xlane.xlu1 %1905  ;;  %v1482_v32 = vsel %vm5846_vm5, %v1481_v31, %v1477_v34  ;;  %v2007_v31 = vstv %s5185_s9 }
 0x272   :  { %v1912_v30 = vmul.f32 0.1, %v1906_v21  ;;  %v1909_v12 = vpop.xlane.xlu0 %1908  ;;  %v1483_v61 = vsel %vm1381_vm11, %v1482_v32, %v1473_v48  ;;  %v2014_v48 = vstv %s5192_s10 }
 0x273   :  { %v1913_v50 = vmul.f32 0.1, %v1909_v12  ;;  %v1485_v5 = vsel %vm5847_vm9, %v1483_v61, 0.0 }
 0x274   :  { %v1930_v33 = vrot.slane %v1912_v30, %v4226_v58  ;;  %1486 = vadd.xlane.f32.xlu1 %v1485_v5  ;;  %v2021_v30 = vstv %s5198_s11  ;;  %v2028_v5 = vstv %s5209_s12 }
 0x275   :  { %v1934_v4 = vrot.slane %v1913_v50, %v5821_v49 }
 0x277   :  { %v1935_v39 = vsel %vm5850_vm13, %v1934_v4, %v1930_v33 }
 0x278   :  { %1894 = vadd.xlane.f32.xlu1 %v1893_v3  ;;  %v1936_v9 = vsel %vm1381_vm11, %v1935_v39, %v1926_v26 }
 0x279   :  { %v1938_v23 = vsel %vm5851_vm3, %v1936_v9, 0.0  ;;  %v2035_v9 = vstv %s5220_s0 }
 0x27a   :  { %1939 = vadd.xlane.f32.xlu0 %v1938_v23 }
 0x282   :  { %v1514_v43 = vpop.xlane.xlu0 %1513 }
 0x301   :  { %v1487_v17 = vpop.xlane.xlu1 %1486 }
 0x302   :  { %v1515_v54 = vadd.f32 %v1514_v43, %v1487_v17 }
 0x304   :  { %v5128_v58 = vadd.f32 1e-20, %v1515_v54 }
 0x305   :  { %v1895_v49 = vpop.xlane.xlu1 %1894 }
 0x306   :  { %2366 = vrsqrt.f32 %v5128_v58  ;;  %v1897_v25 = vmul.f32 0.1, %v1895_v49  ;;  %vm1519_vm4 = vcmp.eq.f32.partialorder %v5128_v58, inf  ;;  %v1522_v37 = vand.u32 2147483648, %v5128_v58 }
 0x307   :  { %v1940_v22 = vpop.xlane.xlu0 %1939  ;;  %vm1521_vm8 = vcmp.eq.f32.partialorder %v5128_v58, 0.0 }
 0x308   :  { %v1941_v62 = vmul.f32 0.1, %v1940_v22 }
 0x30a   :  { %v1942_v52 = vadd.f32 %v1941_v62, %v1897_v25 }
 0x30c   :  { %v5163_v11 = vmul.f32 16.0, %v1942_v52 }
 0x30e   :  { %v2328_v2 = vtrunc.f32 %v5163_v11 }
 0x310   :  { %v2367_v35 = vpop.eup %2366  ;;  %v5190_v29 = vcvt.f32.s32 %v2328_v2 }
 0x311   :  { %v1518_v45 = vmul.f32 %v2367_v35, %v5128_v58 }
 0x312   :  { %vm1947_vm11 = vcmp.lt.s32.totalorder %v5190_v29, 16  ;;  %v1945_v54 = vcvt.s32.f32 %v5190_v29 }
 0x313   :  { %v5204_v44 = vsel %vm1947_vm11, %v5190_v29, 16  ;;  %v1520_v34 = vsel %vm1519_vm4, %v5128_v58, %v1518_v45 }
 0x314   :  { %vm1949_vm0 = vcmp.eq.s32.totalorder %v5204_v44, 0  ;;  %vm1956_vm12 = vcmp.eq.s32.totalorder %v5204_v44, 1  ;;  %vm1963_vm15 = vcmp.eq.s32.totalorder %v5204_v44, 2  ;;  %vm1970_vm10 = vcmp.eq.s32.totalorder %v5204_v44, 3 }
 0x315   :  { %v1955_v51 = vsel %vm1949_vm0, %v1954_v46, 0.0  ;;  %vm1977_vm2 = vcmp.eq.s32.totalorder %v5204_v44, 4  ;;  %vm1984_vm14 = vcmp.eq.s32.totalorder %v5204_v44, 5  ;;  %v1523_v14 = vsel %vm1521_vm8, %v1522_v37, %v1520_v34 }
 0x316   :  { %v1962_v28 = vsel %vm1956_vm12, %v1961_v42, %v1955_v51  ;;  %vm1991_vm1 = vcmp.eq.s32.totalorder %v5204_v44, 6  ;;  %v1524_v61 = vmax.f32 %v1523_v14, 0.0  ;;  %v1952_v15 = vsel %vm1949_vm0, %v1951_v59, 0.0 }
 0x317   :  { %v1969_v20 = vsel %vm1963_vm15, %v1968_v53, %v1962_v28  ;;  %vm1998_vm5 = vcmp.eq.s32.totalorder %v5204_v44, 7  ;;  %v1959_v50 = vsel %vm1956_vm12, %v1958_v27, %v1952_v15  ;;  %vm2005_vm9 = vcmp.eq.s32.totalorder %v5204_v44, 8 }
 0x318   :  { %v1976_v21 = vsel %vm1970_vm10, %v1975_v8, %v1969_v20  ;;  %v1525_v4 = vmin.f32 %v1524_v61, 10.0  ;;  %v1966_v3 = vsel %vm1963_vm15, %v1965_v1, %v1959_v50  ;;  %vm2012_vm7 = vcmp.eq.s32.totalorder %v5204_v44, 9 }
 0x319   :  { %v1983_v32 = vsel %vm1977_vm2, %v1982_v7, %v1976_v21  ;;  %v1973_v39 = vsel %vm1970_vm10, %v1972_v18, %v1966_v3  ;;  %vm2019_vm6 = vcmp.eq.s32.totalorder %v5204_v44, 10  ;;  %vm2026_vm13 = vcmp.eq.s32.totalorder %v5204_v44, 11 }
 0x31a   :  { %v1990_v12 = vsel %vm1984_vm14, %v1989_v57, %v1983_v32  ;;  %v2324_v43 = vtrunc.f32 %v1525_v4  ;;  %v1980_v17 = vsel %vm1977_vm2, %v1979_v10, %v1973_v39  ;;  %vm2033_vm3 = vcmp.eq.s32.totalorder %v5204_v44, 12 }
 0x31b   :  { %v1997_v24 = vsel %vm1991_vm1, %v1996_v0, %v1990_v12  ;;  %v1987_v49 = vsel %vm1984_vm14, %v1986_v47, %v1980_v17  ;;  %vm2040_vm11 = vcmp.eq.s32.totalorder %v5204_v44, 13  ;;  %vm2047_vm0 = vcmp.eq.s32.totalorder %v5204_v44, 14 }
 0x31c   :  { %v2004_v33 = vsel %vm1998_vm5, %v2003_v40, %v1997_v24  ;;  %v2325_v22 = vcvt.f32.s32 %v2324_v43  ;;  %v1994_v62 = vsel %vm1991_vm1, %v1993_v55, %v1987_v49  ;;  %vm2054_vm4 = vcmp.eq.s32.totalorder %v5204_v44, 15 }
 0x31d   :  { %v2011_v26 = vsel %vm2005_vm9, %v2010_v13, %v2004_v33  ;;  %v2001_v46 = vsel %vm1998_vm5, %v2000_v60, %v1994_v62  ;;  %v2042_v13 = vstv %s5257_s14  ;;  %vm2061_vm10 = vcmp.eq.s32.totalorder %v5204_v44, 16 }
 0x31e   :  { %v2018_v23 = vsel %vm2012_vm7, %v2017_v36, %v2011_v26  ;;  %v1527_v53 = vcvt.s32.f32 %v2325_v22  ;;  %vm1529_vm12 = vcmp.lt.s32.totalorder %v2325_v22, 10  ;;  %v1531_v8 = vadd.s32 1, %v2325_v22  ;;  %v5852_v36 = vld [vmem:[#allocation70_spill] sm:$0xff] }
 0x31f   :  { %v2025_v58 = vsel %vm2019_vm6, %v2024_v6, %v2018_v23  ;;  %v1530_v2 = vsel %vm1529_vm12, %v2325_v22, 10  ;;  %v2008_v57 = vsel %vm2005_vm9, %v2007_v31, %v2001_v46  ;;  %v2049_v59 = vstv %s5278_s15 }
 0x320   :  { %v2032_v25 = vsel %vm2026_vm13, %v2031_v16, %v2025_v58  ;;  %v1528_v40 = vsub.f32 %v1525_v4, %v1527_v53  ;;  %vm1532_vm15 = vcmp.lt.s32.totalorder %v1531_v8, 10  ;;  %vm1534_vm2 = vcmp.eq.s32.totalorder %v5852_v36, %v1530_v2 }
 0x321   :  { %v2039_v52 = vsel %vm2033_vm3, %v2038_v38, %v2032_v25  ;;  %v1533_v35 = vsel %vm1532_vm15, %v1531_v8, 10  ;;  %v2015_v6 = vsel %vm2012_vm7, %v2014_v48, %v2008_v57  ;;  %v2056_v18 = vstv %s5287_s16 }
 0x322   :  { %v2046_v42 = vsel %vm2040_vm11, %v2045_v63, %v2039_v52  ;;  %vm1537_vm8 = vcmp.eq.s32.totalorder %v5852_v36, %v1533_v35  ;;  %v1540_v29 = vsub.f32 1.0, %v1528_v40  ;;  %v2022_v38 = vsel %vm2019_vm6, %v2021_v30, %v2015_v6 }
 0x323   :  { %v2053_v7 = vsel %vm2047_vm0, %v2052_v56, %v2046_v42  ;;  %v1946_v63 = vsub.f32 %v5163_v11, %v1945_v54  ;;  %v2448_v56 = vmov 0.0   ;;  %v2029_v45 = vsel %vm2026_vm13, %v2028_v5, %v2022_v38 }
 0x324   :  { %v2060_v0 = vsel %vm2054_vm4, %v2059_v41, %v2053_v7  ;;  %v2192_v41 = vsel %vm1537_vm8, 1.0, %v2448_v56  ;;  %v2191_v27 = vsel %vm1534_vm2, 1.0, %v2448_v56  ;;  %v2036_v1 = vsel %vm2033_vm3, %v2035_v9, %v2029_v45 }
 0x325   :  { %v2067_v16 = vsel %vm2061_vm10, %v2066_v19, %v2060_v0  ;;  %v2063_v19 = vstv %s5289_s2  ;;  %v1541_v51 = vmul.f32 %v2191_v27, %v1540_v29  ;;  %v1542_v47 = vmul.f32 %v2192_v41, %v1528_v40 }
 0x326   :  { %v2068_v10 = vmul.f32 %v2067_v16, %v1946_v63  ;;  %v2043_v55 = vsel %vm2040_vm11, %v2042_v13, %v2036_v1  ;;  %vm2071_vm14 = vcmask 82944  }
 0x327   :  { %v2050_v11 = vsel %vm2047_vm0, %v2049_v59, %v2043_v55  ;;  %v1543_v60 = vadd.f32 %v1542_v47, %v1541_v51 }
 0x328   :  { %v2057_v28 = vsel %vm2054_vm4, %v2056_v18, %v2050_v11 }
 0x329   :  { %v2064_v34 = vsel %vm2061_vm10, %v2063_v19, %v2057_v28 }
 0x32a   :  { %v2069_v20 = vadd.f32 %v2068_v10, %v2064_v34 }
 0x32c   :  { %v2070_v37 = vmul.f32 %v2069_v20, %v1543_v60 }
 0x32e   :  { %2072 = vst.msk [vmem:[#allocation9] sm:$0x3] %vm2071_vm14, %v2070_v37 }
 0x32f   :  { %2423 = shalt.err (!%p2420_p6)
}
 0x330   :  { %s5853_s19 = sld [smem:[#allocation75_spill]] }
 0x336   :  { %s2424_s1 = scalar_lea.hbm %s5853_s19, 32 }
 0x337   :  { %p2425_p7 = scmp.ne.s32.totalorder %s5853_s19, %s2424_s1  ;;  %p2428_p8 = scmp.lt.u32.totalorder %s2424_s1, %s5853_s19 }
 0x339   :  { %p2430_p9 = pnand %p2428_p8, %p2425_p7 }
 0x33b   :  { %2433 = shalt.err (!%p2430_p9)
}
 0x33c   :  { %2082 = dma.vmem_to_hbm [thread:$0]  %s2080_s4, 32, %s5853_s19, [#allocation4]  }
 0x33d   :  { %2440 = dma.done.wait [#allocation4], 32  }
 0x33e   :  { %2441 = vsyncadd [#allocation4], 4294967264 }
 0x33f   :  { %2086 = vsyncpa [#allocation3], 1 }
 0x340   :  { %2087 = vsyncpa [#allocation4], 1 }
 0x341   :  { %2088 = vsyncpa [#allocation5], 1 }
 0x342   :  { %2089 = vsyncpa [#allocation6], 1 }

</bundles_post_ra>
